<compile_context>
chip_gen: v7x
topology: tpu7x:2x2x1
jax: 0.10.0
libtpu: 0.0.40
codegen_flags: <defaults>
</compile_context>

<pallas_src>
import jax
import jax.numpy as jnp
from jax.experimental import pallas as pl
from jax.experimental.pallas import tpu as pltpu


# ----------------------------------------------------------------------------- #
# Fused Seq2seq kernel: encoder GRU loop -> attention prep -> decoder GRU loop.
# Single grid step; all operands VMEM-resident; recurrence via lax.fori_loop.
# ----------------------------------------------------------------------------- #
def seq2seq_kernel(len_ref, x_ref, emb_ref,
                   wie_ref, whe_ref, bie_ref, bhe_ref,
                   wid_ref, whd_ref, bid_ref, bhd_ref,
                   wos_ref, woc_ref, bo_ref,
                   out_ref, enc_scr):
    T_enc, B, _ = x_ref.shape
    T_dec = emb_ref.shape[0]
    H = whe_ref.shape[0]

    lengths = len_ref[...]                               # (B, 1) int32

    # Hoist all weight/bias loads out of the recurrent loops.
    wie = wie_ref[...]; whe = whe_ref[...]; bie = bie_ref[...]; bhe = bhe_ref[...]
    wid = wid_ref[...]; whd = whd_ref[...]; bid = bid_ref[...]; bhd = bhd_ref[...]
    wos = wos_ref[...]; woc = woc_ref[...]; bo = bo_ref[...]

    def gru_cell(x, h, wi, wh, bi, bh):
        # Fused gates: one (B,3H) matmul per operand instead of three (B,H) ones.
        gi = jnp.dot(x, wi, preferred_element_type=jnp.float32) + bi
        gh = jnp.dot(h, wh, preferred_element_type=jnp.float32) + bh
        r = jax.nn.sigmoid(gi[:, :H] + gh[:, :H])
        z = jax.nn.sigmoid(gi[:, H:2 * H] + gh[:, H:2 * H])
        n = jnp.tanh(gi[:, 2 * H:] + r * gh[:, 2 * H:])
        return (1.0 - z) * n + z * h

    # -------------------- encoder (packed-sequence semantics) -------------------- #
    def enc_body(t, h):
        h_new = gru_cell(x_ref[t], h, wie, whe, bie, bhe)
        m = (lengths > t).astype(jnp.float32)            # (B, 1): 1 while t < length
        h_upd = m * h_new + (1.0 - m) * h                # freeze hidden past length
        enc_scr[t] = h_upd * m                           # zero outputs past length
        return h_upd

    h_final = jax.lax.fori_loop(0, T_enc, enc_body,
                                jnp.zeros((B, H), jnp.float32), unroll=True)

    # -------------------- attention prep (done once) -------------------- #
    enc_bth = jnp.transpose(enc_scr[...], (1, 0, 2))     # (B, T_enc, H)
    t_idx = jax.lax.broadcasted_iota(jnp.int32, (B, T_enc), 1)
    amask = (t_idx < lengths).astype(jnp.float32)        # (B, T_enc)

    # -------------------- decoder (teacher forcing) -------------------- #
    def dec_body(t, s):
        s_new = gru_cell(emb_ref[t], s, wid, whd, bid, bhd)

        # MXU attention (flash-style batched einsums, q-length = 1).
        scores = jnp.einsum('bqh,bth->bqt', s_new[:, None, :], enc_bth,
                            preferred_element_type=jnp.float32)[:, 0, :]   # (B, T_enc)
        scores = jnp.where(amask > 0, scores, -1e9)
        smax = jnp.max(scores, axis=-1, keepdims=True)
        p = jnp.exp(scores - smax) * amask
        denom = jnp.sum(p, axis=-1, keepdims=True) + 1e-9   # eps: zero-length rows stay finite
        attn = p / denom
        ctx = jnp.einsum('bqt,bth->bqh', attn[:, None, :], enc_bth,
                         preferred_element_type=jnp.float32)[:, 0, :]      # (B, H)

        logits = (jnp.dot(s_new, wos, preferred_element_type=jnp.float32)
                  + jnp.dot(ctx, woc, preferred_element_type=jnp.float32)
                  + bo)                                                    # (B, C_pad)
        lmax = jnp.max(logits, axis=-1, keepdims=True)
        lse = jnp.log(jnp.sum(jnp.exp(logits - lmax), axis=-1, keepdims=True)) + lmax
        out_ref[t] = logits - lse
        return s_new

    jax.lax.fori_loop(0, T_dec, dec_body, h_final, unroll=True)


# ----------------------------------------------------------------------------- #
# Parameter construction (deterministic, in-script).  GRU weights are fused
# along the gate axis: wi=(in,3H), wh=(H,3H), biases (1,3H), gate order [r,z,n].
# ----------------------------------------------------------------------------- #
def init_seq2seq_params(key, d_in, hidden, embed, num_classes):
    ks = jax.random.split(key, 12)
    sc = 0.1

    def w(k, shape):
        return sc * jax.random.normal(k, shape, jnp.float32)

    return dict(
        wi_e=w(ks[0], (d_in, 3 * hidden)), wh_e=w(ks[1], (hidden, 3 * hidden)),
        bi_e=w(ks[2], (1, 3 * hidden)),    bh_e=w(ks[3], (1, 3 * hidden)),
        wi_d=w(ks[4], (embed, 3 * hidden)), wh_d=w(ks[5], (hidden, 3 * hidden)),
        bi_d=w(ks[6], (1, 3 * hidden)),    bh_d=w(ks[7], (1, 3 * hidden)),
        embedding=w(ks[8], (num_classes, embed)),
        wout_s=w(ks[9], (hidden, num_classes)),
        wout_c=w(ks[10], (hidden, num_classes)),
        bout=w(ks[11], (1, num_classes)),
    )


# ----------------------------------------------------------------------------- #
# Wrapper: pad to lane/sublane-friendly shapes, call the fused kernel, slice back.
# ----------------------------------------------------------------------------- #
def seq2seq_forward(inputs, input_lengths, targets, params,
                    teacher_forcing_ratio: float = 1.0):
    """Equivalent of Seq2seq.forward: encoder -> decoder (full teacher forcing)."""
    # TODO(synk): teacher_forcing_ratio < 1.0 (sampled free-running decoding) requires
    # data-dependent argmax feedback; this kernel implements the ratio=1.0 path only.
    T_enc, B, D = inputs.shape
    T_dec = targets.shape[1]
    H = params['wh_e'].shape[0]
    C = params['wout_s'].shape[1]
    E = params['embedding'].shape[1]

    B_pad = ((B + 7) // 8) * 8            # sublane-friendly batch
    C_pad = ((C + 127) // 128) * 128      # lane-dense output (unmasked vst)

    # Pad batch; padded rows get length 0 (masked everywhere) and are sliced off.
    x = jnp.pad(inputs, ((0, 0), (0, B_pad - B), (0, 0)))
    lengths = jnp.pad(input_lengths.astype(jnp.int32), (0, B_pad - B)).reshape(B_pad, 1)
    tgt = jnp.pad(targets, ((0, B_pad - B), (0, 0)))

    # Glue: embedding lookup + time-major layout for the decoder inputs.
    emb = jnp.transpose(params['embedding'][tgt], (1, 0, 2))          # (T_dec, B_pad, E)

    # Lane-dense output projection: padded class columns get -1e9 bias so they
    # contribute exp(-inf)=0 to the in-kernel log_softmax.
    wout_s = jnp.pad(params['wout_s'], ((0, 0), (0, C_pad - C)))
    wout_c = jnp.pad(params['wout_c'], ((0, 0), (0, C_pad - C)))
    bout = jnp.pad(params['bout'], ((0, 0), (0, C_pad - C)), constant_values=-1e9)

    full = lambda shape: pl.BlockSpec(shape, lambda i: (0,) * len(shape))

    out_padded = pl.pallas_call(
        seq2seq_kernel,
        out_shape=jax.ShapeDtypeStruct((T_dec, B_pad, C_pad), jnp.float32),
        grid=(1,),
        in_specs=[full((B_pad, 1)),
                  full((T_enc, B_pad, D)),
                  full((T_dec, B_pad, E)),
                  full((D, 3 * H)), full((H, 3 * H)), full((1, 3 * H)), full((1, 3 * H)),
                  full((E, 3 * H)), full((H, 3 * H)), full((1, 3 * H)), full((1, 3 * H)),
                  full((H, C_pad)), full((H, C_pad)), full((1, C_pad))],
        out_specs=full((T_dec, B_pad, C_pad)),
        scratch_shapes=[pltpu.VMEM((T_enc, B_pad, H), jnp.float32)],
        compiler_params=pltpu.CompilerParams(dimension_semantics=("arbitrary",)),
    )(lengths, x, emb,
      params['wi_e'], params['wh_e'], params['bi_e'], params['bh_e'],
      params['wi_d'], params['wh_d'], params['bi_d'], params['bh_d'],
      wout_s, wout_c, bout)

    return out_padded[:, :B, :C]                                      # (T_dec, B, C)


if __name__ == "__main__":
    B, T_enc, D_in = 2, 8, 16
    H, E, T_dec, NUM_CLASSES = 32, 32, 6, 16

    key = jax.random.PRNGKey(0)
    k_params, k_x, k_tgt = jax.random.split(key, 3)

    params = init_seq2seq_params(k_params, D_in, H, E, NUM_CLASSES)

    inputs = jax.random.normal(k_x, (T_enc, B, D_in), jnp.float32)
    input_lengths = jnp.array([8, 5], dtype=jnp.int32)
    targets = jax.random.randint(k_tgt, (B, T_dec), 0, NUM_CLASSES, dtype=jnp.int32)

    out = seq2seq_forward(inputs, input_lengths, targets, params,
                          teacher_forcing_ratio=1.0)
    out = jax.block_until_ready(out)

    assert out.shape == (T_dec, B, NUM_CLASSES)
    assert bool(jnp.all(jnp.isfinite(out)))
    # rows of log-probs should sum to ~1 after exp
    assert bool(jnp.allclose(jnp.sum(jnp.exp(out), axis=-1), 1.0, atol=1e-4))
    print("KERNEL_OK")
</pallas_src>

<mosaic_0001>
module attributes {stable_mosaic.version = 11 : i64} {
  func.func @seq2seq_kernel(%arg0: i32, %arg1: memref<8x1xi32, #tpu.memory_space<vmem>>, %arg2: memref<8x8x16xf32, #tpu.memory_space<vmem>>, %arg3: memref<6x8x32xf32, #tpu.memory_space<vmem>>, %arg4: memref<16x96xf32, #tpu.memory_space<vmem>>, %arg5: memref<32x96xf32, #tpu.memory_space<vmem>>, %arg6: memref<1x96xf32, #tpu.memory_space<vmem>>, %arg7: memref<1x96xf32, #tpu.memory_space<vmem>>, %arg8: memref<32x96xf32, #tpu.memory_space<vmem>>, %arg9: memref<32x96xf32, #tpu.memory_space<vmem>>, %arg10: memref<1x96xf32, #tpu.memory_space<vmem>>, %arg11: memref<1x96xf32, #tpu.memory_space<vmem>>, %arg12: memref<32x128xf32, #tpu.memory_space<vmem>>, %arg13: memref<32x128xf32, #tpu.memory_space<vmem>>, %arg14: memref<1x128xf32, #tpu.memory_space<vmem>>, %arg15: memref<6x8x128xf32, #tpu.memory_space<vmem>>, %arg16: memref<8x8x32xf32, #tpu.memory_space<vmem>>) attributes {dimension_semantics = [#tpu.dimension_semantics<arbitrary>], iteration_bounds = array<i64: 1>, scalar_prefetch = 0 : i64, scratch_operands = 1 : i64, tpu.core_type = #tpu.core_type<tc>, window_params = [{pipeline_mode = #tpu.pipeline_mode<synchronous>, transform_indices = @transform_0, window_bounds = array<i64: 8, 1>}, {pipeline_mode = #tpu.pipeline_mode<synchronous>, transform_indices = @transform_1, window_bounds = array<i64: 8, 8, 16>}, {pipeline_mode = #tpu.pipeline_mode<synchronous>, transform_indices = @transform_2, window_bounds = array<i64: 6, 8, 32>}, {pipeline_mode = #tpu.pipeline_mode<synchronous>, transform_indices = @transform_3, window_bounds = array<i64: 16, 96>}, {pipeline_mode = #tpu.pipeline_mode<synchronous>, transform_indices = @transform_4, window_bounds = array<i64: 32, 96>}, {pipeline_mode = #tpu.pipeline_mode<synchronous>, transform_indices = @transform_5, window_bounds = array<i64: 1, 96>}, {pipeline_mode = #tpu.pipeline_mode<synchronous>, transform_indices = @transform_6, window_bounds = array<i64: 1, 96>}, {pipeline_mode = #tpu.pipeline_mode<synchronous>, transform_indices = @transform_7, window_bounds = array<i64: 32, 96>}, {pipeline_mode = #tpu.pipeline_mode<synchronous>, transform_indices = @transform_8, window_bounds = array<i64: 32, 96>}, {pipeline_mode = #tpu.pipeline_mode<synchronous>, transform_indices = @transform_9, window_bounds = array<i64: 1, 96>}, {pipeline_mode = #tpu.pipeline_mode<synchronous>, transform_indices = @transform_10, window_bounds = array<i64: 1, 96>}, {pipeline_mode = #tpu.pipeline_mode<synchronous>, transform_indices = @transform_11, window_bounds = array<i64: 32, 128>}, {pipeline_mode = #tpu.pipeline_mode<synchronous>, transform_indices = @transform_12, window_bounds = array<i64: 32, 128>}, {pipeline_mode = #tpu.pipeline_mode<synchronous>, transform_indices = @transform_13, window_bounds = array<i64: 1, 128>}, {pipeline_mode = #tpu.pipeline_mode<synchronous>, transform_indices = @transform_14, window_bounds = array<i64: 6, 8, 128>}]} {
    %c0 = arith.constant 0 : index
    %c0_0 = arith.constant 0 : index
    %0 = vector.load %arg1[%c0, %c0_0] : memref<8x1xi32, #tpu.memory_space<vmem>>, vector<8x1xi32>
    %c0_1 = arith.constant 0 : index
    %c0_2 = arith.constant 0 : index
    %1 = vector.load %arg4[%c0_1, %c0_2] : memref<16x96xf32, #tpu.memory_space<vmem>>, vector<16x96xf32>
    %c0_3 = arith.constant 0 : index
    %c0_4 = arith.constant 0 : index
    %2 = vector.load %arg5[%c0_3, %c0_4] : memref<32x96xf32, #tpu.memory_space<vmem>>, vector<32x96xf32>
    %c0_5 = arith.constant 0 : index
    %c0_6 = arith.constant 0 : index
    %3 = vector.load %arg6[%c0_5, %c0_6] : memref<1x96xf32, #tpu.memory_space<vmem>>, vector<1x96xf32>
    %c0_7 = arith.constant 0 : index
    %c0_8 = arith.constant 0 : index
    %4 = vector.load %arg7[%c0_7, %c0_8] : memref<1x96xf32, #tpu.memory_space<vmem>>, vector<1x96xf32>
    %c0_9 = arith.constant 0 : index
    %c0_10 = arith.constant 0 : index
    %5 = vector.load %arg8[%c0_9, %c0_10] : memref<32x96xf32, #tpu.memory_space<vmem>>, vector<32x96xf32>
    %c0_11 = arith.constant 0 : index
    %c0_12 = arith.constant 0 : index
    %6 = vector.load %arg9[%c0_11, %c0_12] : memref<32x96xf32, #tpu.memory_space<vmem>>, vector<32x96xf32>
    %c0_13 = arith.constant 0 : index
    %c0_14 = arith.constant 0 : index
    %7 = vector.load %arg10[%c0_13, %c0_14] : memref<1x96xf32, #tpu.memory_space<vmem>>, vector<1x96xf32>
    %c0_15 = arith.constant 0 : index
    %c0_16 = arith.constant 0 : index
    %8 = vector.load %arg11[%c0_15, %c0_16] : memref<1x96xf32, #tpu.memory_space<vmem>>, vector<1x96xf32>
    %c0_17 = arith.constant 0 : index
    %c0_18 = arith.constant 0 : index
    %9 = vector.load %arg12[%c0_17, %c0_18] : memref<32x128xf32, #tpu.memory_space<vmem>>, vector<32x128xf32>
    %c0_19 = arith.constant 0 : index
    %c0_20 = arith.constant 0 : index
    %10 = vector.load %arg13[%c0_19, %c0_20] : memref<32x128xf32, #tpu.memory_space<vmem>>, vector<32x128xf32>
    %c0_21 = arith.constant 0 : index
    %c0_22 = arith.constant 0 : index
    %11 = vector.load %arg14[%c0_21, %c0_22] : memref<1x128xf32, #tpu.memory_space<vmem>>, vector<1x128xf32>
    %cst = arith.constant 0.000000e+00 : f32
    %12 = vector.broadcast %cst : f32 to vector<8x32xf32>
    %c0_i32 = arith.constant 0 : i32
    %13 = arith.index_cast %c0_i32 : i32 to index
    %c0_23 = arith.constant 0 : index
    %c0_24 = arith.constant 0 : index
    %14 = vector.load %arg2[%13, %c0_23, %c0_24] : memref<8x8x16xf32, #tpu.memory_space<vmem>>, vector<1x8x16xf32>
    %15 = vector.shape_cast %14 : vector<1x8x16xf32> to vector<8x16xf32>
    %cst_25 = arith.constant dense<0.000000e+00> : vector<8x96xf32>
    %16 = tpu.matmul %15, %1, %cst_25 {dimension_numbers = #tpu.dot_dimension_numbers<[1], [0], [0], [1], [0, 0, 1, 1], [], []>} : vector<8x16xf32>, vector<16x96xf32>, vector<8x96xf32> -> vector<8x96xf32>
    %17 = vector.broadcast %3 : vector<1x96xf32> to vector<8x96xf32>
    %18 = arith.addf %16, %17 : vector<8x96xf32>
    %cst_26 = arith.constant dense<0.000000e+00> : vector<8x96xf32>
    %19 = tpu.matmul %12, %2, %cst_26 {dimension_numbers = #tpu.dot_dimension_numbers<[1], [0], [0], [1], [0, 0, 1, 1], [], []>} : vector<8x32xf32>, vector<32x96xf32>, vector<8x96xf32> -> vector<8x96xf32>
    %20 = vector.broadcast %4 : vector<1x96xf32> to vector<8x96xf32>
    %21 = arith.addf %19, %20 : vector<8x96xf32>
    %22 = vector.extract_strided_slice %18 {offsets = [0, 0], sizes = [8, 32], strides = [1, 1]} : vector<8x96xf32> to vector<8x32xf32>
    %23 = vector.extract_strided_slice %21 {offsets = [0, 0], sizes = [8, 32], strides = [1, 1]} : vector<8x96xf32> to vector<8x32xf32>
    %24 = arith.addf %22, %23 : vector<8x32xf32>
    %25 = arith.negf %24 : vector<8x32xf32>
    %26 = math.exp %25 : vector<8x32xf32>
    %cst_27 = arith.constant 1.000000e+00 : f32
    %27 = vector.broadcast %cst_27 : f32 to vector<8x32xf32>
    %28 = arith.addf %27, %26 : vector<8x32xf32>
    %29 = arith.divf %27, %28 : vector<8x32xf32>
    %30 = vector.extract_strided_slice %18 {offsets = [0, 32], sizes = [8, 32], strides = [1, 1]} : vector<8x96xf32> to vector<8x32xf32>
    %31 = vector.extract_strided_slice %21 {offsets = [0, 32], sizes = [8, 32], strides = [1, 1]} : vector<8x96xf32> to vector<8x32xf32>
    %32 = arith.addf %30, %31 : vector<8x32xf32>
    %33 = arith.negf %32 : vector<8x32xf32>
    %34 = math.exp %33 : vector<8x32xf32>
    %cst_28 = arith.constant 1.000000e+00 : f32
    %35 = vector.broadcast %cst_28 : f32 to vector<8x32xf32>
    %36 = arith.addf %35, %34 : vector<8x32xf32>
    %37 = arith.divf %35, %36 : vector<8x32xf32>
    %38 = vector.extract_strided_slice %18 {offsets = [0, 64], sizes = [8, 32], strides = [1, 1]} : vector<8x96xf32> to vector<8x32xf32>
    %39 = vector.extract_strided_slice %21 {offsets = [0, 64], sizes = [8, 32], strides = [1, 1]} : vector<8x96xf32> to vector<8x32xf32>
    %40 = arith.mulf %29, %39 : vector<8x32xf32>
    %41 = arith.addf %38, %40 : vector<8x32xf32>
    %42 = math.tanh %41 : vector<8x32xf32>
    %cst_29 = arith.constant 1.000000e+00 : f32
    %43 = vector.broadcast %cst_29 : f32 to vector<8x32xf32>
    %44 = arith.subf %43, %37 : vector<8x32xf32>
    %45 = arith.mulf %44, %42 : vector<8x32xf32>
    %46 = arith.mulf %37, %12 : vector<8x32xf32>
    %47 = arith.addf %45, %46 : vector<8x32xf32>
    %48 = vector.broadcast %c0_i32 : i32 to vector<8x1xi32>
    %49 = arith.cmpi sgt, %0, %48 : vector<8x1xi32>
    %50 = arith.extui %49 : vector<8x1xi1> to vector<8x1xi32>
    %51 = arith.sitofp %50 : vector<8x1xi32> to vector<8x1xf32>
    %52 = vector.broadcast %51 : vector<8x1xf32> to vector<8x32xf32>
    %53 = arith.mulf %52, %47 : vector<8x32xf32>
    %cst_30 = arith.constant 1.000000e+00 : f32
    %54 = vector.broadcast %cst_30 : f32 to vector<8x1xf32>
    %55 = arith.subf %54, %51 : vector<8x1xf32>
    %56 = vector.broadcast %55 : vector<8x1xf32> to vector<8x32xf32>
    %57 = arith.mulf %56, %12 : vector<8x32xf32>
    %58 = arith.addf %53, %57 : vector<8x32xf32>
    %59 = vector.broadcast %51 : vector<8x1xf32> to vector<8x32xf32>
    %60 = arith.mulf %58, %59 : vector<8x32xf32>
    %61 = arith.index_cast %c0_i32 : i32 to index
    %c0_31 = arith.constant 0 : index
    %c0_32 = arith.constant 0 : index
    %62 = vector.load %arg16[%61, %c0_31, %c0_32] : memref<8x8x32xf32, #tpu.memory_space<vmem>>, vector<1x8x32xf32>
    %63 = vector.shape_cast %62 : vector<1x8x32xf32> to vector<8x32xf32>
    %64 = vector.shape_cast %60 : vector<8x32xf32> to vector<1x8x32xf32>
    tpu.vector_store %arg16[%61, %c0_31, %c0_32], %64 {strides = array<i32>} : memref<8x8x32xf32, #tpu.memory_space<vmem>>, vector<1x8x32xf32>,
    %c1_i32 = arith.constant 1 : i32
    %65 = arith.index_cast %c1_i32 : i32 to index
    %c0_33 = arith.constant 0 : index
    %c0_34 = arith.constant 0 : index
    %66 = vector.load %arg2[%65, %c0_33, %c0_34] : memref<8x8x16xf32, #tpu.memory_space<vmem>>, vector<1x8x16xf32>
    %67 = vector.shape_cast %66 : vector<1x8x16xf32> to vector<8x16xf32>
    %cst_35 = arith.constant dense<0.000000e+00> : vector<8x96xf32>
    %68 = tpu.matmul %67, %1, %cst_35 {dimension_numbers = #tpu.dot_dimension_numbers<[1], [0], [0], [1], [0, 0, 1, 1], [], []>} : vector<8x16xf32>, vector<16x96xf32>, vector<8x96xf32> -> vector<8x96xf32>
    %69 = vector.broadcast %3 : vector<1x96xf32> to vector<8x96xf32>
    %70 = arith.addf %68, %69 : vector<8x96xf32>
    %cst_36 = arith.constant dense<0.000000e+00> : vector<8x96xf32>
    %71 = tpu.matmul %58, %2, %cst_36 {dimension_numbers = #tpu.dot_dimension_numbers<[1], [0], [0], [1], [0, 0, 1, 1], [], []>} : vector<8x32xf32>, vector<32x96xf32>, vector<8x96xf32> -> vector<8x96xf32>
    %72 = vector.broadcast %4 : vector<1x96xf32> to vector<8x96xf32>
    %73 = arith.addf %71, %72 : vector<8x96xf32>
    %74 = vector.extract_strided_slice %70 {offsets = [0, 0], sizes = [8, 32], strides = [1, 1]} : vector<8x96xf32> to vector<8x32xf32>
    %75 = vector.extract_strided_slice %73 {offsets = [0, 0], sizes = [8, 32], strides = [1, 1]} : vector<8x96xf32> to vector<8x32xf32>
    %76 = arith.addf %74, %75 : vector<8x32xf32>
    %77 = arith.negf %76 : vector<8x32xf32>
    %78 = math.exp %77 : vector<8x32xf32>
    %cst_37 = arith.constant 1.000000e+00 : f32
    %79 = vector.broadcast %cst_37 : f32 to vector<8x32xf32>
    %80 = arith.addf %79, %78 : vector<8x32xf32>
    %81 = arith.divf %79, %80 : vector<8x32xf32>
    %82 = vector.extract_strided_slice %70 {offsets = [0, 32], sizes = [8, 32], strides = [1, 1]} : vector<8x96xf32> to vector<8x32xf32>
    %83 = vector.extract_strided_slice %73 {offsets = [0, 32], sizes = [8, 32], strides = [1, 1]} : vector<8x96xf32> to vector<8x32xf32>
    %84 = arith.addf %82, %83 : vector<8x32xf32>
    %85 = arith.negf %84 : vector<8x32xf32>
    %86 = math.exp %85 : vector<8x32xf32>
    %cst_38 = arith.constant 1.000000e+00 : f32
    %87 = vector.broadcast %cst_38 : f32 to vector<8x32xf32>
    %88 = arith.addf %87, %86 : vector<8x32xf32>
    %89 = arith.divf %87, %88 : vector<8x32xf32>
    %90 = vector.extract_strided_slice %70 {offsets = [0, 64], sizes = [8, 32], strides = [1, 1]} : vector<8x96xf32> to vector<8x32xf32>
    %91 = vector.extract_strided_slice %73 {offsets = [0, 64], sizes = [8, 32], strides = [1, 1]} : vector<8x96xf32> to vector<8x32xf32>
    %92 = arith.mulf %81, %91 : vector<8x32xf32>
    %93 = arith.addf %90, %92 : vector<8x32xf32>
    %94 = math.tanh %93 : vector<8x32xf32>
    %cst_39 = arith.constant 1.000000e+00 : f32
    %95 = vector.broadcast %cst_39 : f32 to vector<8x32xf32>
    %96 = arith.subf %95, %89 : vector<8x32xf32>
    %97 = arith.mulf %96, %94 : vector<8x32xf32>
    %98 = arith.mulf %89, %58 : vector<8x32xf32>
    %99 = arith.addf %97, %98 : vector<8x32xf32>
    %100 = vector.broadcast %c1_i32 : i32 to vector<8x1xi32>
    %101 = arith.cmpi sgt, %0, %100 : vector<8x1xi32>
    %102 = arith.extui %101 : vector<8x1xi1> to vector<8x1xi32>
    %103 = arith.sitofp %102 : vector<8x1xi32> to vector<8x1xf32>
    %104 = vector.broadcast %103 : vector<8x1xf32> to vector<8x32xf32>
    %105 = arith.mulf %104, %99 : vector<8x32xf32>
    %cst_40 = arith.constant 1.000000e+00 : f32
    %106 = vector.broadcast %cst_40 : f32 to vector<8x1xf32>
    %107 = arith.subf %106, %103 : vector<8x1xf32>
    %108 = vector.broadcast %107 : vector<8x1xf32> to vector<8x32xf32>
    %109 = arith.mulf %108, %58 : vector<8x32xf32>
    %110 = arith.addf %105, %109 : vector<8x32xf32>
    %111 = vector.broadcast %103 : vector<8x1xf32> to vector<8x32xf32>
    %112 = arith.mulf %110, %111 : vector<8x32xf32>
    %113 = arith.index_cast %c1_i32 : i32 to index
    %c0_41 = arith.constant 0 : index
    %c0_42 = arith.constant 0 : index
    %114 = vector.load %arg16[%113, %c0_41, %c0_42] : memref<8x8x32xf32, #tpu.memory_space<vmem>>, vector<1x8x32xf32>
    %115 = vector.shape_cast %114 : vector<1x8x32xf32> to vector<8x32xf32>
    %116 = vector.shape_cast %112 : vector<8x32xf32> to vector<1x8x32xf32>
    tpu.vector_store %arg16[%113, %c0_41, %c0_42], %116 {strides = array<i32>} : memref<8x8x32xf32, #tpu.memory_space<vmem>>, vector<1x8x32xf32>,
    %c2_i32 = arith.constant 2 : i32
    %117 = arith.index_cast %c2_i32 : i32 to index
    %c0_43 = arith.constant 0 : index
    %c0_44 = arith.constant 0 : index
    %118 = vector.load %arg2[%117, %c0_43, %c0_44] : memref<8x8x16xf32, #tpu.memory_space<vmem>>, vector<1x8x16xf32>
    %119 = vector.shape_cast %118 : vector<1x8x16xf32> to vector<8x16xf32>
    %cst_45 = arith.constant dense<0.000000e+00> : vector<8x96xf32>
    %120 = tpu.matmul %119, %1, %cst_45 {dimension_numbers = #tpu.dot_dimension_numbers<[1], [0], [0], [1], [0, 0, 1, 1], [], []>} : vector<8x16xf32>, vector<16x96xf32>, vector<8x96xf32> -> vector<8x96xf32>
    %121 = vector.broadcast %3 : vector<1x96xf32> to vector<8x96xf32>
    %122 = arith.addf %120, %121 : vector<8x96xf32>
    %cst_46 = arith.constant dense<0.000000e+00> : vector<8x96xf32>
    %123 = tpu.matmul %110, %2, %cst_46 {dimension_numbers = #tpu.dot_dimension_numbers<[1], [0], [0], [1], [0, 0, 1, 1], [], []>} : vector<8x32xf32>, vector<32x96xf32>, vector<8x96xf32> -> vector<8x96xf32>
    %124 = vector.broadcast %4 : vector<1x96xf32> to vector<8x96xf32>
    %125 = arith.addf %123, %124 : vector<8x96xf32>
    %126 = vector.extract_strided_slice %122 {offsets = [0, 0], sizes = [8, 32], strides = [1, 1]} : vector<8x96xf32> to vector<8x32xf32>
    %127 = vector.extract_strided_slice %125 {offsets = [0, 0], sizes = [8, 32], strides = [1, 1]} : vector<8x96xf32> to vector<8x32xf32>
    %128 = arith.addf %126, %127 : vector<8x32xf32>
    %129 = arith.negf %128 : vector<8x32xf32>
    %130 = math.exp %129 : vector<8x32xf32>
    %cst_47 = arith.constant 1.000000e+00 : f32
    %131 = vector.broadcast %cst_47 : f32 to vector<8x32xf32>
    %132 = arith.addf %131, %130 : vector<8x32xf32>
    %133 = arith.divf %131, %132 : vector<8x32xf32>
    %134 = vector.extract_strided_slice %122 {offsets = [0, 32], sizes = [8, 32], strides = [1, 1]} : vector<8x96xf32> to vector<8x32xf32>
    %135 = vector.extract_strided_slice %125 {offsets = [0, 32], sizes = [8, 32], strides = [1, 1]} : vector<8x96xf32> to vector<8x32xf32>
    %136 = arith.addf %134, %135 : vector<8x32xf32>
    %137 = arith.negf %136 : vector<8x32xf32>
    %138 = math.exp %137 : vector<8x32xf32>
    %cst_48 = arith.constant 1.000000e+00 : f32
    %139 = vector.broadcast %cst_48 : f32 to vector<8x32xf32>
    %140 = arith.addf %139, %138 : vector<8x32xf32>
    %141 = arith.divf %139, %140 : vector<8x32xf32>
    %142 = vector.extract_strided_slice %122 {offsets = [0, 64], sizes = [8, 32], strides = [1, 1]} : vector<8x96xf32> to vector<8x32xf32>
    %143 = vector.extract_strided_slice %125 {offsets = [0, 64], sizes = [8, 32], strides = [1, 1]} : vector<8x96xf32> to vector<8x32xf32>
    %144 = arith.mulf %133, %143 : vector<8x32xf32>
    %145 = arith.addf %142, %144 : vector<8x32xf32>
    %146 = math.tanh %145 : vector<8x32xf32>
    %cst_49 = arith.constant 1.000000e+00 : f32
    %147 = vector.broadcast %cst_49 : f32 to vector<8x32xf32>
    %148 = arith.subf %147, %141 : vector<8x32xf32>
    %149 = arith.mulf %148, %146 : vector<8x32xf32>
    %150 = arith.mulf %141, %110 : vector<8x32xf32>
    %151 = arith.addf %149, %150 : vector<8x32xf32>
    %152 = vector.broadcast %c2_i32 : i32 to vector<8x1xi32>
    %153 = arith.cmpi sgt, %0, %152 : vector<8x1xi32>
    %154 = arith.extui %153 : vector<8x1xi1> to vector<8x1xi32>
    %155 = arith.sitofp %154 : vector<8x1xi32> to vector<8x1xf32>
    %156 = vector.broadcast %155 : vector<8x1xf32> to vector<8x32xf32>
    %157 = arith.mulf %156, %151 : vector<8x32xf32>
    %cst_50 = arith.constant 1.000000e+00 : f32
    %158 = vector.broadcast %cst_50 : f32 to vector<8x1xf32>
    %159 = arith.subf %158, %155 : vector<8x1xf32>
    %160 = vector.broadcast %159 : vector<8x1xf32> to vector<8x32xf32>
    %161 = arith.mulf %160, %110 : vector<8x32xf32>
    %162 = arith.addf %157, %161 : vector<8x32xf32>
    %163 = vector.broadcast %155 : vector<8x1xf32> to vector<8x32xf32>
    %164 = arith.mulf %162, %163 : vector<8x32xf32>
    %165 = arith.index_cast %c2_i32 : i32 to index
    %c0_51 = arith.constant 0 : index
    %c0_52 = arith.constant 0 : index
    %166 = vector.load %arg16[%165, %c0_51, %c0_52] : memref<8x8x32xf32, #tpu.memory_space<vmem>>, vector<1x8x32xf32>
    %167 = vector.shape_cast %166 : vector<1x8x32xf32> to vector<8x32xf32>
    %168 = vector.shape_cast %164 : vector<8x32xf32> to vector<1x8x32xf32>
    tpu.vector_store %arg16[%165, %c0_51, %c0_52], %168 {strides = array<i32>} : memref<8x8x32xf32, #tpu.memory_space<vmem>>, vector<1x8x32xf32>,
    %c3_i32 = arith.constant 3 : i32
    %169 = arith.index_cast %c3_i32 : i32 to index
    %c0_53 = arith.constant 0 : index
    %c0_54 = arith.constant 0 : index
    %170 = vector.load %arg2[%169, %c0_53, %c0_54] : memref<8x8x16xf32, #tpu.memory_space<vmem>>, vector<1x8x16xf32>
    %171 = vector.shape_cast %170 : vector<1x8x16xf32> to vector<8x16xf32>
    %cst_55 = arith.constant dense<0.000000e+00> : vector<8x96xf32>
    %172 = tpu.matmul %171, %1, %cst_55 {dimension_numbers = #tpu.dot_dimension_numbers<[1], [0], [0], [1], [0, 0, 1, 1], [], []>} : vector<8x16xf32>, vector<16x96xf32>, vector<8x96xf32> -> vector<8x96xf32>
    %173 = vector.broadcast %3 : vector<1x96xf32> to vector<8x96xf32>
    %174 = arith.addf %172, %173 : vector<8x96xf32>
    %cst_56 = arith.constant dense<0.000000e+00> : vector<8x96xf32>
    %175 = tpu.matmul %162, %2, %cst_56 {dimension_numbers = #tpu.dot_dimension_numbers<[1], [0], [0], [1], [0, 0, 1, 1], [], []>} : vector<8x32xf32>, vector<32x96xf32>, vector<8x96xf32> -> vector<8x96xf32>
    %176 = vector.broadcast %4 : vector<1x96xf32> to vector<8x96xf32>
    %177 = arith.addf %175, %176 : vector<8x96xf32>
    %178 = vector.extract_strided_slice %174 {offsets = [0, 0], sizes = [8, 32], strides = [1, 1]} : vector<8x96xf32> to vector<8x32xf32>
    %179 = vector.extract_strided_slice %177 {offsets = [0, 0], sizes = [8, 32], strides = [1, 1]} : vector<8x96xf32> to vector<8x32xf32>
    %180 = arith.addf %178, %179 : vector<8x32xf32>
    %181 = arith.negf %180 : vector<8x32xf32>
    %182 = math.exp %181 : vector<8x32xf32>
    %cst_57 = arith.constant 1.000000e+00 : f32
    %183 = vector.broadcast %cst_57 : f32 to vector<8x32xf32>
    %184 = arith.addf %183, %182 : vector<8x32xf32>
    %185 = arith.divf %183, %184 : vector<8x32xf32>
    %186 = vector.extract_strided_slice %174 {offsets = [0, 32], sizes = [8, 32], strides = [1, 1]} : vector<8x96xf32> to vector<8x32xf32>
    %187 = vector.extract_strided_slice %177 {offsets = [0, 32], sizes = [8, 32], strides = [1, 1]} : vector<8x96xf32> to vector<8x32xf32>
    %188 = arith.addf %186, %187 : vector<8x32xf32>
    %189 = arith.negf %188 : vector<8x32xf32>
    %190 = math.exp %189 : vector<8x32xf32>
    %cst_58 = arith.constant 1.000000e+00 : f32
    %191 = vector.broadcast %cst_58 : f32 to vector<8x32xf32>
    %192 = arith.addf %191, %190 : vector<8x32xf32>
    %193 = arith.divf %191, %192 : vector<8x32xf32>
    %194 = vector.extract_strided_slice %174 {offsets = [0, 64], sizes = [8, 32], strides = [1, 1]} : vector<8x96xf32> to vector<8x32xf32>
    %195 = vector.extract_strided_slice %177 {offsets = [0, 64], sizes = [8, 32], strides = [1, 1]} : vector<8x96xf32> to vector<8x32xf32>
    %196 = arith.mulf %185, %195 : vector<8x32xf32>
    %197 = arith.addf %194, %196 : vector<8x32xf32>
    %198 = math.tanh %197 : vector<8x32xf32>
    %cst_59 = arith.constant 1.000000e+00 : f32
    %199 = vector.broadcast %cst_59 : f32 to vector<8x32xf32>
    %200 = arith.subf %199, %193 : vector<8x32xf32>
    %201 = arith.mulf %200, %198 : vector<8x32xf32>
    %202 = arith.mulf %193, %162 : vector<8x32xf32>
    %203 = arith.addf %201, %202 : vector<8x32xf32>
    %204 = vector.broadcast %c3_i32 : i32 to vector<8x1xi32>
    %205 = arith.cmpi sgt, %0, %204 : vector<8x1xi32>
    %206 = arith.extui %205 : vector<8x1xi1> to vector<8x1xi32>
    %207 = arith.sitofp %206 : vector<8x1xi32> to vector<8x1xf32>
    %208 = vector.broadcast %207 : vector<8x1xf32> to vector<8x32xf32>
    %209 = arith.mulf %208, %203 : vector<8x32xf32>
    %cst_60 = arith.constant 1.000000e+00 : f32
    %210 = vector.broadcast %cst_60 : f32 to vector<8x1xf32>
    %211 = arith.subf %210, %207 : vector<8x1xf32>
    %212 = vector.broadcast %211 : vector<8x1xf32> to vector<8x32xf32>
    %213 = arith.mulf %212, %162 : vector<8x32xf32>
    %214 = arith.addf %209, %213 : vector<8x32xf32>
    %215 = vector.broadcast %207 : vector<8x1xf32> to vector<8x32xf32>
    %216 = arith.mulf %214, %215 : vector<8x32xf32>
    %217 = arith.index_cast %c3_i32 : i32 to index
    %c0_61 = arith.constant 0 : index
    %c0_62 = arith.constant 0 : index
    %218 = vector.load %arg16[%217, %c0_61, %c0_62] : memref<8x8x32xf32, #tpu.memory_space<vmem>>, vector<1x8x32xf32>
    %219 = vector.shape_cast %218 : vector<1x8x32xf32> to vector<8x32xf32>
    %220 = vector.shape_cast %216 : vector<8x32xf32> to vector<1x8x32xf32>
    tpu.vector_store %arg16[%217, %c0_61, %c0_62], %220 {strides = array<i32>} : memref<8x8x32xf32, #tpu.memory_space<vmem>>, vector<1x8x32xf32>,
    %c4_i32 = arith.constant 4 : i32
    %221 = arith.index_cast %c4_i32 : i32 to index
    %c0_63 = arith.constant 0 : index
    %c0_64 = arith.constant 0 : index
    %222 = vector.load %arg2[%221, %c0_63, %c0_64] : memref<8x8x16xf32, #tpu.memory_space<vmem>>, vector<1x8x16xf32>
    %223 = vector.shape_cast %222 : vector<1x8x16xf32> to vector<8x16xf32>
    %cst_65 = arith.constant dense<0.000000e+00> : vector<8x96xf32>
    %224 = tpu.matmul %223, %1, %cst_65 {dimension_numbers = #tpu.dot_dimension_numbers<[1], [0], [0], [1], [0, 0, 1, 1], [], []>} : vector<8x16xf32>, vector<16x96xf32>, vector<8x96xf32> -> vector<8x96xf32>
    %225 = vector.broadcast %3 : vector<1x96xf32> to vector<8x96xf32>
    %226 = arith.addf %224, %225 : vector<8x96xf32>
    %cst_66 = arith.constant dense<0.000000e+00> : vector<8x96xf32>
    %227 = tpu.matmul %214, %2, %cst_66 {dimension_numbers = #tpu.dot_dimension_numbers<[1], [0], [0], [1], [0, 0, 1, 1], [], []>} : vector<8x32xf32>, vector<32x96xf32>, vector<8x96xf32> -> vector<8x96xf32>
    %228 = vector.broadcast %4 : vector<1x96xf32> to vector<8x96xf32>
    %229 = arith.addf %227, %228 : vector<8x96xf32>
    %230 = vector.extract_strided_slice %226 {offsets = [0, 0], sizes = [8, 32], strides = [1, 1]} : vector<8x96xf32> to vector<8x32xf32>
    %231 = vector.extract_strided_slice %229 {offsets = [0, 0], sizes = [8, 32], strides = [1, 1]} : vector<8x96xf32> to vector<8x32xf32>
    %232 = arith.addf %230, %231 : vector<8x32xf32>
    %233 = arith.negf %232 : vector<8x32xf32>
    %234 = math.exp %233 : vector<8x32xf32>
    %cst_67 = arith.constant 1.000000e+00 : f32
    %235 = vector.broadcast %cst_67 : f32 to vector<8x32xf32>
    %236 = arith.addf %235, %234 : vector<8x32xf32>
    %237 = arith.divf %235, %236 : vector<8x32xf32>
    %238 = vector.extract_strided_slice %226 {offsets = [0, 32], sizes = [8, 32], strides = [1, 1]} : vector<8x96xf32> to vector<8x32xf32>
    %239 = vector.extract_strided_slice %229 {offsets = [0, 32], sizes = [8, 32], strides = [1, 1]} : vector<8x96xf32> to vector<8x32xf32>
    %240 = arith.addf %238, %239 : vector<8x32xf32>
    %241 = arith.negf %240 : vector<8x32xf32>
    %242 = math.exp %241 : vector<8x32xf32>
    %cst_68 = arith.constant 1.000000e+00 : f32
    %243 = vector.broadcast %cst_68 : f32 to vector<8x32xf32>
    %244 = arith.addf %243, %242 : vector<8x32xf32>
    %245 = arith.divf %243, %244 : vector<8x32xf32>
    %246 = vector.extract_strided_slice %226 {offsets = [0, 64], sizes = [8, 32], strides = [1, 1]} : vector<8x96xf32> to vector<8x32xf32>
    %247 = vector.extract_strided_slice %229 {offsets = [0, 64], sizes = [8, 32], strides = [1, 1]} : vector<8x96xf32> to vector<8x32xf32>
    %248 = arith.mulf %237, %247 : vector<8x32xf32>
    %249 = arith.addf %246, %248 : vector<8x32xf32>
    %250 = math.tanh %249 : vector<8x32xf32>
    %cst_69 = arith.constant 1.000000e+00 : f32
    %251 = vector.broadcast %cst_69 : f32 to vector<8x32xf32>
    %252 = arith.subf %251, %245 : vector<8x32xf32>
    %253 = arith.mulf %252, %250 : vector<8x32xf32>
    %254 = arith.mulf %245, %214 : vector<8x32xf32>
    %255 = arith.addf %253, %254 : vector<8x32xf32>
    %256 = vector.broadcast %c4_i32 : i32 to vector<8x1xi32>
    %257 = arith.cmpi sgt, %0, %256 : vector<8x1xi32>
    %258 = arith.extui %257 : vector<8x1xi1> to vector<8x1xi32>
    %259 = arith.sitofp %258 : vector<8x1xi32> to vector<8x1xf32>
    %260 = vector.broadcast %259 : vector<8x1xf32> to vector<8x32xf32>
    %261 = arith.mulf %260, %255 : vector<8x32xf32>
    %cst_70 = arith.constant 1.000000e+00 : f32
    %262 = vector.broadcast %cst_70 : f32 to vector<8x1xf32>
    %263 = arith.subf %262, %259 : vector<8x1xf32>
    %264 = vector.broadcast %263 : vector<8x1xf32> to vector<8x32xf32>
    %265 = arith.mulf %264, %214 : vector<8x32xf32>
    %266 = arith.addf %261, %265 : vector<8x32xf32>
    %267 = vector.broadcast %259 : vector<8x1xf32> to vector<8x32xf32>
    %268 = arith.mulf %266, %267 : vector<8x32xf32>
    %269 = arith.index_cast %c4_i32 : i32 to index
    %c0_71 = arith.constant 0 : index
    %c0_72 = arith.constant 0 : index
    %270 = vector.load %arg16[%269, %c0_71, %c0_72] : memref<8x8x32xf32, #tpu.memory_space<vmem>>, vector<1x8x32xf32>
    %271 = vector.shape_cast %270 : vector<1x8x32xf32> to vector<8x32xf32>
    %272 = vector.shape_cast %268 : vector<8x32xf32> to vector<1x8x32xf32>
    tpu.vector_store %arg16[%269, %c0_71, %c0_72], %272 {strides = array<i32>} : memref<8x8x32xf32, #tpu.memory_space<vmem>>, vector<1x8x32xf32>,
    %c5_i32 = arith.constant 5 : i32
    %273 = arith.index_cast %c5_i32 : i32 to index
    %c0_73 = arith.constant 0 : index
    %c0_74 = arith.constant 0 : index
    %274 = vector.load %arg2[%273, %c0_73, %c0_74] : memref<8x8x16xf32, #tpu.memory_space<vmem>>, vector<1x8x16xf32>
    %275 = vector.shape_cast %274 : vector<1x8x16xf32> to vector<8x16xf32>
    %cst_75 = arith.constant dense<0.000000e+00> : vector<8x96xf32>
    %276 = tpu.matmul %275, %1, %cst_75 {dimension_numbers = #tpu.dot_dimension_numbers<[1], [0], [0], [1], [0, 0, 1, 1], [], []>} : vector<8x16xf32>, vector<16x96xf32>, vector<8x96xf32> -> vector<8x96xf32>
    %277 = vector.broadcast %3 : vector<1x96xf32> to vector<8x96xf32>
    %278 = arith.addf %276, %277 : vector<8x96xf32>
    %cst_76 = arith.constant dense<0.000000e+00> : vector<8x96xf32>
    %279 = tpu.matmul %266, %2, %cst_76 {dimension_numbers = #tpu.dot_dimension_numbers<[1], [0], [0], [1], [0, 0, 1, 1], [], []>} : vector<8x32xf32>, vector<32x96xf32>, vector<8x96xf32> -> vector<8x96xf32>
    %280 = vector.broadcast %4 : vector<1x96xf32> to vector<8x96xf32>
    %281 = arith.addf %279, %280 : vector<8x96xf32>
    %282 = vector.extract_strided_slice %278 {offsets = [0, 0], sizes = [8, 32], strides = [1, 1]} : vector<8x96xf32> to vector<8x32xf32>
    %283 = vector.extract_strided_slice %281 {offsets = [0, 0], sizes = [8, 32], strides = [1, 1]} : vector<8x96xf32> to vector<8x32xf32>
    %284 = arith.addf %282, %283 : vector<8x32xf32>
    %285 = arith.negf %284 : vector<8x32xf32>
    %286 = math.exp %285 : vector<8x32xf32>
    %cst_77 = arith.constant 1.000000e+00 : f32
    %287 = vector.broadcast %cst_77 : f32 to vector<8x32xf32>
    %288 = arith.addf %287, %286 : vector<8x32xf32>
    %289 = arith.divf %287, %288 : vector<8x32xf32>
    %290 = vector.extract_strided_slice %278 {offsets = [0, 32], sizes = [8, 32], strides = [1, 1]} : vector<8x96xf32> to vector<8x32xf32>
    %291 = vector.extract_strided_slice %281 {offsets = [0, 32], sizes = [8, 32], strides = [1, 1]} : vector<8x96xf32> to vector<8x32xf32>
    %292 = arith.addf %290, %291 : vector<8x32xf32>
    %293 = arith.negf %292 : vector<8x32xf32>
    %294 = math.exp %293 : vector<8x32xf32>
    %cst_78 = arith.constant 1.000000e+00 : f32
    %295 = vector.broadcast %cst_78 : f32 to vector<8x32xf32>
    %296 = arith.addf %295, %294 : vector<8x32xf32>
    %297 = arith.divf %295, %296 : vector<8x32xf32>
    %298 = vector.extract_strided_slice %278 {offsets = [0, 64], sizes = [8, 32], strides = [1, 1]} : vector<8x96xf32> to vector<8x32xf32>
    %299 = vector.extract_strided_slice %281 {offsets = [0, 64], sizes = [8, 32], strides = [1, 1]} : vector<8x96xf32> to vector<8x32xf32>
    %300 = arith.mulf %289, %299 : vector<8x32xf32>
    %301 = arith.addf %298, %300 : vector<8x32xf32>
    %302 = math.tanh %301 : vector<8x32xf32>
    %cst_79 = arith.constant 1.000000e+00 : f32
    %303 = vector.broadcast %cst_79 : f32 to vector<8x32xf32>
    %304 = arith.subf %303, %297 : vector<8x32xf32>
    %305 = arith.mulf %304, %302 : vector<8x32xf32>
    %306 = arith.mulf %297, %266 : vector<8x32xf32>
    %307 = arith.addf %305, %306 : vector<8x32xf32>
    %308 = vector.broadcast %c5_i32 : i32 to vector<8x1xi32>
    %309 = arith.cmpi sgt, %0, %308 : vector<8x1xi32>
    %310 = arith.extui %309 : vector<8x1xi1> to vector<8x1xi32>
    %311 = arith.sitofp %310 : vector<8x1xi32> to vector<8x1xf32>
    %312 = vector.broadcast %311 : vector<8x1xf32> to vector<8x32xf32>
    %313 = arith.mulf %312, %307 : vector<8x32xf32>
    %cst_80 = arith.constant 1.000000e+00 : f32
    %314 = vector.broadcast %cst_80 : f32 to vector<8x1xf32>
    %315 = arith.subf %314, %311 : vector<8x1xf32>
    %316 = vector.broadcast %315 : vector<8x1xf32> to vector<8x32xf32>
    %317 = arith.mulf %316, %266 : vector<8x32xf32>
    %318 = arith.addf %313, %317 : vector<8x32xf32>
    %319 = vector.broadcast %311 : vector<8x1xf32> to vector<8x32xf32>
    %320 = arith.mulf %318, %319 : vector<8x32xf32>
    %321 = arith.index_cast %c5_i32 : i32 to index
    %c0_81 = arith.constant 0 : index
    %c0_82 = arith.constant 0 : index
    %322 = vector.load %arg16[%321, %c0_81, %c0_82] : memref<8x8x32xf32, #tpu.memory_space<vmem>>, vector<1x8x32xf32>
    %323 = vector.shape_cast %322 : vector<1x8x32xf32> to vector<8x32xf32>
    %324 = vector.shape_cast %320 : vector<8x32xf32> to vector<1x8x32xf32>
    tpu.vector_store %arg16[%321, %c0_81, %c0_82], %324 {strides = array<i32>} : memref<8x8x32xf32, #tpu.memory_space<vmem>>, vector<1x8x32xf32>,
    %c6_i32 = arith.constant 6 : i32
    %325 = arith.index_cast %c6_i32 : i32 to index
    %c0_83 = arith.constant 0 : index
    %c0_84 = arith.constant 0 : index
    %326 = vector.load %arg2[%325, %c0_83, %c0_84] : memref<8x8x16xf32, #tpu.memory_space<vmem>>, vector<1x8x16xf32>
    %327 = vector.shape_cast %326 : vector<1x8x16xf32> to vector<8x16xf32>
    %cst_85 = arith.constant dense<0.000000e+00> : vector<8x96xf32>
    %328 = tpu.matmul %327, %1, %cst_85 {dimension_numbers = #tpu.dot_dimension_numbers<[1], [0], [0], [1], [0, 0, 1, 1], [], []>} : vector<8x16xf32>, vector<16x96xf32>, vector<8x96xf32> -> vector<8x96xf32>
    %329 = vector.broadcast %3 : vector<1x96xf32> to vector<8x96xf32>
    %330 = arith.addf %328, %329 : vector<8x96xf32>
    %cst_86 = arith.constant dense<0.000000e+00> : vector<8x96xf32>
    %331 = tpu.matmul %318, %2, %cst_86 {dimension_numbers = #tpu.dot_dimension_numbers<[1], [0], [0], [1], [0, 0, 1, 1], [], []>} : vector<8x32xf32>, vector<32x96xf32>, vector<8x96xf32> -> vector<8x96xf32>
    %332 = vector.broadcast %4 : vector<1x96xf32> to vector<8x96xf32>
    %333 = arith.addf %331, %332 : vector<8x96xf32>
    %334 = vector.extract_strided_slice %330 {offsets = [0, 0], sizes = [8, 32], strides = [1, 1]} : vector<8x96xf32> to vector<8x32xf32>
    %335 = vector.extract_strided_slice %333 {offsets = [0, 0], sizes = [8, 32], strides = [1, 1]} : vector<8x96xf32> to vector<8x32xf32>
    %336 = arith.addf %334, %335 : vector<8x32xf32>
    %337 = arith.negf %336 : vector<8x32xf32>
    %338 = math.exp %337 : vector<8x32xf32>
    %cst_87 = arith.constant 1.000000e+00 : f32
    %339 = vector.broadcast %cst_87 : f32 to vector<8x32xf32>
    %340 = arith.addf %339, %338 : vector<8x32xf32>
    %341 = arith.divf %339, %340 : vector<8x32xf32>
    %342 = vector.extract_strided_slice %330 {offsets = [0, 32], sizes = [8, 32], strides = [1, 1]} : vector<8x96xf32> to vector<8x32xf32>
    %343 = vector.extract_strided_slice %333 {offsets = [0, 32], sizes = [8, 32], strides = [1, 1]} : vector<8x96xf32> to vector<8x32xf32>
    %344 = arith.addf %342, %343 : vector<8x32xf32>
    %345 = arith.negf %344 : vector<8x32xf32>
    %346 = math.exp %345 : vector<8x32xf32>
    %cst_88 = arith.constant 1.000000e+00 : f32
    %347 = vector.broadcast %cst_88 : f32 to vector<8x32xf32>
    %348 = arith.addf %347, %346 : vector<8x32xf32>
    %349 = arith.divf %347, %348 : vector<8x32xf32>
    %350 = vector.extract_strided_slice %330 {offsets = [0, 64], sizes = [8, 32], strides = [1, 1]} : vector<8x96xf32> to vector<8x32xf32>
    %351 = vector.extract_strided_slice %333 {offsets = [0, 64], sizes = [8, 32], strides = [1, 1]} : vector<8x96xf32> to vector<8x32xf32>
    %352 = arith.mulf %341, %351 : vector<8x32xf32>
    %353 = arith.addf %350, %352 : vector<8x32xf32>
    %354 = math.tanh %353 : vector<8x32xf32>
    %cst_89 = arith.constant 1.000000e+00 : f32
    %355 = vector.broadcast %cst_89 : f32 to vector<8x32xf32>
    %356 = arith.subf %355, %349 : vector<8x32xf32>
    %357 = arith.mulf %356, %354 : vector<8x32xf32>
    %358 = arith.mulf %349, %318 : vector<8x32xf32>
    %359 = arith.addf %357, %358 : vector<8x32xf32>
    %360 = vector.broadcast %c6_i32 : i32 to vector<8x1xi32>
    %361 = arith.cmpi sgt, %0, %360 : vector<8x1xi32>
    %362 = arith.extui %361 : vector<8x1xi1> to vector<8x1xi32>
    %363 = arith.sitofp %362 : vector<8x1xi32> to vector<8x1xf32>
    %364 = vector.broadcast %363 : vector<8x1xf32> to vector<8x32xf32>
    %365 = arith.mulf %364, %359 : vector<8x32xf32>
    %cst_90 = arith.constant 1.000000e+00 : f32
    %366 = vector.broadcast %cst_90 : f32 to vector<8x1xf32>
    %367 = arith.subf %366, %363 : vector<8x1xf32>
    %368 = vector.broadcast %367 : vector<8x1xf32> to vector<8x32xf32>
    %369 = arith.mulf %368, %318 : vector<8x32xf32>
    %370 = arith.addf %365, %369 : vector<8x32xf32>
    %371 = vector.broadcast %363 : vector<8x1xf32> to vector<8x32xf32>
    %372 = arith.mulf %370, %371 : vector<8x32xf32>
    %373 = arith.index_cast %c6_i32 : i32 to index
    %c0_91 = arith.constant 0 : index
    %c0_92 = arith.constant 0 : index
    %374 = vector.load %arg16[%373, %c0_91, %c0_92] : memref<8x8x32xf32, #tpu.memory_space<vmem>>, vector<1x8x32xf32>
    %375 = vector.shape_cast %374 : vector<1x8x32xf32> to vector<8x32xf32>
    %376 = vector.shape_cast %372 : vector<8x32xf32> to vector<1x8x32xf32>
    tpu.vector_store %arg16[%373, %c0_91, %c0_92], %376 {strides = array<i32>} : memref<8x8x32xf32, #tpu.memory_space<vmem>>, vector<1x8x32xf32>,
    %c7_i32 = arith.constant 7 : i32
    %377 = arith.index_cast %c7_i32 : i32 to index
    %c0_93 = arith.constant 0 : index
    %c0_94 = arith.constant 0 : index
    %378 = vector.load %arg2[%377, %c0_93, %c0_94] : memref<8x8x16xf32, #tpu.memory_space<vmem>>, vector<1x8x16xf32>
    %379 = vector.shape_cast %378 : vector<1x8x16xf32> to vector<8x16xf32>
    %cst_95 = arith.constant dense<0.000000e+00> : vector<8x96xf32>
    %380 = tpu.matmul %379, %1, %cst_95 {dimension_numbers = #tpu.dot_dimension_numbers<[1], [0], [0], [1], [0, 0, 1, 1], [], []>} : vector<8x16xf32>, vector<16x96xf32>, vector<8x96xf32> -> vector<8x96xf32>
    %381 = vector.broadcast %3 : vector<1x96xf32> to vector<8x96xf32>
    %382 = arith.addf %380, %381 : vector<8x96xf32>
    %cst_96 = arith.constant dense<0.000000e+00> : vector<8x96xf32>
    %383 = tpu.matmul %370, %2, %cst_96 {dimension_numbers = #tpu.dot_dimension_numbers<[1], [0], [0], [1], [0, 0, 1, 1], [], []>} : vector<8x32xf32>, vector<32x96xf32>, vector<8x96xf32> -> vector<8x96xf32>
    %384 = vector.broadcast %4 : vector<1x96xf32> to vector<8x96xf32>
    %385 = arith.addf %383, %384 : vector<8x96xf32>
    %386 = vector.extract_strided_slice %382 {offsets = [0, 0], sizes = [8, 32], strides = [1, 1]} : vector<8x96xf32> to vector<8x32xf32>
    %387 = vector.extract_strided_slice %385 {offsets = [0, 0], sizes = [8, 32], strides = [1, 1]} : vector<8x96xf32> to vector<8x32xf32>
    %388 = arith.addf %386, %387 : vector<8x32xf32>
    %389 = arith.negf %388 : vector<8x32xf32>
    %390 = math.exp %389 : vector<8x32xf32>
    %cst_97 = arith.constant 1.000000e+00 : f32
    %391 = vector.broadcast %cst_97 : f32 to vector<8x32xf32>
    %392 = arith.addf %391, %390 : vector<8x32xf32>
    %393 = arith.divf %391, %392 : vector<8x32xf32>
    %394 = vector.extract_strided_slice %382 {offsets = [0, 32], sizes = [8, 32], strides = [1, 1]} : vector<8x96xf32> to vector<8x32xf32>
    %395 = vector.extract_strided_slice %385 {offsets = [0, 32], sizes = [8, 32], strides = [1, 1]} : vector<8x96xf32> to vector<8x32xf32>
    %396 = arith.addf %394, %395 : vector<8x32xf32>
    %397 = arith.negf %396 : vector<8x32xf32>
    %398 = math.exp %397 : vector<8x32xf32>
    %cst_98 = arith.constant 1.000000e+00 : f32
    %399 = vector.broadcast %cst_98 : f32 to vector<8x32xf32>
    %400 = arith.addf %399, %398 : vector<8x32xf32>
    %401 = arith.divf %399, %400 : vector<8x32xf32>
    %402 = vector.extract_strided_slice %382 {offsets = [0, 64], sizes = [8, 32], strides = [1, 1]} : vector<8x96xf32> to vector<8x32xf32>
    %403 = vector.extract_strided_slice %385 {offsets = [0, 64], sizes = [8, 32], strides = [1, 1]} : vector<8x96xf32> to vector<8x32xf32>
    %404 = arith.mulf %393, %403 : vector<8x32xf32>
    %405 = arith.addf %402, %404 : vector<8x32xf32>
    %406 = math.tanh %405 : vector<8x32xf32>
    %cst_99 = arith.constant 1.000000e+00 : f32
    %407 = vector.broadcast %cst_99 : f32 to vector<8x32xf32>
    %408 = arith.subf %407, %401 : vector<8x32xf32>
    %409 = arith.mulf %408, %406 : vector<8x32xf32>
    %410 = arith.mulf %401, %370 : vector<8x32xf32>
    %411 = arith.addf %409, %410 : vector<8x32xf32>
    %412 = vector.broadcast %c7_i32 : i32 to vector<8x1xi32>
    %413 = arith.cmpi sgt, %0, %412 : vector<8x1xi32>
    %414 = arith.extui %413 : vector<8x1xi1> to vector<8x1xi32>
    %415 = arith.sitofp %414 : vector<8x1xi32> to vector<8x1xf32>
    %416 = vector.broadcast %415 : vector<8x1xf32> to vector<8x32xf32>
    %417 = arith.mulf %416, %411 : vector<8x32xf32>
    %cst_100 = arith.constant 1.000000e+00 : f32
    %418 = vector.broadcast %cst_100 : f32 to vector<8x1xf32>
    %419 = arith.subf %418, %415 : vector<8x1xf32>
    %420 = vector.broadcast %419 : vector<8x1xf32> to vector<8x32xf32>
    %421 = arith.mulf %420, %370 : vector<8x32xf32>
    %422 = arith.addf %417, %421 : vector<8x32xf32>
    %423 = vector.broadcast %415 : vector<8x1xf32> to vector<8x32xf32>
    %424 = arith.mulf %422, %423 : vector<8x32xf32>
    %425 = arith.index_cast %c7_i32 : i32 to index
    %c0_101 = arith.constant 0 : index
    %c0_102 = arith.constant 0 : index
    %426 = vector.load %arg16[%425, %c0_101, %c0_102] : memref<8x8x32xf32, #tpu.memory_space<vmem>>, vector<1x8x32xf32>
    %427 = vector.shape_cast %426 : vector<1x8x32xf32> to vector<8x32xf32>
    %428 = vector.shape_cast %424 : vector<8x32xf32> to vector<1x8x32xf32>
    tpu.vector_store %arg16[%425, %c0_101, %c0_102], %428 {strides = array<i32>} : memref<8x8x32xf32, #tpu.memory_space<vmem>>, vector<1x8x32xf32>,
    %c8_i32 = arith.constant 8 : i32
    %c0_103 = arith.constant 0 : index
    %c0_104 = arith.constant 0 : index
    %c0_105 = arith.constant 0 : index
    %429 = vector.load %arg16[%c0_103, %c0_104, %c0_105] : memref<8x8x32xf32, #tpu.memory_space<vmem>>, vector<8x8x32xf32>
    %430 = tpu.transpose %429, [1, 0, 2] : vector<8x8x32xf32> -> vector<8x8x32xf32>
    %431 = tpu.iota {dimensions = array<i32: 1>} : vector<8x8xi32>
    %432 = vector.broadcast %0 : vector<8x1xi32> to vector<8x8xi32>
    %433 = arith.cmpi slt, %431, %432 : vector<8x8xi32>
    %434 = arith.extui %433 : vector<8x8xi1> to vector<8x8xi32>
    %435 = arith.sitofp %434 : vector<8x8xi32> to vector<8x8xf32>
    %c0_i32_106 = arith.constant 0 : i32
    %436 = arith.index_cast %c0_i32_106 : i32 to index
    %c0_107 = arith.constant 0 : index
    %c0_108 = arith.constant 0 : index
    %437 = vector.load %arg3[%436, %c0_107, %c0_108] : memref<6x8x32xf32, #tpu.memory_space<vmem>>, vector<1x8x32xf32>
    %438 = vector.shape_cast %437 : vector<1x8x32xf32> to vector<8x32xf32>
    %cst_109 = arith.constant dense<0.000000e+00> : vector<8x96xf32>
    %439 = tpu.matmul %438, %5, %cst_109 {dimension_numbers = #tpu.dot_dimension_numbers<[1], [0], [0], [1], [0, 0, 1, 1], [], []>} : vector<8x32xf32>, vector<32x96xf32>, vector<8x96xf32> -> vector<8x96xf32>
    %440 = vector.broadcast %7 : vector<1x96xf32> to vector<8x96xf32>
    %441 = arith.addf %439, %440 : vector<8x96xf32>
    %cst_110 = arith.constant dense<0.000000e+00> : vector<8x96xf32>
    %442 = tpu.matmul %422, %6, %cst_110 {dimension_numbers = #tpu.dot_dimension_numbers<[1], [0], [0], [1], [0, 0, 1, 1], [], []>} : vector<8x32xf32>, vector<32x96xf32>, vector<8x96xf32> -> vector<8x96xf32>
    %443 = vector.broadcast %8 : vector<1x96xf32> to vector<8x96xf32>
    %444 = arith.addf %442, %443 : vector<8x96xf32>
    %445 = vector.extract_strided_slice %441 {offsets = [0, 0], sizes = [8, 32], strides = [1, 1]} : vector<8x96xf32> to vector<8x32xf32>
    %446 = vector.extract_strided_slice %444 {offsets = [0, 0], sizes = [8, 32], strides = [1, 1]} : vector<8x96xf32> to vector<8x32xf32>
    %447 = arith.addf %445, %446 : vector<8x32xf32>
    %448 = arith.negf %447 : vector<8x32xf32>
    %449 = math.exp %448 : vector<8x32xf32>
    %cst_111 = arith.constant 1.000000e+00 : f32
    %450 = vector.broadcast %cst_111 : f32 to vector<8x32xf32>
    %451 = arith.addf %450, %449 : vector<8x32xf32>
    %452 = arith.divf %450, %451 : vector<8x32xf32>
    %453 = vector.extract_strided_slice %441 {offsets = [0, 32], sizes = [8, 32], strides = [1, 1]} : vector<8x96xf32> to vector<8x32xf32>
    %454 = vector.extract_strided_slice %444 {offsets = [0, 32], sizes = [8, 32], strides = [1, 1]} : vector<8x96xf32> to vector<8x32xf32>
    %455 = arith.addf %453, %454 : vector<8x32xf32>
    %456 = arith.negf %455 : vector<8x32xf32>
    %457 = math.exp %456 : vector<8x32xf32>
    %cst_112 = arith.constant 1.000000e+00 : f32
    %458 = vector.broadcast %cst_112 : f32 to vector<8x32xf32>
    %459 = arith.addf %458, %457 : vector<8x32xf32>
    %460 = arith.divf %458, %459 : vector<8x32xf32>
    %461 = vector.extract_strided_slice %441 {offsets = [0, 64], sizes = [8, 32], strides = [1, 1]} : vector<8x96xf32> to vector<8x32xf32>
    %462 = vector.extract_strided_slice %444 {offsets = [0, 64], sizes = [8, 32], strides = [1, 1]} : vector<8x96xf32> to vector<8x32xf32>
    %463 = arith.mulf %452, %462 : vector<8x32xf32>
    %464 = arith.addf %461, %463 : vector<8x32xf32>
    %465 = math.tanh %464 : vector<8x32xf32>
    %cst_113 = arith.constant 1.000000e+00 : f32
    %466 = vector.broadcast %cst_113 : f32 to vector<8x32xf32>
    %467 = arith.subf %466, %460 : vector<8x32xf32>
    %468 = arith.mulf %467, %465 : vector<8x32xf32>
    %469 = arith.mulf %460, %422 : vector<8x32xf32>
    %470 = arith.addf %468, %469 : vector<8x32xf32>
    %471 = vector.shape_cast %470 : vector<8x32xf32> to vector<8x1x32xf32>
    "tpu.trace_start"() <{level = 10 : i32, message = "bqh,bth->bqt"}> : () -> ()
    %cst_114 = arith.constant dense<0.000000e+00> : vector<8x1x8xf32>
    %472 = tpu.matmul %471, %430, %cst_114 {dimension_numbers = #tpu.dot_dimension_numbers<[2], [2], [1], [1], [0, 0, 0, 1, 1, 1], [0], [0]>} : vector<8x1x32xf32>, vector<8x8x32xf32>, vector<8x1x8xf32> -> vector<8x1x8xf32>
    "tpu.trace_stop"() : () -> ()
    %473 = vector.shape_cast %472 : vector<8x1x8xf32> to vector<8x8xf32>
    %cst_115 = arith.constant 0.000000e+00 : f32
    %474 = vector.broadcast %cst_115 : f32 to vector<8x8xf32>
    %475 = arith.cmpf ogt, %435, %474 : vector<8x8xf32>
    %cst_116 = arith.constant -1.000000e+09 : f32
    %476 = vector.broadcast %cst_116 : f32 to vector<8x8xf32>
    %477 = arith.select %475, %473, %476 : vector<8x8xi1>, vector<8x8xf32>
    %cst_117 = arith.constant dense<0xFF800000> : vector<8xf32>
    %478 = vector.multi_reduction <maximumf>, %477, %cst_117 [1] : vector<8x8xf32> to vector<8xf32>
    %479 = vector.shape_cast %478 : vector<8xf32> to vector<8x1xf32>
    %480 = vector.broadcast %479 : vector<8x1xf32> to vector<8x8xf32>
    %481 = arith.subf %477, %480 : vector<8x8xf32>
    %482 = math.exp %481 : vector<8x8xf32>
    %483 = arith.mulf %482, %435 : vector<8x8xf32>
    %cst_118 = arith.constant dense<0.000000e+00> : vector<8xf32>
    %484 = vector.multi_reduction <add>, %483, %cst_118 [1] : vector<8x8xf32> to vector<8xf32>
    %485 = vector.shape_cast %484 : vector<8xf32> to vector<8x1xf32>
    %cst_119 = arith.constant 9.99999971E-10 : f32
    %486 = vector.broadcast %cst_119 : f32 to vector<8x1xf32>
    %487 = arith.addf %485, %486 : vector<8x1xf32>
    %488 = vector.broadcast %487 : vector<8x1xf32> to vector<8x8xf32>
    %489 = arith.divf %483, %488 : vector<8x8xf32>
    %490 = vector.shape_cast %489 : vector<8x8xf32> to vector<8x1x8xf32>
    "tpu.trace_start"() <{level = 10 : i32, message = "bqt,bth->bqh"}> : () -> ()
    %cst_120 = arith.constant dense<0.000000e+00> : vector<8x1x32xf32>
    %491 = tpu.matmul %490, %430, %cst_120 {dimension_numbers = #tpu.dot_dimension_numbers<[2], [1], [1], [2], [0, 0, 0, 1, 1, 2], [0], [0]>} : vector<8x1x8xf32>, vector<8x8x32xf32>, vector<8x1x32xf32> -> vector<8x1x32xf32>
    "tpu.trace_stop"() : () -> ()
    %492 = vector.shape_cast %491 : vector<8x1x32xf32> to vector<8x32xf32>
    %cst_121 = arith.constant dense<0.000000e+00> : vector<8x128xf32>
    %493 = tpu.matmul %470, %9, %cst_121 {dimension_numbers = #tpu.dot_dimension_numbers<[1], [0], [0], [1], [0, 0, 1, 1], [], []>} : vector<8x32xf32>, vector<32x128xf32>, vector<8x128xf32> -> vector<8x128xf32>
    %cst_122 = arith.constant dense<0.000000e+00> : vector<8x128xf32>
    %494 = tpu.matmul %492, %10, %cst_122 {dimension_numbers = #tpu.dot_dimension_numbers<[1], [0], [0], [1], [0, 0, 1, 1], [], []>} : vector<8x32xf32>, vector<32x128xf32>, vector<8x128xf32> -> vector<8x128xf32>
    %495 = arith.addf %493, %494 : vector<8x128xf32>
    %496 = vector.broadcast %11 : vector<1x128xf32> to vector<8x128xf32>
    %497 = arith.addf %495, %496 : vector<8x128xf32>
    %cst_123 = arith.constant dense<0xFF800000> : vector<8xf32>
    %498 = vector.multi_reduction <maximumf>, %497, %cst_123 [1] : vector<8x128xf32> to vector<8xf32>
    %499 = vector.shape_cast %498 : vector<8xf32> to vector<8x1xf32>
    %500 = vector.broadcast %499 : vector<8x1xf32> to vector<8x128xf32>
    %501 = arith.subf %497, %500 : vector<8x128xf32>
    %502 = math.exp %501 : vector<8x128xf32>
    %cst_124 = arith.constant dense<0.000000e+00> : vector<8xf32>
    %503 = vector.multi_reduction <add>, %502, %cst_124 [1] : vector<8x128xf32> to vector<8xf32>
    %504 = vector.shape_cast %503 : vector<8xf32> to vector<8x1xf32>
    %505 = math.log %504 : vector<8x1xf32>
    %506 = arith.addf %505, %499 : vector<8x1xf32>
    %507 = vector.broadcast %506 : vector<8x1xf32> to vector<8x128xf32>
    %508 = arith.subf %497, %507 : vector<8x128xf32>
    %509 = arith.index_cast %c0_i32_106 : i32 to index
    %c0_125 = arith.constant 0 : index
    %c0_126 = arith.constant 0 : index
    %510 = vector.load %arg15[%509, %c0_125, %c0_126] : memref<6x8x128xf32, #tpu.memory_space<vmem>>, vector<1x8x128xf32>
    %511 = vector.shape_cast %510 : vector<1x8x128xf32> to vector<8x128xf32>
    %512 = vector.shape_cast %508 : vector<8x128xf32> to vector<1x8x128xf32>
    tpu.vector_store %arg15[%509, %c0_125, %c0_126], %512 {strides = array<i32>} : memref<6x8x128xf32, #tpu.memory_space<vmem>>, vector<1x8x128xf32>,
    %c1_i32_127 = arith.constant 1 : i32
    %513 = arith.index_cast %c1_i32_127 : i32 to index
    %c0_128 = arith.constant 0 : index
    %c0_129 = arith.constant 0 : index
    %514 = vector.load %arg3[%513, %c0_128, %c0_129] : memref<6x8x32xf32, #tpu.memory_space<vmem>>, vector<1x8x32xf32>
    %515 = vector.shape_cast %514 : vector<1x8x32xf32> to vector<8x32xf32>
    %cst_130 = arith.constant dense<0.000000e+00> : vector<8x96xf32>
    %516 = tpu.matmul %515, %5, %cst_130 {dimension_numbers = #tpu.dot_dimension_numbers<[1], [0], [0], [1], [0, 0, 1, 1], [], []>} : vector<8x32xf32>, vector<32x96xf32>, vector<8x96xf32> -> vector<8x96xf32>
    %517 = vector.broadcast %7 : vector<1x96xf32> to vector<8x96xf32>
    %518 = arith.addf %516, %517 : vector<8x96xf32>
    %cst_131 = arith.constant dense<0.000000e+00> : vector<8x96xf32>
    %519 = tpu.matmul %470, %6, %cst_131 {dimension_numbers = #tpu.dot_dimension_numbers<[1], [0], [0], [1], [0, 0, 1, 1], [], []>} : vector<8x32xf32>, vector<32x96xf32>, vector<8x96xf32> -> vector<8x96xf32>
    %520 = vector.broadcast %8 : vector<1x96xf32> to vector<8x96xf32>
    %521 = arith.addf %519, %520 : vector<8x96xf32>
    %522 = vector.extract_strided_slice %518 {offsets = [0, 0], sizes = [8, 32], strides = [1, 1]} : vector<8x96xf32> to vector<8x32xf32>
    %523 = vector.extract_strided_slice %521 {offsets = [0, 0], sizes = [8, 32], strides = [1, 1]} : vector<8x96xf32> to vector<8x32xf32>
    %524 = arith.addf %522, %523 : vector<8x32xf32>
    %525 = arith.negf %524 : vector<8x32xf32>
    %526 = math.exp %525 : vector<8x32xf32>
    %cst_132 = arith.constant 1.000000e+00 : f32
    %527 = vector.broadcast %cst_132 : f32 to vector<8x32xf32>
    %528 = arith.addf %527, %526 : vector<8x32xf32>
    %529 = arith.divf %527, %528 : vector<8x32xf32>
    %530 = vector.extract_strided_slice %518 {offsets = [0, 32], sizes = [8, 32], strides = [1, 1]} : vector<8x96xf32> to vector<8x32xf32>
    %531 = vector.extract_strided_slice %521 {offsets = [0, 32], sizes = [8, 32], strides = [1, 1]} : vector<8x96xf32> to vector<8x32xf32>
    %532 = arith.addf %530, %531 : vector<8x32xf32>
    %533 = arith.negf %532 : vector<8x32xf32>
    %534 = math.exp %533 : vector<8x32xf32>
    %cst_133 = arith.constant 1.000000e+00 : f32
    %535 = vector.broadcast %cst_133 : f32 to vector<8x32xf32>
    %536 = arith.addf %535, %534 : vector<8x32xf32>
    %537 = arith.divf %535, %536 : vector<8x32xf32>
    %538 = vector.extract_strided_slice %518 {offsets = [0, 64], sizes = [8, 32], strides = [1, 1]} : vector<8x96xf32> to vector<8x32xf32>
    %539 = vector.extract_strided_slice %521 {offsets = [0, 64], sizes = [8, 32], strides = [1, 1]} : vector<8x96xf32> to vector<8x32xf32>
    %540 = arith.mulf %529, %539 : vector<8x32xf32>
    %541 = arith.addf %538, %540 : vector<8x32xf32>
    %542 = math.tanh %541 : vector<8x32xf32>
    %cst_134 = arith.constant 1.000000e+00 : f32
    %543 = vector.broadcast %cst_134 : f32 to vector<8x32xf32>
    %544 = arith.subf %543, %537 : vector<8x32xf32>
    %545 = arith.mulf %544, %542 : vector<8x32xf32>
    %546 = arith.mulf %537, %470 : vector<8x32xf32>
    %547 = arith.addf %545, %546 : vector<8x32xf32>
    %548 = vector.shape_cast %547 : vector<8x32xf32> to vector<8x1x32xf32>
    "tpu.trace_start"() <{level = 10 : i32, message = "bqh,bth->bqt"}> : () -> ()
    %cst_135 = arith.constant dense<0.000000e+00> : vector<8x1x8xf32>
    %549 = tpu.matmul %548, %430, %cst_135 {dimension_numbers = #tpu.dot_dimension_numbers<[2], [2], [1], [1], [0, 0, 0, 1, 1, 1], [0], [0]>} : vector<8x1x32xf32>, vector<8x8x32xf32>, vector<8x1x8xf32> -> vector<8x1x8xf32>
    "tpu.trace_stop"() : () -> ()
    %550 = vector.shape_cast %549 : vector<8x1x8xf32> to vector<8x8xf32>
    %cst_136 = arith.constant 0.000000e+00 : f32
    %551 = vector.broadcast %cst_136 : f32 to vector<8x8xf32>
    %552 = arith.cmpf ogt, %435, %551 : vector<8x8xf32>
    %cst_137 = arith.constant -1.000000e+09 : f32
    %553 = vector.broadcast %cst_137 : f32 to vector<8x8xf32>
    %554 = arith.select %552, %550, %553 : vector<8x8xi1>, vector<8x8xf32>
    %cst_138 = arith.constant dense<0xFF800000> : vector<8xf32>
    %555 = vector.multi_reduction <maximumf>, %554, %cst_138 [1] : vector<8x8xf32> to vector<8xf32>
    %556 = vector.shape_cast %555 : vector<8xf32> to vector<8x1xf32>
    %557 = vector.broadcast %556 : vector<8x1xf32> to vector<8x8xf32>
    %558 = arith.subf %554, %557 : vector<8x8xf32>
    %559 = math.exp %558 : vector<8x8xf32>
    %560 = arith.mulf %559, %435 : vector<8x8xf32>
    %cst_139 = arith.constant dense<0.000000e+00> : vector<8xf32>
    %561 = vector.multi_reduction <add>, %560, %cst_139 [1] : vector<8x8xf32> to vector<8xf32>
    %562 = vector.shape_cast %561 : vector<8xf32> to vector<8x1xf32>
    %cst_140 = arith.constant 9.99999971E-10 : f32
    %563 = vector.broadcast %cst_140 : f32 to vector<8x1xf32>
    %564 = arith.addf %562, %563 : vector<8x1xf32>
    %565 = vector.broadcast %564 : vector<8x1xf32> to vector<8x8xf32>
    %566 = arith.divf %560, %565 : vector<8x8xf32>
    %567 = vector.shape_cast %566 : vector<8x8xf32> to vector<8x1x8xf32>
    "tpu.trace_start"() <{level = 10 : i32, message = "bqt,bth->bqh"}> : () -> ()
    %cst_141 = arith.constant dense<0.000000e+00> : vector<8x1x32xf32>
    %568 = tpu.matmul %567, %430, %cst_141 {dimension_numbers = #tpu.dot_dimension_numbers<[2], [1], [1], [2], [0, 0, 0, 1, 1, 2], [0], [0]>} : vector<8x1x8xf32>, vector<8x8x32xf32>, vector<8x1x32xf32> -> vector<8x1x32xf32>
    "tpu.trace_stop"() : () -> ()
    %569 = vector.shape_cast %568 : vector<8x1x32xf32> to vector<8x32xf32>
    %cst_142 = arith.constant dense<0.000000e+00> : vector<8x128xf32>
    %570 = tpu.matmul %547, %9, %cst_142 {dimension_numbers = #tpu.dot_dimension_numbers<[1], [0], [0], [1], [0, 0, 1, 1], [], []>} : vector<8x32xf32>, vector<32x128xf32>, vector<8x128xf32> -> vector<8x128xf32>
    %cst_143 = arith.constant dense<0.000000e+00> : vector<8x128xf32>
    %571 = tpu.matmul %569, %10, %cst_143 {dimension_numbers = #tpu.dot_dimension_numbers<[1], [0], [0], [1], [0, 0, 1, 1], [], []>} : vector<8x32xf32>, vector<32x128xf32>, vector<8x128xf32> -> vector<8x128xf32>
    %572 = arith.addf %570, %571 : vector<8x128xf32>
    %573 = vector.broadcast %11 : vector<1x128xf32> to vector<8x128xf32>
    %574 = arith.addf %572, %573 : vector<8x128xf32>
    %cst_144 = arith.constant dense<0xFF800000> : vector<8xf32>
    %575 = vector.multi_reduction <maximumf>, %574, %cst_144 [1] : vector<8x128xf32> to vector<8xf32>
    %576 = vector.shape_cast %575 : vector<8xf32> to vector<8x1xf32>
    %577 = vector.broadcast %576 : vector<8x1xf32> to vector<8x128xf32>
    %578 = arith.subf %574, %577 : vector<8x128xf32>
    %579 = math.exp %578 : vector<8x128xf32>
    %cst_145 = arith.constant dense<0.000000e+00> : vector<8xf32>
    %580 = vector.multi_reduction <add>, %579, %cst_145 [1] : vector<8x128xf32> to vector<8xf32>
    %581 = vector.shape_cast %580 : vector<8xf32> to vector<8x1xf32>
    %582 = math.log %581 : vector<8x1xf32>
    %583 = arith.addf %582, %576 : vector<8x1xf32>
    %584 = vector.broadcast %583 : vector<8x1xf32> to vector<8x128xf32>
    %585 = arith.subf %574, %584 : vector<8x128xf32>
    %586 = arith.index_cast %c1_i32_127 : i32 to index
    %c0_146 = arith.constant 0 : index
    %c0_147 = arith.constant 0 : index
    %587 = vector.load %arg15[%586, %c0_146, %c0_147] : memref<6x8x128xf32, #tpu.memory_space<vmem>>, vector<1x8x128xf32>
    %588 = vector.shape_cast %587 : vector<1x8x128xf32> to vector<8x128xf32>
    %589 = vector.shape_cast %585 : vector<8x128xf32> to vector<1x8x128xf32>
    tpu.vector_store %arg15[%586, %c0_146, %c0_147], %589 {strides = array<i32>} : memref<6x8x128xf32, #tpu.memory_space<vmem>>, vector<1x8x128xf32>,
    %c2_i32_148 = arith.constant 2 : i32
    %590 = arith.index_cast %c2_i32_148 : i32 to index
    %c0_149 = arith.constant 0 : index
    %c0_150 = arith.constant 0 : index
    %591 = vector.load %arg3[%590, %c0_149, %c0_150] : memref<6x8x32xf32, #tpu.memory_space<vmem>>, vector<1x8x32xf32>
    %592 = vector.shape_cast %591 : vector<1x8x32xf32> to vector<8x32xf32>
    %cst_151 = arith.constant dense<0.000000e+00> : vector<8x96xf32>
    %593 = tpu.matmul %592, %5, %cst_151 {dimension_numbers = #tpu.dot_dimension_numbers<[1], [0], [0], [1], [0, 0, 1, 1], [], []>} : vector<8x32xf32>, vector<32x96xf32>, vector<8x96xf32> -> vector<8x96xf32>
    %594 = vector.broadcast %7 : vector<1x96xf32> to vector<8x96xf32>
    %595 = arith.addf %593, %594 : vector<8x96xf32>
    %cst_152 = arith.constant dense<0.000000e+00> : vector<8x96xf32>
    %596 = tpu.matmul %547, %6, %cst_152 {dimension_numbers = #tpu.dot_dimension_numbers<[1], [0], [0], [1], [0, 0, 1, 1], [], []>} : vector<8x32xf32>, vector<32x96xf32>, vector<8x96xf32> -> vector<8x96xf32>
    %597 = vector.broadcast %8 : vector<1x96xf32> to vector<8x96xf32>
    %598 = arith.addf %596, %597 : vector<8x96xf32>
    %599 = vector.extract_strided_slice %595 {offsets = [0, 0], sizes = [8, 32], strides = [1, 1]} : vector<8x96xf32> to vector<8x32xf32>
    %600 = vector.extract_strided_slice %598 {offsets = [0, 0], sizes = [8, 32], strides = [1, 1]} : vector<8x96xf32> to vector<8x32xf32>
    %601 = arith.addf %599, %600 : vector<8x32xf32>
    %602 = arith.negf %601 : vector<8x32xf32>
    %603 = math.exp %602 : vector<8x32xf32>
    %cst_153 = arith.constant 1.000000e+00 : f32
    %604 = vector.broadcast %cst_153 : f32 to vector<8x32xf32>
    %605 = arith.addf %604, %603 : vector<8x32xf32>
    %606 = arith.divf %604, %605 : vector<8x32xf32>
    %607 = vector.extract_strided_slice %595 {offsets = [0, 32], sizes = [8, 32], strides = [1, 1]} : vector<8x96xf32> to vector<8x32xf32>
    %608 = vector.extract_strided_slice %598 {offsets = [0, 32], sizes = [8, 32], strides = [1, 1]} : vector<8x96xf32> to vector<8x32xf32>
    %609 = arith.addf %607, %608 : vector<8x32xf32>
    %610 = arith.negf %609 : vector<8x32xf32>
    %611 = math.exp %610 : vector<8x32xf32>
    %cst_154 = arith.constant 1.000000e+00 : f32
    %612 = vector.broadcast %cst_154 : f32 to vector<8x32xf32>
    %613 = arith.addf %612, %611 : vector<8x32xf32>
    %614 = arith.divf %612, %613 : vector<8x32xf32>
    %615 = vector.extract_strided_slice %595 {offsets = [0, 64], sizes = [8, 32], strides = [1, 1]} : vector<8x96xf32> to vector<8x32xf32>
    %616 = vector.extract_strided_slice %598 {offsets = [0, 64], sizes = [8, 32], strides = [1, 1]} : vector<8x96xf32> to vector<8x32xf32>
    %617 = arith.mulf %606, %616 : vector<8x32xf32>
    %618 = arith.addf %615, %617 : vector<8x32xf32>
    %619 = math.tanh %618 : vector<8x32xf32>
    %cst_155 = arith.constant 1.000000e+00 : f32
    %620 = vector.broadcast %cst_155 : f32 to vector<8x32xf32>
    %621 = arith.subf %620, %614 : vector<8x32xf32>
    %622 = arith.mulf %621, %619 : vector<8x32xf32>
    %623 = arith.mulf %614, %547 : vector<8x32xf32>
    %624 = arith.addf %622, %623 : vector<8x32xf32>
    %625 = vector.shape_cast %624 : vector<8x32xf32> to vector<8x1x32xf32>
    "tpu.trace_start"() <{level = 10 : i32, message = "bqh,bth->bqt"}> : () -> ()
    %cst_156 = arith.constant dense<0.000000e+00> : vector<8x1x8xf32>
    %626 = tpu.matmul %625, %430, %cst_156 {dimension_numbers = #tpu.dot_dimension_numbers<[2], [2], [1], [1], [0, 0, 0, 1, 1, 1], [0], [0]>} : vector<8x1x32xf32>, vector<8x8x32xf32>, vector<8x1x8xf32> -> vector<8x1x8xf32>
    "tpu.trace_stop"() : () -> ()
    %627 = vector.shape_cast %626 : vector<8x1x8xf32> to vector<8x8xf32>
    %cst_157 = arith.constant 0.000000e+00 : f32
    %628 = vector.broadcast %cst_157 : f32 to vector<8x8xf32>
    %629 = arith.cmpf ogt, %435, %628 : vector<8x8xf32>
    %cst_158 = arith.constant -1.000000e+09 : f32
    %630 = vector.broadcast %cst_158 : f32 to vector<8x8xf32>
    %631 = arith.select %629, %627, %630 : vector<8x8xi1>, vector<8x8xf32>
    %cst_159 = arith.constant dense<0xFF800000> : vector<8xf32>
    %632 = vector.multi_reduction <maximumf>, %631, %cst_159 [1] : vector<8x8xf32> to vector<8xf32>
    %633 = vector.shape_cast %632 : vector<8xf32> to vector<8x1xf32>
    %634 = vector.broadcast %633 : vector<8x1xf32> to vector<8x8xf32>
    %635 = arith.subf %631, %634 : vector<8x8xf32>
    %636 = math.exp %635 : vector<8x8xf32>
    %637 = arith.mulf %636, %435 : vector<8x8xf32>
    %cst_160 = arith.constant dense<0.000000e+00> : vector<8xf32>
    %638 = vector.multi_reduction <add>, %637, %cst_160 [1] : vector<8x8xf32> to vector<8xf32>
    %639 = vector.shape_cast %638 : vector<8xf32> to vector<8x1xf32>
    %cst_161 = arith.constant 9.99999971E-10 : f32
    %640 = vector.broadcast %cst_161 : f32 to vector<8x1xf32>
    %641 = arith.addf %639, %640 : vector<8x1xf32>
    %642 = vector.broadcast %641 : vector<8x1xf32> to vector<8x8xf32>
    %643 = arith.divf %637, %642 : vector<8x8xf32>
    %644 = vector.shape_cast %643 : vector<8x8xf32> to vector<8x1x8xf32>
    "tpu.trace_start"() <{level = 10 : i32, message = "bqt,bth->bqh"}> : () -> ()
    %cst_162 = arith.constant dense<0.000000e+00> : vector<8x1x32xf32>
    %645 = tpu.matmul %644, %430, %cst_162 {dimension_numbers = #tpu.dot_dimension_numbers<[2], [1], [1], [2], [0, 0, 0, 1, 1, 2], [0], [0]>} : vector<8x1x8xf32>, vector<8x8x32xf32>, vector<8x1x32xf32> -> vector<8x1x32xf32>
    "tpu.trace_stop"() : () -> ()
    %646 = vector.shape_cast %645 : vector<8x1x32xf32> to vector<8x32xf32>
    %cst_163 = arith.constant dense<0.000000e+00> : vector<8x128xf32>
    %647 = tpu.matmul %624, %9, %cst_163 {dimension_numbers = #tpu.dot_dimension_numbers<[1], [0], [0], [1], [0, 0, 1, 1], [], []>} : vector<8x32xf32>, vector<32x128xf32>, vector<8x128xf32> -> vector<8x128xf32>
    %cst_164 = arith.constant dense<0.000000e+00> : vector<8x128xf32>
    %648 = tpu.matmul %646, %10, %cst_164 {dimension_numbers = #tpu.dot_dimension_numbers<[1], [0], [0], [1], [0, 0, 1, 1], [], []>} : vector<8x32xf32>, vector<32x128xf32>, vector<8x128xf32> -> vector<8x128xf32>
    %649 = arith.addf %647, %648 : vector<8x128xf32>
    %650 = vector.broadcast %11 : vector<1x128xf32> to vector<8x128xf32>
    %651 = arith.addf %649, %650 : vector<8x128xf32>
    %cst_165 = arith.constant dense<0xFF800000> : vector<8xf32>
    %652 = vector.multi_reduction <maximumf>, %651, %cst_165 [1] : vector<8x128xf32> to vector<8xf32>
    %653 = vector.shape_cast %652 : vector<8xf32> to vector<8x1xf32>
    %654 = vector.broadcast %653 : vector<8x1xf32> to vector<8x128xf32>
    %655 = arith.subf %651, %654 : vector<8x128xf32>
    %656 = math.exp %655 : vector<8x128xf32>
    %cst_166 = arith.constant dense<0.000000e+00> : vector<8xf32>
    %657 = vector.multi_reduction <add>, %656, %cst_166 [1] : vector<8x128xf32> to vector<8xf32>
    %658 = vector.shape_cast %657 : vector<8xf32> to vector<8x1xf32>
    %659 = math.log %658 : vector<8x1xf32>
    %660 = arith.addf %659, %653 : vector<8x1xf32>
    %661 = vector.broadcast %660 : vector<8x1xf32> to vector<8x128xf32>
    %662 = arith.subf %651, %661 : vector<8x128xf32>
    %663 = arith.index_cast %c2_i32_148 : i32 to index
    %c0_167 = arith.constant 0 : index
    %c0_168 = arith.constant 0 : index
    %664 = vector.load %arg15[%663, %c0_167, %c0_168] : memref<6x8x128xf32, #tpu.memory_space<vmem>>, vector<1x8x128xf32>
    %665 = vector.shape_cast %664 : vector<1x8x128xf32> to vector<8x128xf32>
    %666 = vector.shape_cast %662 : vector<8x128xf32> to vector<1x8x128xf32>
    tpu.vector_store %arg15[%663, %c0_167, %c0_168], %666 {strides = array<i32>} : memref<6x8x128xf32, #tpu.memory_space<vmem>>, vector<1x8x128xf32>,
    %c3_i32_169 = arith.constant 3 : i32
    %667 = arith.index_cast %c3_i32_169 : i32 to index
    %c0_170 = arith.constant 0 : index
    %c0_171 = arith.constant 0 : index
    %668 = vector.load %arg3[%667, %c0_170, %c0_171] : memref<6x8x32xf32, #tpu.memory_space<vmem>>, vector<1x8x32xf32>
    %669 = vector.shape_cast %668 : vector<1x8x32xf32> to vector<8x32xf32>
    %cst_172 = arith.constant dense<0.000000e+00> : vector<8x96xf32>
    %670 = tpu.matmul %669, %5, %cst_172 {dimension_numbers = #tpu.dot_dimension_numbers<[1], [0], [0], [1], [0, 0, 1, 1], [], []>} : vector<8x32xf32>, vector<32x96xf32>, vector<8x96xf32> -> vector<8x96xf32>
    %671 = vector.broadcast %7 : vector<1x96xf32> to vector<8x96xf32>
    %672 = arith.addf %670, %671 : vector<8x96xf32>
    %cst_173 = arith.constant dense<0.000000e+00> : vector<8x96xf32>
    %673 = tpu.matmul %624, %6, %cst_173 {dimension_numbers = #tpu.dot_dimension_numbers<[1], [0], [0], [1], [0, 0, 1, 1], [], []>} : vector<8x32xf32>, vector<32x96xf32>, vector<8x96xf32> -> vector<8x96xf32>
    %674 = vector.broadcast %8 : vector<1x96xf32> to vector<8x96xf32>
    %675 = arith.addf %673, %674 : vector<8x96xf32>
    %676 = vector.extract_strided_slice %672 {offsets = [0, 0], sizes = [8, 32], strides = [1, 1]} : vector<8x96xf32> to vector<8x32xf32>
    %677 = vector.extract_strided_slice %675 {offsets = [0, 0], sizes = [8, 32], strides = [1, 1]} : vector<8x96xf32> to vector<8x32xf32>
    %678 = arith.addf %676, %677 : vector<8x32xf32>
    %679 = arith.negf %678 : vector<8x32xf32>
    %680 = math.exp %679 : vector<8x32xf32>
    %cst_174 = arith.constant 1.000000e+00 : f32
    %681 = vector.broadcast %cst_174 : f32 to vector<8x32xf32>
    %682 = arith.addf %681, %680 : vector<8x32xf32>
    %683 = arith.divf %681, %682 : vector<8x32xf32>
    %684 = vector.extract_strided_slice %672 {offsets = [0, 32], sizes = [8, 32], strides = [1, 1]} : vector<8x96xf32> to vector<8x32xf32>
    %685 = vector.extract_strided_slice %675 {offsets = [0, 32], sizes = [8, 32], strides = [1, 1]} : vector<8x96xf32> to vector<8x32xf32>
    %686 = arith.addf %684, %685 : vector<8x32xf32>
    %687 = arith.negf %686 : vector<8x32xf32>
    %688 = math.exp %687 : vector<8x32xf32>
    %cst_175 = arith.constant 1.000000e+00 : f32
    %689 = vector.broadcast %cst_175 : f32 to vector<8x32xf32>
    %690 = arith.addf %689, %688 : vector<8x32xf32>
    %691 = arith.divf %689, %690 : vector<8x32xf32>
    %692 = vector.extract_strided_slice %672 {offsets = [0, 64], sizes = [8, 32], strides = [1, 1]} : vector<8x96xf32> to vector<8x32xf32>
    %693 = vector.extract_strided_slice %675 {offsets = [0, 64], sizes = [8, 32], strides = [1, 1]} : vector<8x96xf32> to vector<8x32xf32>
    %694 = arith.mulf %683, %693 : vector<8x32xf32>
    %695 = arith.addf %692, %694 : vector<8x32xf32>
    %696 = math.tanh %695 : vector<8x32xf32>
    %cst_176 = arith.constant 1.000000e+00 : f32
    %697 = vector.broadcast %cst_176 : f32 to vector<8x32xf32>
    %698 = arith.subf %697, %691 : vector<8x32xf32>
    %699 = arith.mulf %698, %696 : vector<8x32xf32>
    %700 = arith.mulf %691, %624 : vector<8x32xf32>
    %701 = arith.addf %699, %700 : vector<8x32xf32>
    %702 = vector.shape_cast %701 : vector<8x32xf32> to vector<8x1x32xf32>
    "tpu.trace_start"() <{level = 10 : i32, message = "bqh,bth->bqt"}> : () -> ()
    %cst_177 = arith.constant dense<0.000000e+00> : vector<8x1x8xf32>
    %703 = tpu.matmul %702, %430, %cst_177 {dimension_numbers = #tpu.dot_dimension_numbers<[2], [2], [1], [1], [0, 0, 0, 1, 1, 1], [0], [0]>} : vector<8x1x32xf32>, vector<8x8x32xf32>, vector<8x1x8xf32> -> vector<8x1x8xf32>
    "tpu.trace_stop"() : () -> ()
    %704 = vector.shape_cast %703 : vector<8x1x8xf32> to vector<8x8xf32>
    %cst_178 = arith.constant 0.000000e+00 : f32
    %705 = vector.broadcast %cst_178 : f32 to vector<8x8xf32>
    %706 = arith.cmpf ogt, %435, %705 : vector<8x8xf32>
    %cst_179 = arith.constant -1.000000e+09 : f32
    %707 = vector.broadcast %cst_179 : f32 to vector<8x8xf32>
    %708 = arith.select %706, %704, %707 : vector<8x8xi1>, vector<8x8xf32>
    %cst_180 = arith.constant dense<0xFF800000> : vector<8xf32>
    %709 = vector.multi_reduction <maximumf>, %708, %cst_180 [1] : vector<8x8xf32> to vector<8xf32>
    %710 = vector.shape_cast %709 : vector<8xf32> to vector<8x1xf32>
    %711 = vector.broadcast %710 : vector<8x1xf32> to vector<8x8xf32>
    %712 = arith.subf %708, %711 : vector<8x8xf32>
    %713 = math.exp %712 : vector<8x8xf32>
    %714 = arith.mulf %713, %435 : vector<8x8xf32>
    %cst_181 = arith.constant dense<0.000000e+00> : vector<8xf32>
    %715 = vector.multi_reduction <add>, %714, %cst_181 [1] : vector<8x8xf32> to vector<8xf32>
    %716 = vector.shape_cast %715 : vector<8xf32> to vector<8x1xf32>
    %cst_182 = arith.constant 9.99999971E-10 : f32
    %717 = vector.broadcast %cst_182 : f32 to vector<8x1xf32>
    %718 = arith.addf %716, %717 : vector<8x1xf32>
    %719 = vector.broadcast %718 : vector<8x1xf32> to vector<8x8xf32>
    %720 = arith.divf %714, %719 : vector<8x8xf32>
    %721 = vector.shape_cast %720 : vector<8x8xf32> to vector<8x1x8xf32>
    "tpu.trace_start"() <{level = 10 : i32, message = "bqt,bth->bqh"}> : () -> ()
    %cst_183 = arith.constant dense<0.000000e+00> : vector<8x1x32xf32>
    %722 = tpu.matmul %721, %430, %cst_183 {dimension_numbers = #tpu.dot_dimension_numbers<[2], [1], [1], [2], [0, 0, 0, 1, 1, 2], [0], [0]>} : vector<8x1x8xf32>, vector<8x8x32xf32>, vector<8x1x32xf32> -> vector<8x1x32xf32>
    "tpu.trace_stop"() : () -> ()
    %723 = vector.shape_cast %722 : vector<8x1x32xf32> to vector<8x32xf32>
    %cst_184 = arith.constant dense<0.000000e+00> : vector<8x128xf32>
    %724 = tpu.matmul %701, %9, %cst_184 {dimension_numbers = #tpu.dot_dimension_numbers<[1], [0], [0], [1], [0, 0, 1, 1], [], []>} : vector<8x32xf32>, vector<32x128xf32>, vector<8x128xf32> -> vector<8x128xf32>
    %cst_185 = arith.constant dense<0.000000e+00> : vector<8x128xf32>
    %725 = tpu.matmul %723, %10, %cst_185 {dimension_numbers = #tpu.dot_dimension_numbers<[1], [0], [0], [1], [0, 0, 1, 1], [], []>} : vector<8x32xf32>, vector<32x128xf32>, vector<8x128xf32> -> vector<8x128xf32>
    %726 = arith.addf %724, %725 : vector<8x128xf32>
    %727 = vector.broadcast %11 : vector<1x128xf32> to vector<8x128xf32>
    %728 = arith.addf %726, %727 : vector<8x128xf32>
    %cst_186 = arith.constant dense<0xFF800000> : vector<8xf32>
    %729 = vector.multi_reduction <maximumf>, %728, %cst_186 [1] : vector<8x128xf32> to vector<8xf32>
    %730 = vector.shape_cast %729 : vector<8xf32> to vector<8x1xf32>
    %731 = vector.broadcast %730 : vector<8x1xf32> to vector<8x128xf32>
    %732 = arith.subf %728, %731 : vector<8x128xf32>
    %733 = math.exp %732 : vector<8x128xf32>
    %cst_187 = arith.constant dense<0.000000e+00> : vector<8xf32>
    %734 = vector.multi_reduction <add>, %733, %cst_187 [1] : vector<8x128xf32> to vector<8xf32>
    %735 = vector.shape_cast %734 : vector<8xf32> to vector<8x1xf32>
    %736 = math.log %735 : vector<8x1xf32>
    %737 = arith.addf %736, %730 : vector<8x1xf32>
    %738 = vector.broadcast %737 : vector<8x1xf32> to vector<8x128xf32>
    %739 = arith.subf %728, %738 : vector<8x128xf32>
    %740 = arith.index_cast %c3_i32_169 : i32 to index
    %c0_188 = arith.constant 0 : index
    %c0_189 = arith.constant 0 : index
    %741 = vector.load %arg15[%740, %c0_188, %c0_189] : memref<6x8x128xf32, #tpu.memory_space<vmem>>, vector<1x8x128xf32>
    %742 = vector.shape_cast %741 : vector<1x8x128xf32> to vector<8x128xf32>
    %743 = vector.shape_cast %739 : vector<8x128xf32> to vector<1x8x128xf32>
    tpu.vector_store %arg15[%740, %c0_188, %c0_189], %743 {strides = array<i32>} : memref<6x8x128xf32, #tpu.memory_space<vmem>>, vector<1x8x128xf32>,
    %c4_i32_190 = arith.constant 4 : i32
    %744 = arith.index_cast %c4_i32_190 : i32 to index
    %c0_191 = arith.constant 0 : index
    %c0_192 = arith.constant 0 : index
    %745 = vector.load %arg3[%744, %c0_191, %c0_192] : memref<6x8x32xf32, #tpu.memory_space<vmem>>, vector<1x8x32xf32>
    %746 = vector.shape_cast %745 : vector<1x8x32xf32> to vector<8x32xf32>
    %cst_193 = arith.constant dense<0.000000e+00> : vector<8x96xf32>
    %747 = tpu.matmul %746, %5, %cst_193 {dimension_numbers = #tpu.dot_dimension_numbers<[1], [0], [0], [1], [0, 0, 1, 1], [], []>} : vector<8x32xf32>, vector<32x96xf32>, vector<8x96xf32> -> vector<8x96xf32>
    %748 = vector.broadcast %7 : vector<1x96xf32> to vector<8x96xf32>
    %749 = arith.addf %747, %748 : vector<8x96xf32>
    %cst_194 = arith.constant dense<0.000000e+00> : vector<8x96xf32>
    %750 = tpu.matmul %701, %6, %cst_194 {dimension_numbers = #tpu.dot_dimension_numbers<[1], [0], [0], [1], [0, 0, 1, 1], [], []>} : vector<8x32xf32>, vector<32x96xf32>, vector<8x96xf32> -> vector<8x96xf32>
    %751 = vector.broadcast %8 : vector<1x96xf32> to vector<8x96xf32>
    %752 = arith.addf %750, %751 : vector<8x96xf32>
    %753 = vector.extract_strided_slice %749 {offsets = [0, 0], sizes = [8, 32], strides = [1, 1]} : vector<8x96xf32> to vector<8x32xf32>
    %754 = vector.extract_strided_slice %752 {offsets = [0, 0], sizes = [8, 32], strides = [1, 1]} : vector<8x96xf32> to vector<8x32xf32>
    %755 = arith.addf %753, %754 : vector<8x32xf32>
    %756 = arith.negf %755 : vector<8x32xf32>
    %757 = math.exp %756 : vector<8x32xf32>
    %cst_195 = arith.constant 1.000000e+00 : f32
    %758 = vector.broadcast %cst_195 : f32 to vector<8x32xf32>
    %759 = arith.addf %758, %757 : vector<8x32xf32>
    %760 = arith.divf %758, %759 : vector<8x32xf32>
    %761 = vector.extract_strided_slice %749 {offsets = [0, 32], sizes = [8, 32], strides = [1, 1]} : vector<8x96xf32> to vector<8x32xf32>
    %762 = vector.extract_strided_slice %752 {offsets = [0, 32], sizes = [8, 32], strides = [1, 1]} : vector<8x96xf32> to vector<8x32xf32>
    %763 = arith.addf %761, %762 : vector<8x32xf32>
    %764 = arith.negf %763 : vector<8x32xf32>
    %765 = math.exp %764 : vector<8x32xf32>
    %cst_196 = arith.constant 1.000000e+00 : f32
    %766 = vector.broadcast %cst_196 : f32 to vector<8x32xf32>
    %767 = arith.addf %766, %765 : vector<8x32xf32>
    %768 = arith.divf %766, %767 : vector<8x32xf32>
    %769 = vector.extract_strided_slice %749 {offsets = [0, 64], sizes = [8, 32], strides = [1, 1]} : vector<8x96xf32> to vector<8x32xf32>
    %770 = vector.extract_strided_slice %752 {offsets = [0, 64], sizes = [8, 32], strides = [1, 1]} : vector<8x96xf32> to vector<8x32xf32>
    %771 = arith.mulf %760, %770 : vector<8x32xf32>
    %772 = arith.addf %769, %771 : vector<8x32xf32>
    %773 = math.tanh %772 : vector<8x32xf32>
    %cst_197 = arith.constant 1.000000e+00 : f32
    %774 = vector.broadcast %cst_197 : f32 to vector<8x32xf32>
    %775 = arith.subf %774, %768 : vector<8x32xf32>
    %776 = arith.mulf %775, %773 : vector<8x32xf32>
    %777 = arith.mulf %768, %701 : vector<8x32xf32>
    %778 = arith.addf %776, %777 : vector<8x32xf32>
    %779 = vector.shape_cast %778 : vector<8x32xf32> to vector<8x1x32xf32>
    "tpu.trace_start"() <{level = 10 : i32, message = "bqh,bth->bqt"}> : () -> ()
    %cst_198 = arith.constant dense<0.000000e+00> : vector<8x1x8xf32>
    %780 = tpu.matmul %779, %430, %cst_198 {dimension_numbers = #tpu.dot_dimension_numbers<[2], [2], [1], [1], [0, 0, 0, 1, 1, 1], [0], [0]>} : vector<8x1x32xf32>, vector<8x8x32xf32>, vector<8x1x8xf32> -> vector<8x1x8xf32>
    "tpu.trace_stop"() : () -> ()
    %781 = vector.shape_cast %780 : vector<8x1x8xf32> to vector<8x8xf32>
    %cst_199 = arith.constant 0.000000e+00 : f32
    %782 = vector.broadcast %cst_199 : f32 to vector<8x8xf32>
    %783 = arith.cmpf ogt, %435, %782 : vector<8x8xf32>
    %cst_200 = arith.constant -1.000000e+09 : f32
    %784 = vector.broadcast %cst_200 : f32 to vector<8x8xf32>
    %785 = arith.select %783, %781, %784 : vector<8x8xi1>, vector<8x8xf32>
    %cst_201 = arith.constant dense<0xFF800000> : vector<8xf32>
    %786 = vector.multi_reduction <maximumf>, %785, %cst_201 [1] : vector<8x8xf32> to vector<8xf32>
    %787 = vector.shape_cast %786 : vector<8xf32> to vector<8x1xf32>
    %788 = vector.broadcast %787 : vector<8x1xf32> to vector<8x8xf32>
    %789 = arith.subf %785, %788 : vector<8x8xf32>
    %790 = math.exp %789 : vector<8x8xf32>
    %791 = arith.mulf %790, %435 : vector<8x8xf32>
    %cst_202 = arith.constant dense<0.000000e+00> : vector<8xf32>
    %792 = vector.multi_reduction <add>, %791, %cst_202 [1] : vector<8x8xf32> to vector<8xf32>
    %793 = vector.shape_cast %792 : vector<8xf32> to vector<8x1xf32>
    %cst_203 = arith.constant 9.99999971E-10 : f32
    %794 = vector.broadcast %cst_203 : f32 to vector<8x1xf32>
    %795 = arith.addf %793, %794 : vector<8x1xf32>
    %796 = vector.broadcast %795 : vector<8x1xf32> to vector<8x8xf32>
    %797 = arith.divf %791, %796 : vector<8x8xf32>
    %798 = vector.shape_cast %797 : vector<8x8xf32> to vector<8x1x8xf32>
    "tpu.trace_start"() <{level = 10 : i32, message = "bqt,bth->bqh"}> : () -> ()
    %cst_204 = arith.constant dense<0.000000e+00> : vector<8x1x32xf32>
    %799 = tpu.matmul %798, %430, %cst_204 {dimension_numbers = #tpu.dot_dimension_numbers<[2], [1], [1], [2], [0, 0, 0, 1, 1, 2], [0], [0]>} : vector<8x1x8xf32>, vector<8x8x32xf32>, vector<8x1x32xf32> -> vector<8x1x32xf32>
    "tpu.trace_stop"() : () -> ()
    %800 = vector.shape_cast %799 : vector<8x1x32xf32> to vector<8x32xf32>
    %cst_205 = arith.constant dense<0.000000e+00> : vector<8x128xf32>
    %801 = tpu.matmul %778, %9, %cst_205 {dimension_numbers = #tpu.dot_dimension_numbers<[1], [0], [0], [1], [0, 0, 1, 1], [], []>} : vector<8x32xf32>, vector<32x128xf32>, vector<8x128xf32> -> vector<8x128xf32>
    %cst_206 = arith.constant dense<0.000000e+00> : vector<8x128xf32>
    %802 = tpu.matmul %800, %10, %cst_206 {dimension_numbers = #tpu.dot_dimension_numbers<[1], [0], [0], [1], [0, 0, 1, 1], [], []>} : vector<8x32xf32>, vector<32x128xf32>, vector<8x128xf32> -> vector<8x128xf32>
    %803 = arith.addf %801, %802 : vector<8x128xf32>
    %804 = vector.broadcast %11 : vector<1x128xf32> to vector<8x128xf32>
    %805 = arith.addf %803, %804 : vector<8x128xf32>
    %cst_207 = arith.constant dense<0xFF800000> : vector<8xf32>
    %806 = vector.multi_reduction <maximumf>, %805, %cst_207 [1] : vector<8x128xf32> to vector<8xf32>
    %807 = vector.shape_cast %806 : vector<8xf32> to vector<8x1xf32>
    %808 = vector.broadcast %807 : vector<8x1xf32> to vector<8x128xf32>
    %809 = arith.subf %805, %808 : vector<8x128xf32>
    %810 = math.exp %809 : vector<8x128xf32>
    %cst_208 = arith.constant dense<0.000000e+00> : vector<8xf32>
    %811 = vector.multi_reduction <add>, %810, %cst_208 [1] : vector<8x128xf32> to vector<8xf32>
    %812 = vector.shape_cast %811 : vector<8xf32> to vector<8x1xf32>
    %813 = math.log %812 : vector<8x1xf32>
    %814 = arith.addf %813, %807 : vector<8x1xf32>
    %815 = vector.broadcast %814 : vector<8x1xf32> to vector<8x128xf32>
    %816 = arith.subf %805, %815 : vector<8x128xf32>
    %817 = arith.index_cast %c4_i32_190 : i32 to index
    %c0_209 = arith.constant 0 : index
    %c0_210 = arith.constant 0 : index
    %818 = vector.load %arg15[%817, %c0_209, %c0_210] : memref<6x8x128xf32, #tpu.memory_space<vmem>>, vector<1x8x128xf32>
    %819 = vector.shape_cast %818 : vector<1x8x128xf32> to vector<8x128xf32>
    %820 = vector.shape_cast %816 : vector<8x128xf32> to vector<1x8x128xf32>
    tpu.vector_store %arg15[%817, %c0_209, %c0_210], %820 {strides = array<i32>} : memref<6x8x128xf32, #tpu.memory_space<vmem>>, vector<1x8x128xf32>,
    %c5_i32_211 = arith.constant 5 : i32
    %821 = arith.index_cast %c5_i32_211 : i32 to index
    %c0_212 = arith.constant 0 : index
    %c0_213 = arith.constant 0 : index
    %822 = vector.load %arg3[%821, %c0_212, %c0_213] : memref<6x8x32xf32, #tpu.memory_space<vmem>>, vector<1x8x32xf32>
    %823 = vector.shape_cast %822 : vector<1x8x32xf32> to vector<8x32xf32>
    %cst_214 = arith.constant dense<0.000000e+00> : vector<8x96xf32>
    %824 = tpu.matmul %823, %5, %cst_214 {dimension_numbers = #tpu.dot_dimension_numbers<[1], [0], [0], [1], [0, 0, 1, 1], [], []>} : vector<8x32xf32>, vector<32x96xf32>, vector<8x96xf32> -> vector<8x96xf32>
    %825 = vector.broadcast %7 : vector<1x96xf32> to vector<8x96xf32>
    %826 = arith.addf %824, %825 : vector<8x96xf32>
    %cst_215 = arith.constant dense<0.000000e+00> : vector<8x96xf32>
    %827 = tpu.matmul %778, %6, %cst_215 {dimension_numbers = #tpu.dot_dimension_numbers<[1], [0], [0], [1], [0, 0, 1, 1], [], []>} : vector<8x32xf32>, vector<32x96xf32>, vector<8x96xf32> -> vector<8x96xf32>
    %828 = vector.broadcast %8 : vector<1x96xf32> to vector<8x96xf32>
    %829 = arith.addf %827, %828 : vector<8x96xf32>
    %830 = vector.extract_strided_slice %826 {offsets = [0, 0], sizes = [8, 32], strides = [1, 1]} : vector<8x96xf32> to vector<8x32xf32>
    %831 = vector.extract_strided_slice %829 {offsets = [0, 0], sizes = [8, 32], strides = [1, 1]} : vector<8x96xf32> to vector<8x32xf32>
    %832 = arith.addf %830, %831 : vector<8x32xf32>
    %833 = arith.negf %832 : vector<8x32xf32>
    %834 = math.exp %833 : vector<8x32xf32>
    %cst_216 = arith.constant 1.000000e+00 : f32
    %835 = vector.broadcast %cst_216 : f32 to vector<8x32xf32>
    %836 = arith.addf %835, %834 : vector<8x32xf32>
    %837 = arith.divf %835, %836 : vector<8x32xf32>
    %838 = vector.extract_strided_slice %826 {offsets = [0, 32], sizes = [8, 32], strides = [1, 1]} : vector<8x96xf32> to vector<8x32xf32>
    %839 = vector.extract_strided_slice %829 {offsets = [0, 32], sizes = [8, 32], strides = [1, 1]} : vector<8x96xf32> to vector<8x32xf32>
    %840 = arith.addf %838, %839 : vector<8x32xf32>
    %841 = arith.negf %840 : vector<8x32xf32>
    %842 = math.exp %841 : vector<8x32xf32>
    %cst_217 = arith.constant 1.000000e+00 : f32
    %843 = vector.broadcast %cst_217 : f32 to vector<8x32xf32>
    %844 = arith.addf %843, %842 : vector<8x32xf32>
    %845 = arith.divf %843, %844 : vector<8x32xf32>
    %846 = vector.extract_strided_slice %826 {offsets = [0, 64], sizes = [8, 32], strides = [1, 1]} : vector<8x96xf32> to vector<8x32xf32>
    %847 = vector.extract_strided_slice %829 {offsets = [0, 64], sizes = [8, 32], strides = [1, 1]} : vector<8x96xf32> to vector<8x32xf32>
    %848 = arith.mulf %837, %847 : vector<8x32xf32>
    %849 = arith.addf %846, %848 : vector<8x32xf32>
    %850 = math.tanh %849 : vector<8x32xf32>
    %cst_218 = arith.constant 1.000000e+00 : f32
    %851 = vector.broadcast %cst_218 : f32 to vector<8x32xf32>
    %852 = arith.subf %851, %845 : vector<8x32xf32>
    %853 = arith.mulf %852, %850 : vector<8x32xf32>
    %854 = arith.mulf %845, %778 : vector<8x32xf32>
    %855 = arith.addf %853, %854 : vector<8x32xf32>
    %856 = vector.shape_cast %855 : vector<8x32xf32> to vector<8x1x32xf32>
    "tpu.trace_start"() <{level = 10 : i32, message = "bqh,bth->bqt"}> : () -> ()
    %cst_219 = arith.constant dense<0.000000e+00> : vector<8x1x8xf32>
    %857 = tpu.matmul %856, %430, %cst_219 {dimension_numbers = #tpu.dot_dimension_numbers<[2], [2], [1], [1], [0, 0, 0, 1, 1, 1], [0], [0]>} : vector<8x1x32xf32>, vector<8x8x32xf32>, vector<8x1x8xf32> -> vector<8x1x8xf32>
    "tpu.trace_stop"() : () -> ()
    %858 = vector.shape_cast %857 : vector<8x1x8xf32> to vector<8x8xf32>
    %cst_220 = arith.constant 0.000000e+00 : f32
    %859 = vector.broadcast %cst_220 : f32 to vector<8x8xf32>
    %860 = arith.cmpf ogt, %435, %859 : vector<8x8xf32>
    %cst_221 = arith.constant -1.000000e+09 : f32
    %861 = vector.broadcast %cst_221 : f32 to vector<8x8xf32>
    %862 = arith.select %860, %858, %861 : vector<8x8xi1>, vector<8x8xf32>
    %cst_222 = arith.constant dense<0xFF800000> : vector<8xf32>
    %863 = vector.multi_reduction <maximumf>, %862, %cst_222 [1] : vector<8x8xf32> to vector<8xf32>
    %864 = vector.shape_cast %863 : vector<8xf32> to vector<8x1xf32>
    %865 = vector.broadcast %864 : vector<8x1xf32> to vector<8x8xf32>
    %866 = arith.subf %862, %865 : vector<8x8xf32>
    %867 = math.exp %866 : vector<8x8xf32>
    %868 = arith.mulf %867, %435 : vector<8x8xf32>
    %cst_223 = arith.constant dense<0.000000e+00> : vector<8xf32>
    %869 = vector.multi_reduction <add>, %868, %cst_223 [1] : vector<8x8xf32> to vector<8xf32>
    %870 = vector.shape_cast %869 : vector<8xf32> to vector<8x1xf32>
    %cst_224 = arith.constant 9.99999971E-10 : f32
    %871 = vector.broadcast %cst_224 : f32 to vector<8x1xf32>
    %872 = arith.addf %870, %871 : vector<8x1xf32>
    %873 = vector.broadcast %872 : vector<8x1xf32> to vector<8x8xf32>
    %874 = arith.divf %868, %873 : vector<8x8xf32>
    %875 = vector.shape_cast %874 : vector<8x8xf32> to vector<8x1x8xf32>
    "tpu.trace_start"() <{level = 10 : i32, message = "bqt,bth->bqh"}> : () -> ()
    %cst_225 = arith.constant dense<0.000000e+00> : vector<8x1x32xf32>
    %876 = tpu.matmul %875, %430, %cst_225 {dimension_numbers = #tpu.dot_dimension_numbers<[2], [1], [1], [2], [0, 0, 0, 1, 1, 2], [0], [0]>} : vector<8x1x8xf32>, vector<8x8x32xf32>, vector<8x1x32xf32> -> vector<8x1x32xf32>
    "tpu.trace_stop"() : () -> ()
    %877 = vector.shape_cast %876 : vector<8x1x32xf32> to vector<8x32xf32>
    %cst_226 = arith.constant dense<0.000000e+00> : vector<8x128xf32>
    %878 = tpu.matmul %855, %9, %cst_226 {dimension_numbers = #tpu.dot_dimension_numbers<[1], [0], [0], [1], [0, 0, 1, 1], [], []>} : vector<8x32xf32>, vector<32x128xf32>, vector<8x128xf32> -> vector<8x128xf32>
    %cst_227 = arith.constant dense<0.000000e+00> : vector<8x128xf32>
    %879 = tpu.matmul %877, %10, %cst_227 {dimension_numbers = #tpu.dot_dimension_numbers<[1], [0], [0], [1], [0, 0, 1, 1], [], []>} : vector<8x32xf32>, vector<32x128xf32>, vector<8x128xf32> -> vector<8x128xf32>
    %880 = arith.addf %878, %879 : vector<8x128xf32>
    %881 = vector.broadcast %11 : vector<1x128xf32> to vector<8x128xf32>
    %882 = arith.addf %880, %881 : vector<8x128xf32>
    %cst_228 = arith.constant dense<0xFF800000> : vector<8xf32>
    %883 = vector.multi_reduction <maximumf>, %882, %cst_228 [1] : vector<8x128xf32> to vector<8xf32>
    %884 = vector.shape_cast %883 : vector<8xf32> to vector<8x1xf32>
    %885 = vector.broadcast %884 : vector<8x1xf32> to vector<8x128xf32>
    %886 = arith.subf %882, %885 : vector<8x128xf32>
    %887 = math.exp %886 : vector<8x128xf32>
    %cst_229 = arith.constant dense<0.000000e+00> : vector<8xf32>
    %888 = vector.multi_reduction <add>, %887, %cst_229 [1] : vector<8x128xf32> to vector<8xf32>
    %889 = vector.shape_cast %888 : vector<8xf32> to vector<8x1xf32>
    %890 = math.log %889 : vector<8x1xf32>
    %891 = arith.addf %890, %884 : vector<8x1xf32>
    %892 = vector.broadcast %891 : vector<8x1xf32> to vector<8x128xf32>
    %893 = arith.subf %882, %892 : vector<8x128xf32>
    %894 = arith.index_cast %c5_i32_211 : i32 to index
    %c0_230 = arith.constant 0 : index
    %c0_231 = arith.constant 0 : index
    %895 = vector.load %arg15[%894, %c0_230, %c0_231] : memref<6x8x128xf32, #tpu.memory_space<vmem>>, vector<1x8x128xf32>
    %896 = vector.shape_cast %895 : vector<1x8x128xf32> to vector<8x128xf32>
    %897 = vector.shape_cast %893 : vector<8x128xf32> to vector<1x8x128xf32>
    tpu.vector_store %arg15[%894, %c0_230, %c0_231], %897 {strides = array<i32>} : memref<6x8x128xf32, #tpu.memory_space<vmem>>, vector<1x8x128xf32>,
    %c6_i32_232 = arith.constant 6 : i32
    return
  }
  func.func @transform_0(%arg0: i32) -> (i32, i32) {
    %c0_i32 = arith.constant 0 : i32
    %c0_i32_0 = arith.constant 0 : i32
    %c0_i32_1 = arith.constant 0 : i32
    return %c0_i32, %c0_i32_0 : i32, i32
  }
  func.func @transform_1(%arg0: i32) -> (i32, i32, i32) {
    %c0_i32 = arith.constant 0 : i32
    %c0_i32_0 = arith.constant 0 : i32
    %c0_i32_1 = arith.constant 0 : i32
    %c0_i32_2 = arith.constant 0 : i32
    return %c0_i32, %c0_i32_0, %c0_i32_1 : i32, i32, i32
  }
  func.func @transform_2(%arg0: i32) -> (i32, i32, i32) {
    %c0_i32 = arith.constant 0 : i32
    %c0_i32_0 = arith.constant 0 : i32
    %c0_i32_1 = arith.constant 0 : i32
    %c0_i32_2 = arith.constant 0 : i32
    return %c0_i32, %c0_i32_0, %c0_i32_1 : i32, i32, i32
  }
  func.func @transform_3(%arg0: i32) -> (i32, i32) {
    %c0_i32 = arith.constant 0 : i32
    %c0_i32_0 = arith.constant 0 : i32
    %c0_i32_1 = arith.constant 0 : i32
    return %c0_i32, %c0_i32_0 : i32, i32
  }
  func.func @transform_4(%arg0: i32) -> (i32, i32) {
    %c0_i32 = arith.constant 0 : i32
    %c0_i32_0 = arith.constant 0 : i32
    %c0_i32_1 = arith.constant 0 : i32
    return %c0_i32, %c0_i32_0 : i32, i32
  }
  func.func @transform_5(%arg0: i32) -> (i32, i32) {
    %c0_i32 = arith.constant 0 : i32
    %c0_i32_0 = arith.constant 0 : i32
    %c0_i32_1 = arith.constant 0 : i32
    return %c0_i32, %c0_i32_0 : i32, i32
  }
  func.func @transform_6(%arg0: i32) -> (i32, i32) {
    %c0_i32 = arith.constant 0 : i32
    %c0_i32_0 = arith.constant 0 : i32
    %c0_i32_1 = arith.constant 0 : i32
    return %c0_i32, %c0_i32_0 : i32, i32
  }
  func.func @transform_7(%arg0: i32) -> (i32, i32) {
    %c0_i32 = arith.constant 0 : i32
    %c0_i32_0 = arith.constant 0 : i32
    %c0_i32_1 = arith.constant 0 : i32
    return %c0_i32, %c0_i32_0 : i32, i32
  }
  func.func @transform_8(%arg0: i32) -> (i32, i32) {
    %c0_i32 = arith.constant 0 : i32
    %c0_i32_0 = arith.constant 0 : i32
    %c0_i32_1 = arith.constant 0 : i32
    return %c0_i32, %c0_i32_0 : i32, i32
  }
  func.func @transform_9(%arg0: i32) -> (i32, i32) {
    %c0_i32 = arith.constant 0 : i32
    %c0_i32_0 = arith.constant 0 : i32
    %c0_i32_1 = arith.constant 0 : i32
    return %c0_i32, %c0_i32_0 : i32, i32
  }
  func.func @transform_10(%arg0: i32) -> (i32, i32) {
    %c0_i32 = arith.constant 0 : i32
    %c0_i32_0 = arith.constant 0 : i32
    %c0_i32_1 = arith.constant 0 : i32
    return %c0_i32, %c0_i32_0 : i32, i32
  }
  func.func @transform_11(%arg0: i32) -> (i32, i32) {
    %c0_i32 = arith.constant 0 : i32
    %c0_i32_0 = arith.constant 0 : i32
    %c0_i32_1 = arith.constant 0 : i32
    return %c0_i32, %c0_i32_0 : i32, i32
  }
  func.func @transform_12(%arg0: i32) -> (i32, i32) {
    %c0_i32 = arith.constant 0 : i32
    %c0_i32_0 = arith.constant 0 : i32
    %c0_i32_1 = arith.constant 0 : i32
    return %c0_i32, %c0_i32_0 : i32, i32
  }
  func.func @transform_13(%arg0: i32) -> (i32, i32) {
    %c0_i32 = arith.constant 0 : i32
    %c0_i32_0 = arith.constant 0 : i32
    %c0_i32_1 = arith.constant 0 : i32
    return %c0_i32, %c0_i32_0 : i32, i32
  }
  func.func @transform_14(%arg0: i32) -> (i32, i32, i32) {
    %c0_i32 = arith.constant 0 : i32
    %c0_i32_0 = arith.constant 0 : i32
    %c0_i32_1 = arith.constant 0 : i32
    %c0_i32_2 = arith.constant 0 : i32
    return %c0_i32, %c0_i32_0, %c0_i32_1 : i32, i32, i32
  }
}

</mosaic_0001>

<bundles_post_ra>
// kernel: tpu_custom_call.1
= control target key start
LH: loop header
LB: loop body
LE: loop exit
PB: predicated region body
PF: predicated region fallthrough
CT: control target
= control target key end

     0   :  { %19 = vsyncpa [#allocation4], 0  ;;  %s15906_s0 = inlined_call_operand.vmem [shape: s32[8,1], index: 0, kind: input, shape index: {}]   ;;  %s15907_s1 = inlined_call_operand.hbm [shape: f32[8,8,16], index: 1, kind: input, shape index: {}]   ;;  %s15908_s2 = inlined_call_operand.hbm [shape: f32[6,8,32], index: 2, kind: input, shape index: {}]   ;;  %s15909_s3 = inlined_call_operand.hbm [shape: f32[16,96], index: 3, kind: input, shape index: {}]   ;;  %s15910_s4 = inlined_call_operand.hbm [shape: f32[32,96], index: 4, kind: input, shape index: {}]   ;;  %s15911_s5 = inlined_call_operand.vmem [shape: f32[1,96], index: 5, kind: input, shape index: {}]   ;;  %s15912_s6 = inlined_call_operand.vmem [shape: f32[1,96], index: 6, kind: input, shape index: {}]   ;;  %s15913_s7 = inlined_call_operand.vmem [shape: f32[32,96], index: 7, kind: input, shape index: {}]   ;;  %s15914_s8 = inlined_call_operand.hbm [shape: f32[32,96], index: 8, kind: input, shape index: {}]   ;;  %s15915_s9 = inlined_call_operand.vmem [shape: f32[1,96], index: 9, kind: input, shape index: {}]   ;;  %s15916_s10 = inlined_call_operand.vmem [shape: f32[1,96], index: 10, kind: input, shape index: {}]   ;;  %s15917_s11 = inlined_call_operand.hbm [shape: f32[32,128], index: 11, kind: input, shape index: {}]   ;;  %s15918_s12 = inlined_call_operand.hbm [shape: f32[32,128], index: 12, kind: input, shape index: {}]   ;;  %s15919_s13 = inlined_call_operand.vmem [shape: f32[1,128], index: 13, kind: input, shape index: {}]   ;;  %s15920_s14 = inlined_call_operand.hbm [shape: f32[6,8,128], index: 14, kind: output, shape index: {}]  }
   0x1   :  { %20 = vsyncpa [#allocation7], 0 }
   0x2   :  { %21 = vsyncpa [#allocation10], 0 }
   0x3   :  { %22 = vsyncpa [#allocation13], 0 }
   0x4   :  { %23 = vsyncpa [#allocation5], 0  ;;  %s14182_s29 = smov [#allocation6]   ;;  %s14183_s15 = smov [#allocation9]  }
   0x5   :  { %s43_s30 = sshll.u32 %s14182_s29, 4  ;;  %s67_s16 = sshll.u32 %s14183_s15, 4  ;;  %s44_s30 = int_to_ptr.vmem [resolvable:$true] %s43_s30  ;;  %s14276_s16 = int_to_ptr.vmem [resolvable:$true] %s67_s16 }
   0x6   :  { %s13996_s19 = scalar_lea.hbm %s15908_s2, 768 }
   0x7   :  { %p13997_p0 = scmp.ne.s32.totalorder %s15908_s2, %s13996_s19  ;;  %p14000_p1 = scmp.lt.u32.totalorder %s13996_s19, %s15908_s2 }
   0x9   :  { %p14002_p2 = pnand %p14000_p1, %p13997_p0 }
   0xb   :  { %14005 = shalt.err (!%p14002_p2)
}
   0xc   :  { %s14006_s24 = scalar_lea.vmem %s44_s30, 768  ;;  %p14011_p4 = scmp.lt.s32.totalorder %s44_s30, %s44_s30 }
   0xd   :  { %p14007_p3 = scmp.ne.s32.totalorder %s44_s30, %s14006_s24  ;;  %p14012_p5 = scmp.lt.s32.totalorder %s14006_s24, %s14006_s24 }
   0xf   :  { %p14013_p6 = por %p14012_p5, %p14011_p4 }
  0x11   :  { %p14014_p7 = pnand %p14013_p6, %p14007_p3 }
  0x13   :  { %14017 = shalt.err (!%p14014_p7)
}
  0x14   :  { %s14184_s25 = smov 128   ;;  %s14185_s26 = smov 8  }
  0x15   :  { %49 = dma.hbm_to_vmem [thread:$0]  %s15908_s2, 768, %s44_s30, [#allocation7], %s14184_s25, %s14184_s25, %s14185_s26  }
  0x16   :  { %s14018_s17 = scalar_lea.hbm %s15910_s4, 512 }
  0x17   :  { %p14019_p8 = scmp.ne.s32.totalorder %s15910_s4, %s14018_s17  ;;  %p14022_p9 = scmp.lt.u32.totalorder %s14018_s17, %s15910_s4 }
  0x19   :  { %p14024_p10 = pnand %p14022_p9, %p14019_p8 }
  0x1b   :  { %14027 = shalt.err (!%p14024_p10)
}
  0x1c   :  { %s14028_s22 = scalar_lea.vmem %s14276_s16, 512  ;;  %p14033_p12 = scmp.lt.s32.totalorder %s14276_s16, %s14276_s16 }
  0x1d   :  { %p14029_p11 = scmp.ne.s32.totalorder %s14276_s16, %s14028_s22  ;;  %p14034_p13 = scmp.lt.s32.totalorder %s14028_s22, %s14028_s22 }
  0x1f   :  { %p14035_p0 = por %p14034_p13, %p14033_p12 }
  0x21   :  { %p14036_p1 = pnand %p14035_p0, %p14029_p11 }
  0x23   :  { %14039 = shalt.err (!%p14036_p1)
}
  0x24   :  { %73 = dma.hbm_to_vmem [thread:$0]  %s15910_s4, 512, %s14276_s16, [#allocation10], %s14184_s25, %s14184_s25, %s14185_s26  }
  0x25   :  { %s14186_s23 = smov [#allocation12]   ;;  %s14187_s27 = smov [#allocation3]  }
  0x26   :  { %s101_s24 = sshll.u32 %s14186_s23, 4  ;;  %s31_s28 = sshll.u32 %s14187_s27, 4  ;;  %s102_s24 = int_to_ptr.vmem [resolvable:$true] %s101_s24  ;;  %s14313_s28 = int_to_ptr.vmem [resolvable:$true] %s31_s28 }
  0x27   :  { %s14040_s17 = scalar_lea.hbm %s15917_s11, 512 }
  0x28   :  { %p14041_p2 = scmp.ne.s32.totalorder %s15917_s11, %s14040_s17  ;;  %p14044_p3 = scmp.lt.u32.totalorder %s14040_s17, %s15917_s11 }
  0x2a   :  { %p14046_p4 = pnand %p14044_p3, %p14041_p2 }
  0x2c   :  { %14049 = shalt.err (!%p14046_p4)
}
  0x2d   :  { %s14050_s4 = scalar_lea.vmem %s102_s24, 512  ;;  %p14055_p6 = scmp.lt.s32.totalorder %s102_s24, %s102_s24 }
  0x2e   :  { %p14051_p5 = scmp.ne.s32.totalorder %s102_s24, %s14050_s4  ;;  %p14056_p7 = scmp.lt.s32.totalorder %s14050_s4, %s14050_s4 }
  0x30   :  { %p14057_p8 = por %p14056_p7, %p14055_p6 }
  0x32   :  { %p14058_p9 = pnand %p14057_p8, %p14051_p5 }
  0x34   :  { %14061 = shalt.err (!%p14058_p9)
}
  0x35   :  { %107 = dma.hbm_to_vmem [thread:$0]  %s15917_s11, 512, %s102_s24, [#allocation13], %s14184_s25, %s14184_s25, %s14185_s26  }
  0x36   :  { %s14062_s23 = scalar_lea.hbm %s15907_s1, 1024 }
  0x37   :  { %p14063_p10 = scmp.ne.s32.totalorder %s15907_s1, %s14062_s23  ;;  %p14066_p11 = scmp.lt.u32.totalorder %s14062_s23, %s15907_s1 }
  0x39   :  { %p14068_p12 = pnand %p14066_p11, %p14063_p10 }
  0x3b   :  { %14071 = shalt.err (!%p14068_p12)
}
  0x3c   :  { %s14072_s18 = scalar_lea.vmem %s14313_s28, 1024  ;;  %p14077_p0 = scmp.lt.s32.totalorder %s14313_s28, %s14313_s28 }
  0x3d   :  { %p14073_p13 = scmp.ne.s32.totalorder %s14313_s28, %s14072_s18  ;;  %p14078_p1 = scmp.lt.s32.totalorder %s14072_s18, %s14072_s18 }
  0x3f   :  { %p14079_p2 = por %p14078_p1, %p14077_p0 }
  0x41   :  { %p14080_p3 = pnand %p14079_p2, %p14073_p13 }
  0x43   :  { %14083 = shalt.err (!%p14080_p3)
}
  0x44   :  { %37 = dma.hbm_to_vmem [thread:$0]  %s15907_s1, 1024, %s14313_s28, [#allocation4], %s14184_s25, %s14184_s25, %s14185_s26  }
  0x45   :  { %s14188_s19 = smov [#allocation8]   ;;  %s14189_s21 = smov [#allocation11]  }
  0x46   :  { %s55_s20 = sshll.u32 %s14188_s19, 4  ;;  %s85_s4 = sshll.u32 %s14189_s21, 4  ;;  %s56_s20 = int_to_ptr.vmem [resolvable:$true] %s55_s20  ;;  %s14350_s4 = int_to_ptr.vmem [resolvable:$true] %s85_s4 }
  0x47   :  { %s14084_s2 = scalar_lea.hbm %s15909_s3, 256 }
  0x48   :  { %p14085_p4 = scmp.ne.s32.totalorder %s15909_s3, %s14084_s2  ;;  %p14088_p5 = scmp.lt.u32.totalorder %s14084_s2, %s15909_s3 }
  0x4a   :  { %p14090_p6 = pnand %p14088_p5, %p14085_p4 }
  0x4c   :  { %14093 = shalt.err (!%p14090_p6)
}
  0x4d   :  { %s14094_s1 = scalar_lea.vmem %s56_s20, 256  ;;  %p14099_p8 = scmp.lt.s32.totalorder %s56_s20, %s56_s20 }
  0x4e   :  { %p14095_p7 = scmp.ne.s32.totalorder %s56_s20, %s14094_s1  ;;  %p14100_p9 = scmp.lt.s32.totalorder %s14094_s1, %s14094_s1 }
  0x50   :  { %p14101_p10 = por %p14100_p9, %p14099_p8 }
  0x52   :  { %p14102_p11 = pnand %p14101_p10, %p14095_p7 }
  0x54   :  { %14105 = shalt.err (!%p14102_p11)
}
  0x55   :  { %61 = dma.hbm_to_vmem [thread:$0]  %s15909_s3, 256, %s56_s20, [#allocation7], %s14184_s25, %s14184_s25, %s14185_s26  }
  0x56   :  { %s14106_s11 = scalar_lea.hbm %s15914_s8, 512 }
  0x57   :  { %p14107_p12 = scmp.ne.s32.totalorder %s15914_s8, %s14106_s11  ;;  %p14110_p13 = scmp.lt.u32.totalorder %s14106_s11, %s15914_s8 }
  0x59   :  { %p14112_p0 = pnand %p14110_p13, %p14107_p12 }
  0x5b   :  { %14115 = shalt.err (!%p14112_p0)
}
  0x5c   :  { %s14116_s22 = scalar_lea.vmem %s14350_s4, 512  ;;  %p14121_p2 = scmp.lt.s32.totalorder %s14350_s4, %s14350_s4 }
  0x5d   :  { %p14117_p1 = scmp.ne.s32.totalorder %s14350_s4, %s14116_s22  ;;  %p14122_p3 = scmp.lt.s32.totalorder %s14116_s22, %s14116_s22 }
  0x5f   :  { %p14123_p4 = por %p14122_p3, %p14121_p2 }
  0x61   :  { %p14124_p5 = pnand %p14123_p4, %p14117_p1 }
  0x63   :  { %14127 = shalt.err (!%p14124_p5)
}
  0x64   :  { %91 = dma.hbm_to_vmem [thread:$0]  %s15914_s8, 512, %s14350_s4, [#allocation10], %s14184_s25, %s14184_s25, %s14185_s26  }
  0x65   :  { %s14190_s2 = smov [#allocation14]   ;;  %s14128_s29 = scalar_lea.hbm %s15918_s12, 512 }
  0x66   :  { %s113_s30 = sshll.u32 %s14190_s2, 4  ;;  %p14129_p6 = scmp.ne.s32.totalorder %s15918_s12, %s14128_s29  ;;  %s114_s30 = int_to_ptr.vmem [resolvable:$true] %s113_s30 }
  0x67   :  { %p14132_p7 = scmp.lt.u32.totalorder %s14128_s29, %s15918_s12 }
  0x69   :  { %p14134_p8 = pnand %p14132_p7, %p14129_p6 }
  0x6b   :  { %14137 = shalt.err (!%p14134_p8)
}
  0x6c   :  { %s14138_s18 = scalar_lea.vmem %s114_s30, 512  ;;  %p14143_p10 = scmp.lt.s32.totalorder %s114_s30, %s114_s30 }
  0x6d   :  { %p14139_p9 = scmp.ne.s32.totalorder %s114_s30, %s14138_s18  ;;  %p14144_p11 = scmp.lt.s32.totalorder %s14138_s18, %s14138_s18 }
  0x6f   :  { %p14145_p12 = por %p14144_p11, %p14143_p10 }
  0x71   :  { %p14146_p13 = pnand %p14145_p12, %p14139_p9 }
  0x73   :  { %14149 = shalt.err (!%p14146_p13)
}
  0x74   :  { %119 = dma.hbm_to_vmem [thread:$0]  %s15918_s12, 512, %s114_s30, [#allocation13], %s14184_s25, %s14184_s25, %s14185_s26  }
  0x75   :  { %14172 = dma.done.wait [#allocation4], 1024  }
  0x76   :  { %14173 = vsyncadd [#allocation4], 4294966272 }
  0x77   :  { %14174 = dma.done.wait [#allocation7], 1024  }
  0x78   :  { %14175 = vsyncadd [#allocation7], 4294966272 }
  0x79   :  { %14176 = dma.done.wait [#allocation10], 1024  }
  0x7a   :  { %14177 = vsyncadd [#allocation10], 4294966272 }
  0x7b   :  { %14178 = dma.done.wait [#allocation13], 1024  }
  0x7c   :  { %14179 = vsyncadd [#allocation13], 4294966272  ;;  %v14191_v0 = vmov 0.0|0.0   ;;  %vm14192_vm0 = vmmov 0   ;;  %v14193_v1 = vmov 0.0   ;;  %v146_v2 = vld [vmem:[#allocation9] sm:$0xff] }
  0x7d   :  { %13625 = vmatprep.subr.bf16.mxu1 %v14191_v0  ;;  %13622 = vmatprep.subr.bf16.mxu0 %v14191_v0  ;;  %v147_v3 = vld [vmem:[#allocation9 + $0x8] sm:$0xff]  ;;  %v144_v4 = vld [vmem:[#allocation8] sm:$0xff]  ;;  %v145_v6 = vld [vmem:[#allocation8 + $0x8] sm:$0xff]  ;;  %vm178_vm1 = vcmask 130048   ;;  %v14194_v13 = vmov 0   ;;  %s14195_s21 = smov 64  }
  0x7e   :  { %12738 = vmatprep.mubr.msk.f32.mxu0 %vm14192_vm0, %v14193_v1  ;;  %12749 = vmatprep.mubr.msk.f32.mxu1 %vm14192_vm0, %v14193_v1  ;;  %v14408_v5 = vpack.c.bf16 %v147_v3, %v146_v2  ;;  %v148_v7 = vld [vmem:[#allocation9 + $0x10] sm:$0xff]  ;;  %v149_v8 = vld [vmem:[#allocation9 + $0x18] sm:$0xff]  ;;  %v14410_v9 = vpack.c.bf16 %v145_v6, %v144_v4  ;;  %v171_v11 = vld [vmem:[#allocation3] sm:$0xff]  ;;  %vm258_vm3 = vcmask 261120   ;;  %vm2828_vm11 = vcmask 1041409  }
  0x7f   :  { %v14413_v10 = vpack.c.bf16 %v149_v8, %v148_v7  ;;  %v14433_v12 = vld [vmem:[%s15906_s0] sm:$0xff]  ;;  %13857 = vset.pattern.permute.xlu1 %v14194_v13  ;;  %13858 = vset.pattern.permute.xlu0 %v14194_v13  ;;  %v382_v33 = vld [vmem:[#allocation3 + $0x8] sm:$0xff]  ;;  %vm2831_vm12 = vcmask 1042434   ;;  %vm2834_vm13 = vcmask 1043459   ;;  %vm2837_vm14 = vcmask 1044484  }
  0x80   :  { %13627 = vmatpush3.bf16.msra.mxu1 %v14408_v5  ;;  %13624 = vmatpush3.bf16.msra.mxu0 %v14410_v9  ;;  %vm358_vm2 = vcmp.gt.s32.totalorder %v14433_v12, 0  ;;  %v14440_v17 = vld [vmem:[%s15912_s6] ss:$0 sm:$0xff]  ;;  %vm557_vm4 = vcmp.gt.s32.totalorder %v14433_v12, 1  ;;  %vm757_vm5 = vcmp.gt.s32.totalorder %v14433_v12, 2  ;;  %vm957_vm6 = vcmp.gt.s32.totalorder %v14433_v12, 3 }
  0x81   :  { %13628 = vmatprep.subr.bf16.mxu1 %v14191_v0  ;;  %13631 = vmatprep.subr.bf16.mxu0 %v14191_v0  ;;  %v12151_v14 = vsel %vm358_vm2, 1.0, %v14193_v1  ;;  %v14447_v22 = vld [vmem:[%s15911_s5] ss:$0 sm:$0xff]  ;;  %s14196_s5 = smov 96   ;;  %v12155_v51 = vsel %vm557_vm4, 1.0, %v14193_v1  ;;  %vm1157_vm7 = vcmp.gt.s32.totalorder %v14433_v12, 4 }
  0x82   :  { %363 = vperm.xlu1 %13857, %v12151_v14   ;;  %v367_v15 = vsub.f32 1.0, %v12151_v14  ;;  %v566_v60 = vsub.f32 1.0, %v12155_v51  ;;  %v582_v63 = vld [vmem:[#allocation3 + $0x10] sm:$0xff]  ;;  %vm1357_vm8 = vcmp.gt.s32.totalorder %v14433_v12, 5  ;;  %vm1557_vm9 = vcmp.gt.s32.totalorder %v14433_v12, 6 }
  0x83   :  { %12739 = vmatmul.mubr.msk.f32.vlgmr.msra.gmra.mrb[0].mxu0 %vm178_vm1, %v171_v11  ;;  %vm1757_vm10 = vcmp.gt.s32.totalorder %v14433_v12, 7  ;;  %vm2840_vm15 = vcmask 1045509   ;;  %vm2843_vm2 = vcmask 1046534   ;;  %vm2846_vm4 = vcmask 1047559  }
  0x84   :  { %13630 = vmatpush3.bf16.msra.mxu1 %v14413_v10  ;;  %13633 = vmatpush3.bf16.msra.mxu0 %v14410_v9 }
  0x85   :  { %12756 = vmatprep.mubr.msk.f32.mxu0 %vm14192_vm0, %v14193_v1  ;;  %13634 = vmatprep.subr.bf16.mxu0 %v14191_v0 }
  0x86   :  { %13640 = vmatprep.subr.bf16.mxu1 %v14191_v0  ;;  %370 = vperm.xlu1 %13857, %v367_v15  }
  0x87   :  { %12750 = vmatmul.mubr.f32.vlgmr.msra.gmra.mrb[0].mxu1 %v14193_v1  ;;  %12757 = vmatmul.mubr.msk.f32.vlgmr.msra.gmra.mrb[2].mxu0 %vm178_vm1, %v382_v33 }
  0x88   :  { %13642 = vmatpush3.bf16.msra.mxu1 %v14410_v9  ;;  %12774 = vmatprep.mubr.msk.f32.mxu1 %vm14192_vm0, %v14193_v1 }
  0x89   :  { %13643 = vmatprep.subr.bf16.mxu1 %v14191_v0  ;;  %13636 = vmatpush3.bf16.msra.mxu0 %v14408_v5 }
  0x8a   :  { %12767 = vmatprep.mubr.msk.f32.mxu0 %vm14192_vm0, %v14193_v1  ;;  %13637 = vmatprep.subr.bf16.mxu0 %v14191_v0 }
  0x8b   :  { %12775 = vmatmul.mubr.msk.f32.vlgmr.msra.gmra.mrb[2].mxu1 %vm178_vm1, %v582_v63 }
  0x8c   :  { %13645 = vmatpush3.bf16.msra.mxu1 %v14408_v5  ;;  %12785 = vmatprep.mubr.msk.f32.mxu1 %vm14192_vm0, %v14193_v1 }
  0x8d   :  { %13639 = vmatpush3.bf16.msra.mxu0 %v14413_v10  ;;  %13646 = vmatprep.subr.bf16.mxu1 %v14191_v0 }
  0x8e   :  { %13649 = vmatprep.subr.bf16.mxu0 %v14191_v0 }
  0x90   :  { %13648 = vmatpush3.bf16.msra.mxu1 %v14413_v10 }
  0x91   :  { %13658 = vmatprep.subr.bf16.mxu1 %v14191_v0 }
 0x101   :  { %v14459_v35 = vpop.permute.xlu1 %363 }
 0x105   :  { %v371_v40 = vpop.permute.xlu1 %370 }
 0x106   :  { %v373_v43 = vmul.f32 0.0, %v371_v40 }
 0x156   :  { %v248_v16 = vpop.f32.mrb[0].mxu0 }
 0x157   :  { %v12740_v18 = vpop.f32.mrb[1].mxu0  ;;  %v249_v23 = vadd.f32 %v14447_v22, %v248_v16 }
 0x15a   :  { %v328_v19 = vpop.f32.mrb[0].mxu1  ;;  %v452_v45 = vpop.f32.mrb[2].mxu0 }
 0x15b   :  { %v329_v20 = vadd.f32 %v14440_v17, %v328_v19  ;;  %v12751_v21 = vpop.f32.mrb[1].mxu1  ;;  %v12758_v46 = vpop.f32.mrb[3].mxu0  ;;  %v453_v52 = vadd.f32 %v14447_v22, %v452_v45 }
 0x15d   :  { %340 = vrot.lane.b32.xlu0 %v329_v20, %s14195_s21  ;;  %v332_v24 = vadd.f32 %v329_v20, %v249_v23 }
 0x15e   :  { %v652_v18 = vpop.f32.mrb[2].mxu1 }
 0x15f   :  { %v12150_v25 = vmul.f32 -1.442695, %v332_v24  ;;  %v12776_v19 = vpop.f32.mrb[3].mxu1 }
 0x161   :  { %13859 = vpow2.f32 %v12150_v25  ;;  %v12159_v25 = vsel %vm757_vm5, 1.0, %v14193_v1  ;;  %vm2850_vm5 = vcmask 64512  }
 0x16b   :  { %v13860_v26 = vpop.eup %13859 }
 0x16c   :  { %v336_v27 = vadd.f32 1.0, %v13860_v26  ;;  %v653_v26 = vadd.f32 %v14447_v22, %v652_v18 }
 0x16e   :  { %13861 = vrcp.f32 %v336_v27 }
 0x178   :  { %v13862_v28 = vpop.eup %13861 }
 0x179   :  { %v350_v36 = vsub.f32 1.0, %v13862_v28  ;;  %v356_v38 = vmul.f32 0.0, %v13862_v28 }
 0x1cf   :  { %v341_v29 = vpop.permute.xlu0 %340 }
 0x1d0   :  { %v343_v30 = vmul.f32 %v13862_v28, %v341_v29 }
 0x1d2   :  { %345 = vrot.lane.b32.xlu0 %v343_v30, %s14195_s21 }
 0x244   :  { %v346_v31 = vpop.permute.xlu0 %345 }
 0x245   :  { %v348_v32 = vadd.f32 %v346_v31, %v249_v23 }
 0x247   :  { %13863 = vtanh.f32 %v348_v32 }
 0x251   :  { %v13864_v34 = vpop.eup %13863 }
 0x252   :  { %352 = vrot.lane.b32.xlu0 %v13864_v34, %s14196_s5  ;;  %v766_v34 = vsub.f32 1.0, %v12159_v25 }
 0x2c4   :  { %v353_v37 = vpop.permute.xlu0 %352 }
 0x2c5   :  { %v355_v39 = vmul.f32 %v353_v37, %v350_v36 }
 0x2c7   :  { %v357_v41 = vadd.f32 %v356_v38, %v355_v39  ;;  %v782_v38 = vld [vmem:[#allocation3 + $0x18] sm:$0xff] }
 0x2c9   :  { %v366_v42 = vmul.f32 %v14459_v35, %v357_v41 }
 0x2cb   :  { %v14462_v44 = vadd.f32 %v373_v43, %v366_v42 }
 0x2cd   :  { %457 = vrot.lane.b32.xlu1 %v14462_v44, %s14196_s5 }
 0x33f   :  { %v458_v47 = vpop.permute.xlu1 %457 }
 0x340   :  { %12768 = vmatmul.mubr.msk.f32.vlgmr.msra.gmra.mrb[4].mxu0 %vm258_vm3, %v458_v47 }
 0x341   :  { %13651 = vmatpush3.bf16.msra.mxu0 %v14410_v9  ;;  %12792 = vmatprep.mubr.msk.f32.mxu0 %vm14192_vm0, %v14193_v1 }
 0x342   :  { %13652 = vmatprep.subr.bf16.mxu0 %v14191_v0 }
 0x344   :  { %12793 = vmatmul.mubr.msk.f32.vlgmr.msra.gmra.mrb[6].mxu0 %vm178_vm1, %v782_v38 }
 0x345   :  { %13654 = vmatpush3.bf16.msra.mxu0 %v14408_v5  ;;  %12803 = vmatprep.mubr.msk.f32.mxu0 %vm14192_vm0, %v14193_v1 }
 0x346   :  { %13655 = vmatprep.subr.bf16.mxu0 %v14191_v0 }
 0x349   :  { %13657 = vmatpush3.bf16.msra.mxu0 %v14413_v10 }
 0x34a   :  { %13667 = vmatprep.subr.bf16.mxu0 %v14191_v0 }
 0x413   :  { %v527_v48 = vpop.f32.mrb[4].mxu0 }
 0x414   :  { %v528_v49 = vadd.f32 %v14440_v17, %v527_v48  ;;  %v12769_v50 = vpop.f32.mrb[5].mxu0 }
 0x416   :  { %539 = vrot.lane.b32.xlu0 %v528_v49, %s14195_s21  ;;  %v531_v53 = vadd.f32 %v528_v49, %v453_v52 }
 0x418   :  { %v12154_v54 = vmul.f32 -1.442695, %v531_v53 }
 0x41a   :  { %562 = vperm.xlu0 %13858, %v12155_v51   ;;  %13865 = vpow2.f32 %v12154_v54  ;;  %v852_v51 = vpop.f32.mrb[6].mxu0 }
 0x424   :  { %v13866_v55 = vpop.eup %13865 }
 0x425   :  { %v535_v56 = vadd.f32 1.0, %v13866_v55 }
 0x427   :  { %13867 = vrcp.f32 %v535_v56 }
 0x431   :  { %v13868_v57 = vpop.eup %13867 }
 0x432   :  { %v549_v4 = vsub.f32 1.0, %v13868_v57  ;;  %v555_v7 = vmul.f32 %v13868_v57, %v14462_v44 }
 0x488   :  { %v540_v58 = vpop.permute.xlu0 %539 }
 0x489   :  { %v542_v59 = vmul.f32 %v13868_v57, %v540_v58  ;;  %v12163_v57 = vsel %vm957_vm6, 1.0, %v14193_v1  ;;  %v853_v58 = vadd.f32 %v14447_v22, %v852_v51 }
 0x48b   :  { %544 = vrot.lane.b32.xlu1 %v542_v59, %s14195_s21 }
 0x48f   :  { %569 = vperm.xlu1 %13857, %v566_v60  }
 0x499   :  { %v14486_v11 = vpop.permute.xlu0 %562 }
 0x4fd   :  { %v545_v61 = vpop.permute.xlu1 %544 }
 0x4fe   :  { %v547_v62 = vadd.f32 %v545_v61, %v453_v52  ;;  %v12794_v52 = vpop.f32.mrb[7].mxu0 }
 0x500   :  { %13869 = vtanh.f32 %v547_v62 }
 0x50a   :  { %v13870_v2 = vpop.eup %13869 }
 0x50b   :  { %551 = vrot.lane.b32.xlu1 %v13870_v2, %s14196_s5 }
 0x50e   :  { %v570_v3 = vpop.permute.xlu1 %569 }
 0x50f   :  { %v572_v14 = vmul.f32 %v570_v3, %v14462_v44 }
 0x57d   :  { %v552_v6 = vpop.permute.xlu1 %551 }
 0x57e   :  { %v554_v8 = vmul.f32 %v552_v6, %v549_v4  ;;  %v966_v4 = vsub.f32 1.0, %v12163_v57 }
 0x580   :  { %v556_v13 = vadd.f32 %v555_v7, %v554_v8  ;;  %v982_v8 = vld [vmem:[#allocation3 + $0x20] sm:$0xff] }
 0x582   :  { %v565_v15 = vmul.f32 %v14486_v11, %v556_v13 }
 0x584   :  { %v14490_v16 = vadd.f32 %v572_v14, %v565_v15 }
 0x586   :  { %657 = vrot.lane.b32.xlu0 %v14490_v16, %s14196_s5 }
 0x5f8   :  { %v658_v20 = vpop.permute.xlu0 %657 }
 0x5f9   :  { %12786 = vmatmul.mubr.msk.f32.vlgmr.msra.gmra.mrb[4].mxu1 %vm258_vm3, %v658_v20 }
 0x5fa   :  { %13660 = vmatpush3.bf16.msra.mxu1 %v14410_v9  ;;  %12810 = vmatprep.mubr.msk.f32.mxu1 %vm14192_vm0, %v14193_v1 }
 0x5fb   :  { %13661 = vmatprep.subr.bf16.mxu1 %v14191_v0 }
 0x5fd   :  { %12811 = vmatmul.mubr.msk.f32.vlgmr.msra.gmra.mrb[6].mxu1 %vm178_vm1, %v982_v8 }
 0x5fe   :  { %13663 = vmatpush3.bf16.msra.mxu1 %v14408_v5  ;;  %12821 = vmatprep.mubr.msk.f32.mxu1 %vm14192_vm0, %v14193_v1 }
 0x5ff   :  { %13664 = vmatprep.subr.bf16.mxu1 %v14191_v0 }
 0x602   :  { %13666 = vmatpush3.bf16.msra.mxu1 %v14413_v10 }
 0x603   :  { %13676 = vmatprep.subr.bf16.mxu1 %v14191_v0 }
 0x6cc   :  { %v727_v21 = vpop.f32.mrb[4].mxu1 }
 0x6cd   :  { %v728_v23 = vadd.f32 %v14440_v17, %v727_v21  ;;  %v12787_v24 = vpop.f32.mrb[5].mxu1 }
 0x6cf   :  { %739 = vrot.lane.b32.xlu1 %v728_v23, %s14195_s21  ;;  %v731_v27 = vadd.f32 %v728_v23, %v653_v26 }
 0x6d1   :  { %v12158_v28 = vmul.f32 -1.442695, %v731_v27  ;;  %v1052_v27 = vpop.f32.mrb[6].mxu1 }
 0x6d3   :  { %762 = vperm.xlu1 %13857, %v12159_v25   ;;  %13871 = vpow2.f32 %v12158_v28  ;;  %v12812_v28 = vpop.f32.mrb[7].mxu1 }
 0x6dd   :  { %v13872_v29 = vpop.eup %13871 }
 0x6de   :  { %v735_v30 = vadd.f32 1.0, %v13872_v29 }
 0x6e0   :  { %13873 = vrcp.f32 %v735_v30 }
 0x6ea   :  { %v13874_v31 = vpop.eup %13873 }
 0x6eb   :  { %v749_v41 = vsub.f32 1.0, %v13874_v31  ;;  %v755_v43 = vmul.f32 %v13874_v31, %v14490_v16 }
 0x741   :  { %v740_v32 = vpop.permute.xlu1 %739 }
 0x742   :  { %v742_v33 = vmul.f32 %v13874_v31, %v740_v32 }
 0x744   :  { %744 = vrot.lane.b32.xlu0 %v742_v33, %s14195_s21  ;;  %v12167_v33 = vsel %vm1157_vm7, 1.0, %v14193_v1 }
 0x748   :  { %769 = vperm.xlu0 %13858, %v766_v34   ;;  %v1053_v34 = vadd.f32 %v14447_v22, %v1052_v27 }
 0x752   :  { %v14513_v40 = vpop.permute.xlu1 %762 }
 0x7b6   :  { %v745_v36 = vpop.permute.xlu0 %744 }
 0x7b7   :  { %v747_v37 = vadd.f32 %v745_v36, %v653_v26 }
 0x7b9   :  { %13875 = vtanh.f32 %v747_v37 }
 0x7c3   :  { %v13876_v39 = vpop.eup %13875 }
 0x7c4   :  { %751 = vrot.lane.b32.xlu1 %v13876_v39, %s14196_s5 }
 0x7c7   :  { %v770_v46 = vpop.permute.xlu0 %769 }
 0x7c8   :  { %v772_v48 = vmul.f32 %v770_v46, %v14490_v16 }
 0x836   :  { %v752_v42 = vpop.permute.xlu1 %751 }
 0x837   :  { %v754_v45 = vmul.f32 %v752_v42, %v749_v41 }
 0x839   :  { %v756_v47 = vadd.f32 %v755_v43, %v754_v45  ;;  %v1166_v45 = vsub.f32 1.0, %v12167_v33 }
 0x83b   :  { %v765_v49 = vmul.f32 %v14513_v40, %v756_v47 }
 0x83d   :  { %v14518_v50 = vadd.f32 %v772_v48, %v765_v49  ;;  %v1182_v48 = vld [vmem:[#allocation3 + $0x28] sm:$0xff] }
 0x83f   :  { %857 = vrot.lane.b32.xlu0 %v14518_v50, %s14196_s5 }
 0x8b1   :  { %v858_v53 = vpop.permute.xlu0 %857 }
 0x8b2   :  { %12804 = vmatmul.mubr.msk.f32.vlgmr.msra.gmra.mrb[8].mxu0 %vm258_vm3, %v858_v53 }
 0x8b3   :  { %13669 = vmatpush3.bf16.msra.mxu0 %v14410_v9  ;;  %12828 = vmatprep.mubr.msk.f32.mxu0 %vm14192_vm0, %v14193_v1 }
 0x8b4   :  { %13670 = vmatprep.subr.bf16.mxu0 %v14191_v0 }
 0x8b6   :  { %12829 = vmatmul.mubr.msk.f32.vlgmr.msra.gmra.mrb[10].mxu0 %vm178_vm1, %v1182_v48 }
 0x8b7   :  { %13672 = vmatpush3.bf16.msra.mxu0 %v14408_v5  ;;  %12839 = vmatprep.mubr.msk.f32.mxu0 %vm14192_vm0, %v14193_v1 }
 0x8b8   :  { %13673 = vmatprep.subr.bf16.mxu0 %v14191_v0 }
 0x8bb   :  { %13675 = vmatpush3.bf16.msra.mxu0 %v14413_v10 }
 0x8bc   :  { %13685 = vmatprep.subr.bf16.mxu0 %v14191_v0 }
 0x985   :  { %v927_v54 = vpop.f32.mrb[8].mxu0 }
 0x986   :  { %v928_v55 = vadd.f32 %v14440_v17, %v927_v54  ;;  %v12805_v56 = vpop.f32.mrb[9].mxu0 }
 0x988   :  { %939 = vrot.lane.b32.xlu1 %v928_v55, %s14195_s21  ;;  %v931_v59 = vadd.f32 %v928_v55, %v853_v58 }
 0x98a   :  { %v12162_v60 = vmul.f32 -1.442695, %v931_v59 }
 0x98c   :  { %962 = vperm.xlu1 %13857, %v12163_v57   ;;  %13877 = vpow2.f32 %v12162_v60 }
 0x996   :  { %v13878_v61 = vpop.eup %13877 }
 0x997   :  { %v935_v62 = vadd.f32 1.0, %v13878_v61  ;;  %v1252_v61 = vpop.f32.mrb[10].mxu0 }
 0x999   :  { %13879 = vrcp.f32 %v935_v62  ;;  %v12830_v62 = vpop.f32.mrb[11].mxu0 }
 0x99a   :  { %v1582_v62 = vld [vmem:[#allocation3 + $0x38] sm:$0xff] }
 0x9a3   :  { %v13880_v63 = vpop.eup %13879 }
 0x9a4   :  { %v949_v15 = vsub.f32 1.0, %v13880_v63  ;;  %v955_v19 = vmul.f32 %v13880_v63, %v14518_v50 }
 0x9fa   :  { %v940_v2 = vpop.permute.xlu1 %939 }
 0x9fb   :  { %v942_v3 = vmul.f32 %v13880_v63, %v940_v2 }
 0x9fd   :  { %944 = vrot.lane.b32.xlu0 %v942_v3, %s14195_s21 }
 0xa01   :  { %969 = vperm.xlu0 %13858, %v966_v4  }
 0xa0b   :  { %v14541_v14 = vpop.permute.xlu1 %962 }
 0xa6f   :  { %v945_v6 = vpop.permute.xlu0 %944 }
 0xa70   :  { %v947_v7 = vadd.f32 %v945_v6, %v853_v58  ;;  %v12171_v6 = vsel %vm1357_vm8, 1.0, %v14193_v1 }
 0xa72   :  { %13881 = vtanh.f32 %v947_v7  ;;  %v1253_v7 = vadd.f32 %v14447_v22, %v1252_v61 }
 0xa7c   :  { %v13882_v13 = vpop.eup %13881 }
 0xa7d   :  { %951 = vrot.lane.b32.xlu1 %v13882_v13, %s14196_s5 }
 0xa80   :  { %v970_v21 = vpop.permute.xlu0 %969 }
 0xa81   :  { %v972_v24 = vmul.f32 %v970_v21, %v14518_v50  ;;  %v1366_v21 = vsub.f32 1.0, %v12171_v6 }
 0xaef   :  { %v952_v18 = vpop.permute.xlu1 %951 }
 0xaf0   :  { %v954_v20 = vmul.f32 %v952_v18, %v949_v15 }
 0xaf2   :  { %v956_v23 = vadd.f32 %v955_v19, %v954_v20 }
 0xaf4   :  { %v965_v25 = vmul.f32 %v14541_v14, %v956_v23 }
 0xaf6   :  { %v14546_v26 = vadd.f32 %v972_v24, %v965_v25  ;;  %v1382_v25 = vld [vmem:[#allocation3 + $0x30] sm:$0xff] }
 0xaf8   :  { %1057 = vrot.lane.b32.xlu0 %v14546_v26, %s14196_s5 }
 0xb6a   :  { %v1058_v29 = vpop.permute.xlu0 %1057 }
 0xb6b   :  { %12822 = vmatmul.mubr.msk.f32.vlgmr.msra.gmra.mrb[8].mxu1 %vm258_vm3, %v1058_v29 }
 0xb6c   :  { %13678 = vmatpush3.bf16.msra.mxu1 %v14410_v9  ;;  %12846 = vmatprep.mubr.msk.f32.mxu1 %vm14192_vm0, %v14193_v1 }
 0xb6d   :  { %13679 = vmatprep.subr.bf16.mxu1 %v14191_v0 }
 0xb6f   :  { %12847 = vmatmul.mubr.msk.f32.vlgmr.msra.gmra.mrb[10].mxu1 %vm178_vm1, %v1382_v25 }
 0xb70   :  { %13681 = vmatpush3.bf16.msra.mxu1 %v14408_v5  ;;  %12857 = vmatprep.mubr.msk.f32.mxu1 %vm14192_vm0, %v14193_v1 }
 0xb71   :  { %13682 = vmatprep.subr.bf16.mxu1 %v14191_v0 }
 0xb74   :  { %13684 = vmatpush3.bf16.msra.mxu1 %v14413_v10 }
 0xb75   :  { %13694 = vmatprep.subr.bf16.mxu1 %v14191_v0 }
 0xc3e   :  { %v1127_v30 = vpop.f32.mrb[8].mxu1 }
 0xc3f   :  { %v1128_v31 = vadd.f32 %v14440_v17, %v1127_v30  ;;  %v12823_v32 = vpop.f32.mrb[9].mxu1 }
 0xc41   :  { %1139 = vrot.lane.b32.xlu1 %v1128_v31, %s14195_s21  ;;  %v1131_v36 = vadd.f32 %v1128_v31, %v1053_v34 }
 0xc43   :  { %v12166_v37 = vmul.f32 -1.442695, %v1131_v36 }
 0xc45   :  { %1162 = vperm.xlu1 %13857, %v12167_v33   ;;  %13883 = vpow2.f32 %v12166_v37 }
 0xc4f   :  { %v13884_v38 = vpop.eup %13883 }
 0xc50   :  { %v1135_v39 = vadd.f32 1.0, %v13884_v38 }
 0xc52   :  { %13885 = vrcp.f32 %v1135_v39  ;;  %v1452_v39 = vpop.f32.mrb[10].mxu1 }
 0xc53   :  { %v1453_v48 = vadd.f32 %v14447_v22, %v1452_v39  ;;  %v156_v39 = vld [vmem:[#allocation11] sm:$0xff] }
 0xc5c   :  { %v13886_v41 = vpop.eup %13885 }
 0xc5d   :  { %v1149_v52 = vsub.f32 1.0, %v13886_v41  ;;  %v1155_v54 = vmul.f32 %v13886_v41, %v14546_v26 }
 0xcb3   :  { %v1140_v42 = vpop.permute.xlu1 %1139 }
 0xcb4   :  { %v1142_v43 = vmul.f32 %v13886_v41, %v1140_v42  ;;  %v12848_v41 = vpop.f32.mrb[11].mxu1 }
 0xcb6   :  { %1144 = vrot.lane.b32.xlu0 %v1142_v43, %s14195_s21 }
 0xcba   :  { %1169 = vperm.xlu0 %13858, %v1166_v45  }
 0xcc4   :  { %v14569_v51 = vpop.permute.xlu1 %1162 }
 0xd28   :  { %v1145_v46 = vpop.permute.xlu0 %1144 }
 0xd29   :  { %v1147_v47 = vadd.f32 %v1145_v46, %v1053_v34 }
 0xd2b   :  { %13887 = vtanh.f32 %v1147_v47  ;;  %v12175_v47 = vsel %vm1557_vm9, 1.0, %v14193_v1 }
 0xd35   :  { %v13888_v49 = vpop.eup %13887 }
 0xd36   :  { %1151 = vrot.lane.b32.xlu1 %v13888_v49, %s14196_s5 }
 0xd39   :  { %v1170_v56 = vpop.permute.xlu0 %1169 }
 0xd3a   :  { %v1172_v58 = vmul.f32 %v1170_v56, %v14546_v26 }
 0xda8   :  { %v1152_v53 = vpop.permute.xlu1 %1151 }
 0xda9   :  { %v1154_v55 = vmul.f32 %v1152_v53, %v1149_v52 }
 0xdab   :  { %v1156_v57 = vadd.f32 %v1155_v54, %v1154_v55 }
 0xdad   :  { %v1165_v59 = vmul.f32 %v14569_v51, %v1156_v57 }
 0xdaf   :  { %v14574_v60 = vadd.f32 %v1172_v58, %v1165_v59  ;;  %v1566_v58 = vsub.f32 1.0, %v12175_v47 }
 0xdb1   :  { %1257 = vrot.lane.b32.xlu0 %v14574_v60, %s14196_s5 }
 0xe23   :  { %v1258_v63 = vpop.permute.xlu0 %1257 }
 0xe24   :  { %12840 = vmatmul.mubr.msk.f32.vlgmr.msra.gmra.mrb[12].mxu0 %vm258_vm3, %v1258_v63 }
 0xe25   :  { %13687 = vmatpush3.bf16.msra.mxu0 %v14410_v9  ;;  %12864 = vmatprep.mubr.msk.f32.mxu0 %vm14192_vm0, %v14193_v1 }
 0xe26   :  { %13688 = vmatprep.subr.bf16.mxu0 %v14191_v0 }
 0xe28   :  { %12865 = vmatmul.mubr.msk.f32.vlgmr.msra.gmra.mrb[14].mxu0 %vm178_vm1, %v1582_v62 }
 0xe29   :  { %13690 = vmatpush3.bf16.msra.mxu0 %v14408_v5  ;;  %12875 = vmatprep.mubr.msk.f32.mxu0 %vm14192_vm0, %v14193_v1 }
 0xe2a   :  { %13691 = vmatprep.subr.bf16.mxu0 %v14191_v0 }
 0xe2d   :  { %13693 = vmatpush3.bf16.msra.mxu0 %v14413_v10 }
 0xe2e   :  { %13700 = vmatprep.subr.bf16.mxu0 %v14191_v0 }
 0xef7   :  { %v1327_v2 = vpop.f32.mrb[12].mxu0 }
 0xef8   :  { %v1328_v3 = vadd.f32 %v14440_v17, %v1327_v2  ;;  %v12841_v4 = vpop.f32.mrb[13].mxu0 }
 0xefa   :  { %1339 = vrot.lane.b32.xlu1 %v1328_v3, %s14195_s21  ;;  %v1331_v8 = vadd.f32 %v1328_v3, %v1253_v7 }
 0xefb   :  { %v1652_v10 = vpop.f32.mrb[14].mxu0 }
 0xefc   :  { %v12170_v9 = vmul.f32 -1.442695, %v1331_v8  ;;  %v1653_v25 = vadd.f32 %v14447_v22, %v1652_v10  ;;  %v152_v22 = vld [vmem:[%s15913_s7] sm:$0xff] }
 0xefe   :  { %1362 = vperm.xlu1 %13857, %v12171_v6   ;;  %13889 = vpow2.f32 %v12170_v9 }
 0xf08   :  { %v13890_v13 = vpop.eup %13889 }
 0xf09   :  { %v1335_v15 = vadd.f32 1.0, %v13890_v13 }
 0xf0b   :  { %13891 = vrcp.f32 %v1335_v15 }
 0xf15   :  { %v13892_v18 = vpop.eup %13891 }
 0xf16   :  { %v1349_v29 = vsub.f32 1.0, %v13892_v18  ;;  %v1355_v31 = vmul.f32 %v13892_v18, %v14574_v60 }
 0xf6c   :  { %v1340_v19 = vpop.permute.xlu1 %1339 }
 0xf6d   :  { %v1342_v20 = vmul.f32 %v13892_v18, %v1340_v19  ;;  %v12866_v18 = vpop.f32.mrb[15].mxu0 }
 0xf6e   :  { %v14695_v18 = vld [vmem:[%s15915_s9] ss:$0 sm:$0xff] }
 0xf6f   :  { %1344 = vrot.lane.b32.xlu0 %v1342_v20, %s14195_s21 }
 0xf73   :  { %1369 = vperm.xlu0 %13858, %v1366_v21  }
 0xf7d   :  { %v14597_v28 = vpop.permute.xlu1 %1362 }
 0xfe1   :  { %v1345_v23 = vpop.permute.xlu0 %1344 }
 0xfe2   :  { %v1347_v24 = vadd.f32 %v1345_v23, %v1253_v7 }
 0xfe4   :  { %13893 = vtanh.f32 %v1347_v24  ;;  %v12179_v24 = vsel %vm1757_vm10, 1.0, %v14193_v1 }
 0xfee   :  { %v13894_v27 = vpop.eup %13893 }
 0xfef   :  { %1351 = vrot.lane.b32.xlu1 %v13894_v27, %s14196_s5 }
 0xff2   :  { %v1370_v33 = vpop.permute.xlu0 %1369 }
 0xff3   :  { %v1372_v36 = vmul.f32 %v1370_v33, %v14574_v60 }
0x1061   :  { %v1352_v30 = vpop.permute.xlu1 %1351 }
0x1062   :  { %v1354_v32 = vmul.f32 %v1352_v30, %v1349_v29 }
0x1064   :  { %v1356_v34 = vadd.f32 %v1355_v31, %v1354_v32 }
0x1066   :  { %v1365_v37 = vmul.f32 %v14597_v28, %v1356_v34 }
0x1068   :  { %v14602_v38 = vadd.f32 %v1372_v36, %v1365_v37  ;;  %v153_v37 = vld [vmem:[%s15913_s7 + $0x8] sm:$0xff] }
0x1069   :  { %v14647_v41 = vpack.c.bf16 %v153_v37, %v152_v22 }
0x106a   :  { %1457 = vrot.lane.b32.xlu0 %v14602_v38, %s14196_s5 }
0x10dc   :  { %v1458_v42 = vpop.permute.xlu0 %1457 }
0x10dd   :  { %12858 = vmatmul.mubr.msk.f32.vlgmr.msra.gmra.mrb[12].mxu1 %vm258_vm3, %v1458_v42  ;;  %v157_v42 = vld [vmem:[#allocation11 + $0x8] sm:$0xff] }
0x10de   :  { %12886 = vmatprep.mubr.msk.f32.mxu1 %vm14192_vm0, %v14193_v1  ;;  %13696 = vmatpush3.bf16.msra.mxu1 %v14647_v41 }
0x10df   :  { %13697 = vmatprep.subr.bf16.mxu1 %v14191_v0 }
0x11b0   :  { %v1527_v43 = vpop.f32.mrb[12].mxu1 }
0x11b1   :  { %v1528_v45 = vadd.f32 %v14440_v17, %v1527_v43  ;;  %v12859_v46 = vpop.f32.mrb[13].mxu1  ;;  %v154_v43 = vld [vmem:[%s15913_s7 + $0x10] sm:$0xff] }
0x11b2   :  { %v14655_v46 = vpack.c.bf16 %v157_v42, %v156_v39  ;;  %v1794_v42 = vlaneseq }
0x11b3   :  { %1539 = vrot.lane.b32.xlu1 %v1528_v45, %s14195_s21  ;;  %v1531_v49 = vadd.f32 %v1528_v45, %v1453_v48  ;;  %v155_v45 = vld [vmem:[%s15913_s7 + $0x18] sm:$0xff] }
0x11b5   :  { %v12174_v52 = vmul.f32 -1.442695, %v1531_v49  ;;  %v14658_v49 = vpack.c.bf16 %v155_v45, %v154_v43  ;;  %v1795_v45 = vshrl.u32 %v1794_v42, 7 }
0x11b7   :  { %1562 = vperm.xlu1 %13857, %v12175_v47   ;;  %13895 = vpow2.f32 %v12174_v52  ;;  %v158_v47 = vld [vmem:[#allocation11 + $0x10] sm:$0xff]  ;;  %13699 = vmatpush3.bf16.msra.mxu1 %v14658_v49 }
0x11b8   :  { %12900 = vmatprep.subr.mxu1 %v14193_v1 }
0x11c1   :  { %v13896_v53 = vpop.eup %13895 }
0x11c2   :  { %v1535_v54 = vadd.f32 1.0, %v13896_v53 }
0x11c4   :  { %13897 = vrcp.f32 %v1535_v54  ;;  %v1933_v54 = vld [vmem:[#allocation6] sm:$0xff] }
0x11c5   :  { %12887 = vmatmul.mubr.msk.f32.vlgmr.msra.gmra.mrb[14].mxu1 %vm258_vm3, %v1933_v54 }
0x11c6   :  { %12902 = vmatprep.mubr.msk.f32.mxu1 %vm14192_vm0, %v14193_v1 }
0x11ce   :  { %v13898_v55 = vpop.eup %13897 }
0x11cf   :  { %v1549_v3 = vsub.f32 1.0, %v13898_v55  ;;  %v1555_v6 = vmul.f32 %v13898_v55, %v14602_v38 }
0x1225   :  { %v1540_v56 = vpop.permute.xlu1 %1539 }
0x1226   :  { %v1542_v57 = vmul.f32 %v13898_v55, %v1540_v56 }
0x1228   :  { %1544 = vrot.lane.b32.xlu0 %v1542_v57, %s14195_s21 }
0x122c   :  { %1569 = vperm.xlu0 %13858, %v1566_v58  }
0x1236   :  { %v14623_v2 = vpop.permute.xlu1 %1562 }
0x129a   :  { %v1545_v59 = vpop.permute.xlu0 %1544 }
0x129b   :  { %v1547_v61 = vadd.f32 %v1545_v59, %v1453_v48  ;;  %v159_v48 = vld [vmem:[#allocation11 + $0x18] sm:$0xff] }
0x129c   :  { %v14662_v53 = vpack.c.bf16 %v159_v48, %v158_v47 }
0x129d   :  { %13899 = vtanh.f32 %v1547_v61 }
0x12a7   :  { %v13900_v63 = vpop.eup %13899 }
0x12a8   :  { %1551 = vrot.lane.b32.xlu1 %v13900_v63, %s14196_s5 }
0x12ab   :  { %v1570_v5 = vpop.permute.xlu0 %1569 }
0x12ac   :  { %v1572_v9 = vmul.f32 %v1570_v5, %v14602_v38 }
0x131a   :  { %v1552_v4 = vpop.permute.xlu1 %1551 }
0x131b   :  { %v1554_v7 = vmul.f32 %v1552_v4, %v1549_v3 }
0x131d   :  { %v1556_v8 = vadd.f32 %v1555_v6, %v1554_v7  ;;  %v2009_v7 = vpop.f32.mrb[14].mxu1 }
0x131e   :  { %v12888_v5 = vpop.f32.mrb[15].mxu1 }
0x131f   :  { %v1565_v13 = vmul.f32 %v14623_v2, %v1556_v8  ;;  %v14688_v8 = vld [vmem:[%s15916_s10] ss:$0 sm:$0xff] }
0x1321   :  { %v14628_v15 = vadd.f32 %v1572_v9, %v1565_v13 }
0x1323   :  { %1657 = vrot.lane.b32.xlu0 %v14628_v15, %s14196_s5 }
0x1395   :  { %v1658_v19 = vpop.permute.xlu0 %1657 }
0x1396   :  { %12876 = vmatmul.mubr.msk.f32.vlgmr.msra.gmra.mrb[16].mxu0 %vm258_vm3, %v1658_v19  ;;  %v2010_v19 = vadd.f32 %v14695_v18, %v2009_v7 }
0x1397   :  { %12897 = vmatprep.mubr.msk.f32.mxu0 %vm14192_vm0, %v14193_v1  ;;  %13702 = vmatpush3.bf16.msra.mxu0 %v14655_v46 }
0x1398   :  { %13703 = vmatprep.subr.bf16.mxu0 %v14191_v0 }
0x139b   :  { %13705 = vmatpush3.bf16.msra.mxu0 %v14662_v53 }
0x139c   :  { %12910 = vmatprep.subr.mxu0 %v14193_v1 }
0x1469   :  { %v1727_v20 = vpop.f32.mrb[16].mxu0 }
0x146a   :  { %v1728_v21 = vadd.f32 %v14440_v17, %v1727_v20  ;;  %v12877_v23 = vpop.f32.mrb[17].mxu0  ;;  %v1766_v17 = vsub.f32 1.0, %v12179_v24 }
0x146c   :  { %1739 = vrot.lane.b32.xlu1 %v1728_v21, %s14195_s21  ;;  %v1731_v27 = vadd.f32 %v1728_v21, %v1653_v25 }
0x146e   :  { %v12178_v29 = vmul.f32 -1.442695, %v1731_v27 }
0x1470   :  { %1762 = vperm.xlu1 %13857, %v12179_v24   ;;  %13901 = vpow2.f32 %v12178_v29 }
0x147a   :  { %v13902_v30 = vpop.eup %13901 }
0x147b   :  { %v1735_v31 = vadd.f32 1.0, %v13902_v30  ;;  %v375_v30 = vmul.f32 %v14462_v44, %v14459_v35 }
0x147d   :  { %13903 = vrcp.f32 %v1735_v31  ;;  %v774_v31 = vmul.f32 %v14518_v50, %v14513_v40 }
0x1487   :  { %v13904_v32 = vpop.eup %13903 }
0x1488   :  { %v1749_v56 = vsub.f32 1.0, %v13904_v32  ;;  %v1755_v58 = vmul.f32 %v13904_v32, %v14628_v15 }
0x14de   :  { %v1740_v33 = vpop.permute.xlu1 %1739 }
0x14df   :  { %v1742_v34 = vmul.f32 %v13904_v32, %v1740_v33  ;;  %v1174_v32 = vmul.f32 %v14574_v60, %v14569_v51  ;;  %v1574_v33 = vmul.f32 %v14628_v15, %v14623_v2  ;;  %v574_v51 = vmul.f32 %v14490_v16, %v14486_v11 }
0x14e0   :  { %v1374_v16 = vmul.f32 %v14602_v38, %v14597_v28 }
0x14e1   :  { %1744 = vrot.lane.b32.xlu0 %v1742_v34, %s14195_s21 }
0x14e5   :  { %1769 = vperm.xlu0 %13858, %v1766_v17  }
0x14ef   :  { %v14670_v55 = vpop.permute.xlu1 %1762 }
0x1553   :  { %v1745_v12 = vpop.permute.xlu0 %1744 }
0x1554   :  { %v1747_v36 = vadd.f32 %v1745_v12, %v1653_v25 }
0x1556   :  { %13905 = vtanh.f32 %v1747_v36  ;;  %v974_v36 = vmul.f32 %v14546_v26, %v14541_v14  ;;  %v14197_v14 = vmov 1966171168  }
0x1557   :  { %v2123_v26 = vunpack.c.l.s4 %v14197_v14 }
0x1559   :  { %v2124_v43 = vunpack.c.0.s8 %v2123_v26 }
0x1560   :  { %v13906_v52 = vpop.eup %13905 }
0x1561   :  { %1751 = vrot.lane.b32.xlu1 %v13906_v52, %s14196_s5  ;;  %v14741_v52 = vsub.s32 %v2124_v43, %v1795_v45 }
0x1564   :  { %v1770_v61 = vpop.permute.xlu0 %1769 }
0x1565   :  { %v1772_v63 = vmul.f32 %v1770_v61, %v14628_v15 }
0x15d3   :  { %v1752_v57 = vpop.permute.xlu1 %1751 }
0x15d4   :  { %v1754_v59 = vmul.f32 %v1752_v57, %v1749_v56  ;;  %v14746_v57 = vsub.s32 0, %v1795_v45 }
0x15d6   :  { %v1756_v62 = vadd.f32 %v1755_v58, %v1754_v59  ;;  %v14198_v59 = vmov 1983009808  }
0x15d7   :  { %v1792_v61 = vunpack.c.l.s4 %v14198_v59 }
0x15d8   :  { %v1765_v3 = vmul.f32 %v14670_v55, %v1756_v62 }
0x15da   :  { %v14678_v4 = vadd.f32 %v1772_v63, %v1765_v3 }
0x15dc   :  { %2020 = vrot.lane.b32.xlu0 %v14678_v4, %s14196_s5  ;;  %v1774_v39 = vmul.f32 %v14678_v4, %v14670_v55 }
0x164e   :  { %v2021_v6 = vpop.permute.xlu0 %2020 }
0x164f   :  { %12898 = vmatmul.mubr.msk.f32.vlgmr.msra.gmra.mrb[18].mxu0 %vm258_vm3, %v2021_v6 }
0x1650   :  { %12912 = vmatprep.mubr.msk.f32.mxu0 %vm14192_vm0, %v14193_v1 }
0x1722   :  { %v2090_v9 = vpop.f32.mrb[18].mxu0 }
0x1723   :  { %v2091_v13 = vadd.f32 %v14688_v8, %v2090_v9  ;;  %v12899_v10 = vpop.f32.mrb[19].mxu0  ;;  %v14199_v9 = vmov 1934713408  }
0x1724   :  { %v1793_v10 = vunpack.c.0.s8 %v1792_v61 }
0x1725   :  { %2102 = vrot.lane.b32.xlu1 %v2091_v13, %s14195_s21  ;;  %v2094_v20 = vadd.f32 %v2091_v13, %v2010_v19  ;;  %v1856_v13 = vunpack.c.l.s4 %v14199_v9 }
0x1727   :  { %v12185_v21 = vmul.f32 -1.442695, %v2094_v20 }
0x1729   :  { %13907 = vpow2.f32 %v12185_v21 }
0x1733   :  { %v13908_v23 = vpop.eup %13907 }
0x1734   :  { %v2098_v24 = vadd.f32 1.0, %v13908_v23 }
0x1736   :  { %13909 = vrcp.f32 %v2098_v24 }
0x1740   :  { %v13910_v25 = vpop.eup %13909 }
0x1741   :  { %v2112_v47 = vsub.f32 1.0, %v13910_v25  ;;  %v2118_v28 = vmul.f32 %v13910_v25, %v14678_v4 }
0x1797   :  { %v2103_v27 = vpop.permute.xlu1 %2102 }
0x1798   :  { %v2105_v29 = vmul.f32 %v13910_v25, %v2103_v27  ;;  %v1857_v27 = vunpack.c.0.s8 %v1856_v13 }
0x179a   :  { %2107 = vrot.lane.b32.xlu0 %v2105_v29, %s14195_s21  ;;  %v1796_v29 = vsub.s32 %v1793_v10, %v1795_v45 }
0x179e   :  { %377 = vrot.lane.b32.xlu0 %v375_v30, %s14196_s5 }
0x17a2   :  { %776 = vrot.lane.b32.xlu0 %v774_v31, %s14196_s5 }
0x17a6   :  { %1176 = vrot.lane.b32.xlu0 %v1174_v32, %s14196_s5 }
0x17aa   :  { %1576 = vrot.lane.b32.xlu0 %v1574_v33, %s14196_s5 }
0x180c   :  { %v2108_v34 = vpop.permute.xlu0 %2107 }
0x180d   :  { %v2110_v17 = vadd.f32 %v2108_v34, %v2010_v19 }
0x180f   :  { %13911 = vtanh.f32 %v2110_v17 }
0x1810   :  { %v378_v35 = vpop.permute.xlu0 %377 }
0x1811   :  { %380 = vst.msk [vmem:[#allocation2] sm:$0xff] %vm258_vm3, %v378_v35 }
0x1814   :  { %v777_v44 = vpop.permute.xlu0 %776 }
0x1815   :  { %780 = vst.msk [vmem:[#allocation2 + $0x10] sm:$0xff] %vm258_vm3, %v777_v44 }
0x1818   :  { %v1177_v40 = vpop.permute.xlu0 %1176  ;;  %v14717_v60 = vld [vmem:[#allocation2] sm:$0xff] }
0x1819   :  { %v13912_v50 = vpop.eup %13911  ;;  %1180 = vst.msk [vmem:[#allocation2 + $0x20] sm:$0xff] %vm258_vm3, %v1177_v40  ;;  %v1860_v40 = vsub.s32 %v1857_v27, %v1795_v45 }
0x181a   :  { %2114 = vrot.lane.b32.xlu1 %v13912_v50, %s14196_s5 }
0x181c   :  { %v14719_v2 = vld [vmem:[#allocation2 + $0x10] sm:$0xff]  ;;  %v1577_v15 = vpop.permute.xlu0 %1576 }
0x181d   :  { %v1790_v12 = vcombine.high %v14717_v60, %v14719_v2  ;;  %1580 = vst.msk [vmem:[#allocation2 + $0x30] sm:$0xff] %vm258_vm3, %v1577_v15 }
0x181e   :  { %576 = vrot.lane.b32.xlu1 %v574_v51, %s14196_s5 }
0x181f   :  { %v1804_v51 = vrot.slane %v1790_v12, %v1796_v29 }
0x1820   :  { %v14728_v22 = vld [vmem:[#allocation2 + $0x20] sm:$0xff] }
0x1822   :  { %976 = vrot.lane.b32.xlu1 %v974_v36, %s14196_s5 }
0x1824   :  { %v14730_v11 = vld [vmem:[#allocation2 + $0x30] sm:$0xff] }
0x1825   :  { %v1822_v37 = vcombine.high %v14728_v22, %v14730_v11 }
0x1826   :  { %1376 = vrot.lane.b32.xlu1 %v1374_v16, %s14196_s5 }
0x182a   :  { %1776 = vrot.lane.b32.xlu1 %v1774_v39, %s14196_s5  ;;  %v1789_v39 = vcombine.low %v14717_v60, %v14719_v2 }
0x188c   :  { %v2115_v48 = vpop.permute.xlu1 %2114 }
0x188d   :  { %v2117_v38 = vmul.f32 %v2115_v48, %v2112_v47  ;;  %v1821_v47 = vcombine.low %v14728_v22, %v14730_v11 }
0x188f   :  { %v14744_v54 = vadd.f32 %v2118_v28, %v2117_v38  ;;  %v1797_v38 = vrot.slane %v1789_v39, %v1796_v29  ;;  %v1829_v61 = vrot.slane %v1821_v47, %v1796_v29 }
0x1890   :  { %v577_v56 = vpop.permute.xlu1 %576 }
0x1891   :  { %580 = vst.msk [vmem:[#allocation2 + $0x8] sm:$0xff] %vm258_vm3, %v577_v56  ;;  %v2128_v55 = vrot.slane %v14744_v54, %v14741_v52  ;;  %v2121_v58 = vcombine.high %v14744_v54, %v14744_v54 }
0x1893   :  { %v2144_v62 = vrot.slane %v2128_v55, %v14741_v52  ;;  %v2136_v63 = vcombine.high %v2128_v55, %v2128_v55  ;;  %v2135_v3 = vrot.slane %v2121_v58, %v14741_v52 }
0x1894   :  { %v977_v4 = vpop.permute.xlu1 %976 }
0x1895   :  { %980 = vst.msk [vmem:[#allocation2 + $0x18] sm:$0xff] %vm258_vm3, %v977_v4  ;;  %v2173_v6 = vrot.slane %v2144_v62, %v14746_v57  ;;  %v2158_v7 = vrot.slane %v2136_v63, %v14741_v52  ;;  %v2166_v5 = vcombine.high %v2144_v62, %v2144_v62  ;;  %v2137_v21 = vcombine.high %v2135_v3, %v2135_v3  ;;  %v13991_v4 = vld [vmem:[%s15906_s0] sm:$0xff] }
0x1896   :  { %v2151_v25 = vrot.slane %v2135_v3, %v14741_v52  ;;  %v1836_v62 = vrot.slane %v1822_v37, %v1796_v29 }
0x1897   :  { %2174 = vrot.lane.b32.xlu0 %v2173_v6, %s14196_s5  ;;  %v2254_v19 = vrot.slane %v2158_v7, %v14746_v57  ;;  %v2168_v20 = vcombine.high %v2158_v7, %v2158_v7  ;;  %v2335_v24 = vrot.slane %v2166_v5, %v14746_v57  ;;  %v2165_v31 = vrot.slane %v2137_v21, %v14741_v52 }
0x1898   :  { %v1377_v23 = vpop.permute.xlu1 %1376  ;;  %v1782_v32 = vld [vmem:[#allocation2 + $0x8] sm:$0xff]  ;;  %v2497_v35 = vrot.slane %v2151_v25, %v14746_v57  ;;  %v2167_v44 = vcombine.high %v2151_v25, %v2151_v25 }
0x1899   :  { %1380 = vst.msk [vmem:[#allocation2 + $0x28] sm:$0xff] %vm258_vm3, %v1377_v23  ;;  %2255 = vrot.lane.b32.xlu1 %v2254_v19, %s14196_s5  ;;  %v2416_v30 = vrot.slane %v2168_v20, %v14746_v57  ;;  %v2578_v36 = vrot.slane %v2165_v31, %v14746_v57  ;;  %v2169_v16 = vcombine.high %v2165_v31, %v2165_v31 }
0x189a   :  { %v2659_v43 = vrot.slane %v2167_v44, %v14746_v57 }
0x189b   :  { %2336 = vrot.lane.b32.xlu0 %v2335_v24, %s14196_s5  ;;  %v2740_v28 = vrot.slane %v2169_v16, %v14746_v57 }
0x189c   :  { %v1784_v33 = vld [vmem:[#allocation2 + $0x18] sm:$0xff]  ;;  %v1777_v34 = vpop.permute.xlu1 %1776 }
0x189d   :  { %v1806_v17 = vcombine.high %v1782_v32, %v1784_v33  ;;  %1780 = vst.msk [vmem:[#allocation2 + $0x38] sm:$0xff] %vm258_vm3, %v1777_v34  ;;  %2417 = vrot.lane.b32.xlu1 %v2416_v30, %s14196_s5  ;;  %v1805_v50 = vcombine.low %v1782_v32, %v1784_v33 }
0x189f   :  { %v1820_v15 = vrot.slane %v1806_v17, %v1796_v29  ;;  %2498 = vrot.lane.b32.xlu0 %v2497_v35, %s14196_s5  ;;  %v1813_v45 = vrot.slane %v1805_v50, %v1796_v29 }
0x18a0   :  { %v1786_v56 = vld [vmem:[#allocation2 + $0x28] sm:$0xff] }
0x18a1   :  { %v1869_v14 = vcombine.low %v1804_v51, %v1820_v15  ;;  %v1870_v26 = vcombine.high %v1804_v51, %v1820_v15  ;;  %2579 = vrot.lane.b32.xlu1 %v2578_v36, %s14196_s5  ;;  %v1853_v58 = vcombine.low %v1797_v38, %v1813_v45  ;;  %v1854_v59 = vcombine.high %v1797_v38, %v1813_v45 }
0x18a3   :  { %v1877_v12 = vrot.slane %v1869_v14, %v1860_v40  ;;  %v1884_v48 = vrot.slane %v1870_v26, %v1860_v40  ;;  %2660 = vrot.lane.b32.xlu0 %v2659_v43, %s14196_s5  ;;  %v1861_v13 = vrot.slane %v1853_v58, %v1860_v40  ;;  %v1868_v10 = vrot.slane %v1854_v59, %v1860_v40 }
0x18a4   :  { %v1788_v55 = vld [vmem:[#allocation2 + $0x38] sm:$0xff] }
0x18a5   :  { %v1837_v60 = vcombine.low %v1786_v56, %v1788_v55  ;;  %v1838_v2 = vcombine.high %v1786_v56, %v1788_v55  ;;  %2741 = vrot.lane.b32.xlu1 %v2740_v28, %s14196_s5 }
0x18a7   :  { %v1845_v63 = vrot.slane %v1837_v60, %v1796_v29  ;;  %v1852_v3 = vrot.slane %v1838_v2, %v1796_v29  ;;  %1928 = vperm.xlu0 %13858, %v13991_v4  }
0x18a9   :  { %v1885_v6 = vcombine.low %v1829_v61, %v1845_v63  ;;  %v1886_v7 = vcombine.high %v1829_v61, %v1845_v63  ;;  %v1901_v5 = vcombine.low %v1836_v62, %v1852_v3  ;;  %v1902_v9 = vcombine.high %v1836_v62, %v1852_v3 }
0x18ab   :  { %v1893_v19 = vrot.slane %v1885_v6, %v1860_v40  ;;  %v1900_v20 = vrot.slane %v1886_v7, %v1860_v40  ;;  %v1909_v21 = vrot.slane %v1901_v5, %v1860_v40  ;;  %v1916_v23 = vrot.slane %v1902_v9, %v1860_v40 }
0x18ad   :  { %v14790_v24 = vcombine.low %v1861_v13, %v1893_v19  ;;  %v14792_v22 = vcombine.high %v1861_v13, %v1893_v19  ;;  %v14794_v11 = vcombine.low %v1868_v10, %v1900_v20  ;;  %v14796_v37 = vcombine.high %v1868_v10, %v1900_v20 }
0x18ae   :  { %v14798_v25 = vcombine.low %v1877_v12, %v1909_v21  ;;  %v14800_v27 = vcombine.high %v1877_v12, %v1909_v21  ;;  %v14802_v29 = vcombine.low %v1884_v48, %v1916_v23  ;;  %v14804_v30 = vcombine.high %v1884_v48, %v1916_v23 }
0x18af   :  { %12901 = vmatpush3.xpose.msk.msra.mxu1 %vm258_vm3, %v14790_v24  ;;  %12911 = vmatpush3.xpose.msk.msra.mxu0 %vm258_vm3, %v14794_v11  ;;  %v1926_v48 = vand.u32 127, %v1794_v42 }
0x18b0   :  { %12905 = vmatprep.subr.mxu1 %v14193_v1  ;;  %12920 = vmatprep.subr.mxu0 %v14193_v1 }
0x1909   :  { %v2175_v31 = vpop.permute.xlu0 %2174 }
0x190a   :  { %12903 = vmatmul.mubr.msk.f32.vlgmr.msra.gmra.mrb[16].mxu1 %vm258_vm3, %v2175_v31 }
0x190b   :  { %12906 = vmatpush3.xpose.msk.msra.mxu1 %vm258_vm3, %v14792_v22  ;;  %v2256_v32 = vpop.permute.xlu1 %2255  ;;  %12907 = vmatprep.mubr.msk.f32.mxu1 %vm14192_vm0, %v14193_v1 }
0x190c   :  { %12915 = vmatprep.subr.mxu1 %v14193_v1 }
0x190d   :  { %v2337_v33 = vpop.permute.xlu0 %2336 }
0x190e   :  { %12908 = vmatmul.mubr.msk.f32.vlgmr.msra.gmra.mrb[18].mxu1 %vm258_vm3, %v2256_v32  ;;  %12913 = vmatmul.mubr.msk.f32.vlgmr.msra.gmra.mrb[20].mxu0 %vm258_vm3, %v2337_v33 }
0x190f   :  { %12916 = vmatpush3.xpose.msk.msra.mxu1 %vm258_vm3, %v14796_v37  ;;  %12921 = vmatpush3.xpose.msk.msra.mxu0 %vm258_vm3, %v14798_v25  ;;  %v2418_v34 = vpop.permute.xlu1 %2417 }
0x1910   :  { %12917 = vmatprep.mubr.msk.f32.mxu1 %vm14192_vm0, %v14193_v1  ;;  %12922 = vmatprep.mubr.msk.f32.mxu0 %vm14192_vm0, %v14193_v1 }
0x1911   :  { %12925 = vmatprep.subr.mxu1 %v14193_v1  ;;  %12930 = vmatprep.subr.mxu0 %v14193_v1  ;;  %v2499_v17 = vpop.permute.xlu0 %2498 }
0x1912   :  { %12918 = vmatmul.mubr.msk.f32.vlgmr.msra.gmra.mrb[20].mxu1 %vm258_vm3, %v2418_v34  ;;  %12923 = vmatmul.mubr.msk.f32.vlgmr.msra.gmra.mrb[22].mxu0 %vm258_vm3, %v2499_v17 }
0x1913   :  { %12926 = vmatpush3.xpose.msk.msra.mxu1 %vm258_vm3, %v14800_v27  ;;  %12931 = vmatpush3.xpose.msk.msra.mxu0 %vm258_vm3, %v14802_v29  ;;  %v2580_v35 = vpop.permute.xlu1 %2579 }
0x1914   :  { %12927 = vmatprep.mubr.msk.f32.mxu1 %vm14192_vm0, %v14193_v1  ;;  %12932 = vmatprep.mubr.msk.f32.mxu0 %vm14192_vm0, %v14193_v1 }
0x1915   :  { %12935 = vmatprep.subr.mxu1 %v14193_v1  ;;  %12940 = vmatprep.subr.mxu0 %v14193_v1  ;;  %v2661_v44 = vpop.permute.xlu0 %2660 }
0x1916   :  { %12928 = vmatmul.mubr.msk.f32.vlgmr.msra.gmra.mrb[22].mxu1 %vm258_vm3, %v2580_v35  ;;  %12933 = vmatmul.mubr.msk.f32.vlgmr.msra.gmra.mrb[24].mxu0 %vm258_vm3, %v2661_v44 }
0x1917   :  { %12936 = vmatpush3.xpose.msk.msra.mxu1 %vm258_vm3, %v14804_v30  ;;  %12941 = vmatpush3.msra.mxu0 %v14790_v24  ;;  %v2742_v40 = vpop.permute.xlu1 %2741 }
0x1918   :  { %12937 = vmatprep.mubr.msk.f32.mxu1 %vm14192_vm0, %v14193_v1  ;;  %12945 = vmatprep.subr.mxu1 %v14193_v1 }
0x1919   :  { %12942 = vmatprep.mubr.msk.f32.mxu0 %vm14192_vm0, %v14193_v1  ;;  %12950 = vmatprep.subr.mxu0 %v14193_v1 }
0x191a   :  { %12938 = vmatmul.mubr.msk.f32.vlgmr.msra.gmra.mrb[24].mxu1 %vm258_vm3, %v2742_v40 }
0x191b   :  { %12946 = vmatpush3.msra.mxu1 %v14792_v22  ;;  %12947 = vmatprep.mubr.msk.f32.mxu1 %vm14192_vm0, %v14193_v1 }
0x191c   :  { %12955 = vmatprep.subr.mxu1 %v14193_v1 }
0x1926   :  { %v1929_v60 = vpop.permute.xlu0 %1928 }
0x1927   :  { %vm1930_vm1 = vcmp.lt.s32.totalorder %v1926_v48, %v1929_v60  ;;  %v163_v48 = vld [vmem:[#allocation12 + $0x8] sm:$0xff]  ;;  %v165_v60 = vld [vmem:[#allocation12 + $0x18] sm:$0xff] }
0x1928   :  { %v14865_v6 = vsel %vm1930_vm1, 1.0, %v14193_v1 }
0x1929   :  { %vm2818_vm6 = vcmp.gt.f32.partialorder %v14865_v6, 0.0 }
0x19dd   :  { %v2247_v50 = vpop.f32.mrb[16].mxu1 }
0x19de   :  { %v12904_v51 = vpop.f32.mrb[17].mxu1 }
0x19e1   :  { %v2328_v15 = vpop.f32.mrb[18].mxu1  ;;  %v2409_v36 = vpop.f32.mrb[20].mxu0 }
0x19e2   :  { %v2827_v16 = vrot.slane %v2328_v15, 7  ;;  %v2830_v39 = vrot.slane %v2409_v36, 6  ;;  %v12909_v14 = vpop.f32.mrb[19].mxu1  ;;  %v12914_v26 = vpop.f32.mrb[21].mxu0 }
0x19e4   :  { %v2829_v43 = vsel %vm2828_vm11, %v2827_v16, %v2247_v50 }
0x19e5   :  { %v2832_v45 = vsel %vm2831_vm12, %v2830_v39, %v2829_v43  ;;  %v2490_v47 = vpop.f32.mrb[20].mxu1  ;;  %v2571_v12 = vpop.f32.mrb[22].mxu0 }
0x19e6   :  { %v2833_v28 = vrot.slane %v2490_v47, 5  ;;  %v2836_v38 = vrot.slane %v2571_v12, 4  ;;  %v12919_v56 = vpop.f32.mrb[21].mxu1  ;;  %v12924_v55 = vpop.f32.mrb[23].mxu0  ;;  %v162_v12 = vld [vmem:[#allocation12] sm:$0xff] }
0x19e7   :  { %v164_v55 = vld [vmem:[#allocation12 + $0x10] sm:$0xff] }
0x19e8   :  { %v2835_v2 = vsel %vm2834_vm13, %v2833_v28, %v2832_v45 }
0x19e9   :  { %v2838_v58 = vsel %vm2837_vm14, %v2836_v38, %v2835_v2  ;;  %v2652_v59 = vpop.f32.mrb[22].mxu1  ;;  %v2733_v61 = vpop.f32.mrb[24].mxu0  ;;  %v14912_v38 = vpack.c.bf16 %v163_v48, %v162_v12  ;;  %v14920_v2 = vpack.c.bf16 %v165_v60, %v164_v55 }
0x19ea   :  { %v2839_v62 = vrot.slane %v2652_v59, 3  ;;  %v2842_v63 = vrot.slane %v2733_v61, 2  ;;  %v12929_v3 = vpop.f32.mrb[23].mxu1  ;;  %v12934_v4 = vpop.f32.mrb[25].mxu0  ;;  %v166_v59 = vld [vmem:[#allocation14] sm:$0xff]  ;;  %v167_v61 = vld [vmem:[#allocation14 + $0x8] sm:$0xff] }
0x19eb   :  { %v169_v3 = vld [vmem:[#allocation14 + $0x18] sm:$0xff] }
0x19ec   :  { %v2841_v42 = vsel %vm2840_vm15, %v2839_v62, %v2838_v58  ;;  %v14940_v62 = vpack.c.bf16 %v167_v61, %v166_v59 }
0x19ed   :  { %v2814_v7 = vpop.f32.mrb[24].mxu1  ;;  %v2844_v5 = vsel %vm2843_vm2, %v2842_v63, %v2841_v42  ;;  %v168_v63 = vld [vmem:[#allocation14 + $0x10] sm:$0xff] }
0x19ee   :  { %v2845_v9 = vrot.slane %v2814_v7, 1  ;;  %v12939_v13 = vpop.f32.mrb[25].mxu1  ;;  %v14944_v4 = vpack.c.bf16 %v169_v3, %v168_v63 }
0x19f0   :  { %v2847_v10 = vsel %vm2846_vm4, %v2845_v9, %v2844_v5 }
0x19f1   :  { %v2849_v19 = vsel %vm2818_vm6, %v2847_v10, -1e+09 }
0x19f2   :  { %v2851_v20 = vsel %vm2850_vm5, %v2849_v19, -inf }
0x19f3   :  { %2852 = vmax.xlane.f32.xlu1 %v2851_v20 }
0x1a80   :  { %v2853_v21 = vpop.xlane.xlu1 %2852 }
0x1a81   :  { %v2854_v23 = vsub.f32 %v2849_v19, %v2853_v21 }
0x1a83   :  { %v2855_v31 = vmul.f32 1.442695, %v2854_v23 }
0x1a85   :  { %13913 = vpow2.f32 %v2855_v31 }
0x1a8f   :  { %v13914_v32 = vpop.eup %13913 }
0x1a90   :  { %v2857_v33 = vmul.f32 %v13914_v32, %v14865_v6 }
0x1a92   :  { %v2858_v34 = vsel %vm2850_vm5, %v2857_v33, 0.0 }
0x1a93   :  { %2859 = vadd.xlane.f32.xlu0 %v2858_v34 }
0x1aa9   :  { %3584 = vrot.lane.b32.xlu0 %v14744_v54, %s14196_s5 }
0x1b20   :  { %v2860_v17 = vpop.xlane.xlu0 %2859 }
0x1b21   :  { %v2861_v35 = vadd.f32 1e-09, %v2860_v17 }
0x1b23   :  { %13915 = vrcp.f32 %v2861_v35 }
0x1b24   :  { %v3585_v58 = vpop.permute.xlu0 %3584 }
0x1b2d   :  { %v13916_v44 = vpop.eup %13915 }
0x1b2e   :  { %v2863_v40 = vmul.f32 %v13916_v44, %v2857_v33 }
0x1b30   :  { %v2865_v50 = vcombine.high %v2863_v40, %v2863_v40  ;;  %v2872_v51 = vrot.slane %v2863_v40, %v14741_v52 }
0x1b32   :  { %v2888_v15 = vrot.slane %v2872_v51, %v14741_v52  ;;  %v2880_v36 = vcombine.high %v2872_v51, %v2872_v51  ;;  %v2879_v39 = vrot.slane %v2865_v50, %v14741_v52 }
0x1b34   :  { %12943 = vmatmul.mubr.msk.f32.vlgmr.msra.gmra.mrb[26].mxu0 %vm2850_vm5, %v2888_v15  ;;  %v2902_v16 = vrot.slane %v2880_v36, %v14741_v52  ;;  %v2910_v14 = vcombine.high %v2888_v15, %v2888_v15  ;;  %v2881_v43 = vcombine.high %v2879_v39, %v2879_v39  ;;  %v2895_v45 = vrot.slane %v2879_v39, %v14741_v52 }
0x1b35   :  { %12951 = vmatpush3.msra.mxu0 %v14794_v11  ;;  %12952 = vmatprep.mubr.msk.f32.mxu0 %vm14192_vm0, %v14193_v1 }
0x1b36   :  { %12948 = vmatmul.mubr.msk.f32.vlgmr.msra.gmra.mrb[26].mxu1 %vm2850_vm5, %v2902_v16  ;;  %12960 = vmatprep.subr.mxu0 %v14193_v1  ;;  %v2912_v26 = vcombine.high %v2902_v16, %v2902_v16  ;;  %v2909_v47 = vrot.slane %v2881_v43, %v14741_v52  ;;  %v2911_v28 = vcombine.high %v2895_v45, %v2895_v45 }
0x1b37   :  { %12956 = vmatpush3.msra.mxu1 %v14796_v37  ;;  %12957 = vmatprep.mubr.msk.f32.mxu1 %vm14192_vm0, %v14193_v1 }
0x1b38   :  { %12953 = vmatmul.mubr.msk.f32.vlgmr.msra.gmra.mrb[28].mxu0 %vm2850_vm5, %v2910_v14  ;;  %12965 = vmatprep.subr.mxu1 %v14193_v1  ;;  %v2913_v56 = vcombine.high %v2909_v47, %v2909_v47 }
0x1b39   :  { %12961 = vmatpush3.msra.mxu0 %v14798_v25  ;;  %12962 = vmatprep.mubr.msk.f32.mxu0 %vm14192_vm0, %v14193_v1 }
0x1b3a   :  { %12958 = vmatmul.mubr.msk.f32.vlgmr.msra.gmra.mrb[28].mxu1 %vm2850_vm5, %v2912_v26  ;;  %12970 = vmatprep.subr.mxu0 %v14193_v1 }
0x1b3b   :  { %12966 = vmatpush3.msra.mxu1 %v14800_v27  ;;  %12967 = vmatprep.mubr.msk.f32.mxu1 %vm14192_vm0, %v14193_v1 }
0x1b3c   :  { %12963 = vmatmul.mubr.msk.f32.vlgmr.msra.gmra.mrb[30].mxu0 %vm2850_vm5, %v2895_v45  ;;  %12975 = vmatprep.subr.mxu1 %v14193_v1 }
0x1b3d   :  { %12971 = vmatpush3.msra.mxu0 %v14802_v29  ;;  %12972 = vmatprep.mubr.msk.f32.mxu0 %vm14192_vm0, %v14193_v1 }
0x1b3e   :  { %12968 = vmatmul.mubr.msk.f32.vlgmr.msra.gmra.mrb[30].mxu1 %vm2850_vm5, %v2909_v47  ;;  %13706 = vmatprep.subr.bf16.mxu0 %v14191_v0 }
0x1b3f   :  { %12976 = vmatpush3.msra.mxu1 %v14804_v30  ;;  %12977 = vmatprep.mubr.msk.f32.mxu1 %vm14192_vm0, %v14193_v1 }
0x1b40   :  { %12973 = vmatmul.mubr.msk.f32.vlgmr.msra.gmra.mrb[32].mxu0 %vm2850_vm5, %v2911_v28  ;;  %13712 = vmatprep.subr.bf16.mxu1 %v14191_v0 }
0x1b41   :  { %12988 = vmatprep.mubr.msk.f32.mxu0 %vm14192_vm0, %v14193_v1  ;;  %13708 = vmatpush3.bf16.msra.mxu0 %v14940_v62 }
0x1b42   :  { %12978 = vmatmul.mubr.msk.f32.vlgmr.msra.gmra.mrb[32].mxu1 %vm2850_vm5, %v2913_v56  ;;  %13709 = vmatprep.subr.bf16.mxu0 %v14191_v0  ;;  %v3678_v56 = vld [vmem:[#allocation6 + $0x8] sm:$0xff] }
0x1b43   :  { %13714 = vmatpush3.bf16.msra.mxu1 %v14912_v38  ;;  %12999 = vmatprep.mubr.msk.f32.mxu1 %vm14192_vm0, %v14193_v1 }
0x1b44   :  { %13715 = vmatprep.subr.bf16.mxu1 %v14191_v0 }
0x1b45   :  { %13711 = vmatpush3.bf16.msra.mxu0 %v14944_v4 }
0x1b46   :  { %13718 = vmatprep.subr.bf16.mxu0 %v14191_v0 }
0x1b47   :  { %13717 = vmatpush3.bf16.msra.mxu1 %v14920_v2 }
0x1b48   :  { %13724 = vmatprep.subr.bf16.mxu1 %v14191_v0 }
0x1b4a   :  { %13000 = vmatmul.mubr.msk.f32.vlgmr.msra.gmra.mrb[34].mxu1 %vm258_vm3, %v3585_v58 }
0x1b4b   :  { %13726 = vmatpush3.bf16.msra.mxu1 %v14655_v46  ;;  %13021 = vmatprep.mubr.msk.f32.mxu1 %vm14192_vm0, %v14193_v1 }
0x1b4c   :  { %13727 = vmatprep.subr.bf16.mxu1 %v14191_v0 }
0x1b4f   :  { %13729 = vmatpush3.bf16.msra.mxu1 %v14662_v53 }
0x1b50   :  { %13029 = vmatprep.subr.mxu1 %v14193_v1 }
0x1b52   :  { %13022 = vmatmul.mubr.msk.f32.vlgmr.msra.gmra.mrb[36].mxu1 %vm258_vm3, %v3585_v58 }
0x1b53   :  { %13031 = vmatprep.mubr.msk.f32.mxu1 %vm14192_vm0, %v14193_v1 }
0x1b58   :  { %13030 = vmatpush3.xpose.msk.msra.mxu1 %vm258_vm3, %v14792_v22 }
0x1b59   :  { %13039 = vmatprep.subr.mxu1 %v14193_v1 }
0x1c07   :  { %v2982_v42 = vpop.f32.mrb[26].mxu0 }
0x1c08   :  { %v12944_v7 = vpop.f32.mrb[27].mxu0 }
0x1c09   :  { %v3054_v5 = vpop.f32.mrb[26].mxu1 }
0x1c0a   :  { %v3498_v9 = vrot.slane %v3054_v5, 7  ;;  %v12949_v13 = vpop.f32.mrb[27].mxu1 }
0x1c0b   :  { %v3126_v10 = vpop.f32.mrb[28].mxu0 }
0x1c0c   :  { %v3499_v19 = vsel %vm2828_vm11, %v3498_v9, %v2982_v42  ;;  %v3500_v20 = vrot.slane %v3126_v10, 6  ;;  %v12954_v21 = vpop.f32.mrb[29].mxu0 }
0x1c0d   :  { %v3198_v23 = vpop.f32.mrb[28].mxu1 }
0x1c0e   :  { %v3501_v31 = vsel %vm2831_vm12, %v3500_v20, %v3499_v19  ;;  %v3502_v32 = vrot.slane %v3198_v23, 5  ;;  %v12959_v33 = vpop.f32.mrb[29].mxu1 }
0x1c0f   :  { %v3270_v34 = vpop.f32.mrb[30].mxu0 }
0x1c10   :  { %v3503_v17 = vsel %vm2834_vm13, %v3502_v32, %v3501_v31  ;;  %v3504_v35 = vrot.slane %v3270_v34, 4  ;;  %v12964_v44 = vpop.f32.mrb[31].mxu0 }
0x1c11   :  { %v3342_v40 = vpop.f32.mrb[30].mxu1 }
0x1c12   :  { %v3505_v50 = vsel %vm2837_vm14, %v3504_v35, %v3503_v17  ;;  %v3506_v51 = vrot.slane %v3342_v40, 3  ;;  %v12969_v15 = vpop.f32.mrb[31].mxu1 }
0x1c13   :  { %v3414_v36 = vpop.f32.mrb[32].mxu0 }
0x1c14   :  { %v3507_v16 = vsel %vm2840_vm15, %v3506_v51, %v3505_v50  ;;  %v3508_v39 = vrot.slane %v3414_v36, 2  ;;  %v12974_v14 = vpop.f32.mrb[33].mxu0 }
0x1c15   :  { %v3486_v26 = vpop.f32.mrb[32].mxu1 }
0x1c16   :  { %v3509_v43 = vsel %vm2843_vm2, %v3508_v39, %v3507_v16  ;;  %v3510_v45 = vrot.slane %v3486_v26, 1  ;;  %v12979_v47 = vpop.f32.mrb[33].mxu1 }
0x1c18   :  { %v3511_v12 = vsel %vm2846_vm4, %v3510_v45, %v3509_v43 }
0x1c19   :  { %12989 = vmatmul.mubr.msk.f32.vlgmr.msra.gmra.mrb[34].mxu0 %vm258_vm3, %v3511_v12 }
0x1c1a   :  { %13720 = vmatpush3.bf16.msra.mxu0 %v14647_v41  ;;  %13010 = vmatprep.mubr.msk.f32.mxu0 %vm14192_vm0, %v14193_v1 }
0x1c1b   :  { %13721 = vmatprep.subr.bf16.mxu0 %v14191_v0 }
0x1c1d   :  { %v3654_v48 = vpop.f32.mrb[34].mxu1 }
0x1c1e   :  { %v13001_v28 = vpop.f32.mrb[35].mxu1  ;;  %13723 = vmatpush3.bf16.msra.mxu0 %v14658_v49 }
0x1c1f   :  { %13024 = vmatprep.subr.mxu0 %v14193_v1 }
0x1c21   :  { %13011 = vmatmul.mubr.msk.f32.vlgmr.msra.gmra.mrb[36].mxu0 %vm258_vm3, %v3678_v56 }
0x1c22   :  { %13026 = vmatprep.mubr.msk.f32.mxu0 %vm14192_vm0, %v14193_v1 }
0x1c25   :  { %v3818_v55 = vpop.f32.mrb[36].mxu1 }
0x1c26   :  { %v3819_v60 = vadd.f32 %v14688_v8, %v3818_v55  ;;  %v13023_v58 = vpop.f32.mrb[37].mxu1 }
0x1c27   :  { %13025 = vmatpush3.xpose.msk.msra.mxu0 %vm258_vm3, %v14790_v24 }
0x1c28   :  { %3830 = vrot.lane.b32.xlu1 %v3819_v60, %s14195_s21  ;;  %13034 = vmatprep.subr.mxu0 %v14193_v1 }
0x1c9a   :  { %v3831_v19 = vpop.permute.xlu1 %3830 }
0x1cec   :  { %v3580_v59 = vpop.f32.mrb[34].mxu0 }
0x1ced   :  { %v14970_v61 = vadd.f32 %v3654_v48, %v3580_v59  ;;  %v12990_v63 = vpop.f32.mrb[35].mxu0 }
0x1cf4   :  { %v3748_v3 = vpop.f32.mrb[36].mxu0 }
0x1cf5   :  { %v3749_v42 = vadd.f32 %v14695_v18, %v3748_v3  ;;  %v13012_v7 = vpop.f32.mrb[37].mxu0 }
0x1cf7   :  { %v3822_v5 = vadd.f32 %v3819_v60, %v3749_v42 }
0x1cf9   :  { %v12215_v9 = vmul.f32 -1.442695, %v3822_v5 }
0x1cfb   :  { %13917 = vpow2.f32 %v12215_v9 }
0x1d05   :  { %v13918_v8 = vpop.eup %13917 }
0x1d06   :  { %v3826_v13 = vadd.f32 1.0, %v13918_v8 }
0x1d08   :  { %13919 = vrcp.f32 %v3826_v13 }
0x1d12   :  { %v13920_v10 = vpop.eup %13919 }
0x1d13   :  { %v3833_v20 = vmul.f32 %v13920_v10, %v3831_v19  ;;  %v3840_v32 = vsub.f32 1.0, %v13920_v10  ;;  %v3846_v33 = vmul.f32 %v13920_v10, %v14744_v54 }
0x1d15   :  { %3835 = vrot.lane.b32.xlu1 %v3833_v20, %s14195_s21 }
0x1d87   :  { %v3836_v21 = vpop.permute.xlu1 %3835 }
0x1d88   :  { %v3838_v23 = vadd.f32 %v3836_v21, %v3749_v42 }
0x1d8a   :  { %13921 = vtanh.f32 %v3838_v23 }
0x1d94   :  { %v13922_v31 = vpop.eup %13921 }
0x1d95   :  { %3842 = vrot.lane.b32.xlu0 %v13922_v31, %s14196_s5 }
0x1e07   :  { %v3843_v18 = vpop.permute.xlu0 %3842 }
0x1e08   :  { %v3845_v34 = vmul.f32 %v3843_v18, %v3840_v32 }
0x1e0a   :  { %v14976_v17 = vadd.f32 %v3846_v33, %v3845_v34 }
0x1e0c   :  { %v3856_v35 = vrot.slane %v14976_v17, %v14741_v52  ;;  %v3849_v44 = vcombine.high %v14976_v17, %v14976_v17 }
0x1e0e   :  { %v3872_v40 = vrot.slane %v3856_v35, %v14741_v52  ;;  %v3864_v50 = vcombine.high %v3856_v35, %v3856_v35  ;;  %v3863_v51 = vrot.slane %v3849_v44, %v14741_v52 }
0x1e10   :  { %v3901_v15 = vrot.slane %v3872_v40, %v14746_v57  ;;  %v3886_v36 = vrot.slane %v3864_v50, %v14741_v52  ;;  %v3894_v16 = vcombine.high %v3872_v40, %v3872_v40  ;;  %v3865_v14 = vcombine.high %v3863_v51, %v3863_v51 }
0x1e11   :  { %v3879_v43 = vrot.slane %v3863_v51, %v14741_v52 }
0x1e12   :  { %3902 = vrot.lane.b32.xlu1 %v3901_v15, %s14196_s5  ;;  %v3979_v54 = vrot.slane %v3886_v36, %v14746_v57  ;;  %v3896_v39 = vcombine.high %v3886_v36, %v3886_v36  ;;  %v4057_v26 = vrot.slane %v3894_v16, %v14746_v57  ;;  %v3893_v47 = vrot.slane %v3865_v14, %v14741_v52 }
0x1e13   :  { %v4213_v12 = vrot.slane %v3879_v43, %v14746_v57  ;;  %v3895_v48 = vcombine.high %v3879_v43, %v3879_v43 }
0x1e14   :  { %3980 = vrot.lane.b32.xlu0 %v3979_v54, %s14196_s5  ;;  %v4135_v45 = vrot.slane %v3896_v39, %v14746_v57  ;;  %v4291_v28 = vrot.slane %v3893_v47, %v14746_v57  ;;  %v3897_v56 = vcombine.high %v3893_v47, %v3893_v47 }
0x1e15   :  { %v4369_v55 = vrot.slane %v3895_v48, %v14746_v57 }
0x1e16   :  { %4058 = vrot.lane.b32.xlu1 %v4057_v26, %s14196_s5  ;;  %v4447_v60 = vrot.slane %v3897_v56, %v14746_v57 }
0x1e18   :  { %4136 = vrot.lane.b32.xlu0 %v4135_v45, %s14196_s5 }
0x1e1a   :  { %4214 = vrot.lane.b32.xlu1 %v4213_v12, %s14196_s5 }
0x1e1c   :  { %4292 = vrot.lane.b32.xlu0 %v4291_v28, %s14196_s5 }
0x1e1e   :  { %4370 = vrot.lane.b32.xlu1 %v4369_v55, %s14196_s5 }
0x1e20   :  { %4448 = vrot.lane.b32.xlu0 %v4447_v60, %s14196_s5 }
0x1e84   :  { %v3903_v58 = vpop.permute.xlu1 %3902 }
0x1e85   :  { %13027 = vmatmul.mubr.msk.f32.vlgmr.msra.gmra.mrb[38].mxu0 %vm258_vm3, %v3903_v58 }
0x1e86   :  { %13035 = vmatpush3.xpose.msk.msra.mxu0 %vm258_vm3, %v14794_v11  ;;  %v3981_v59 = vpop.permute.xlu0 %3980  ;;  %13036 = vmatprep.mubr.msk.f32.mxu0 %vm14192_vm0, %v14193_v1 }
0x1e87   :  { %13032 = vmatmul.mubr.msk.f32.vlgmr.msra.gmra.mrb[38].mxu1 %vm258_vm3, %v3981_v59  ;;  %13044 = vmatprep.subr.mxu0 %v14193_v1 }
0x1e88   :  { %13040 = vmatpush3.xpose.msk.msra.mxu1 %vm258_vm3, %v14796_v37  ;;  %v4059_v63 = vpop.permute.xlu1 %4058  ;;  %13041 = vmatprep.mubr.msk.f32.mxu1 %vm14192_vm0, %v14193_v1 }
0x1e89   :  { %13037 = vmatmul.mubr.msk.f32.vlgmr.msra.gmra.mrb[40].mxu0 %vm258_vm3, %v4059_v63  ;;  %13049 = vmatprep.subr.mxu1 %v14193_v1 }
0x1e8a   :  { %13045 = vmatpush3.xpose.msk.msra.mxu0 %vm258_vm3, %v14798_v25  ;;  %v4137_v3 = vpop.permute.xlu0 %4136  ;;  %13046 = vmatprep.mubr.msk.f32.mxu0 %vm14192_vm0, %v14193_v1 }
0x1e8b   :  { %13042 = vmatmul.mubr.msk.f32.vlgmr.msra.gmra.mrb[40].mxu1 %vm258_vm3, %v4137_v3  ;;  %13054 = vmatprep.subr.mxu0 %v14193_v1 }
0x1e8c   :  { %13050 = vmatpush3.xpose.msk.msra.mxu1 %vm258_vm3, %v14800_v27  ;;  %v4215_v42 = vpop.permute.xlu1 %4214  ;;  %13051 = vmatprep.mubr.msk.f32.mxu1 %vm14192_vm0, %v14193_v1 }
0x1e8d   :  { %13047 = vmatmul.mubr.msk.f32.vlgmr.msra.gmra.mrb[42].mxu0 %vm258_vm3, %v4215_v42  ;;  %13059 = vmatprep.subr.mxu1 %v14193_v1 }
0x1e8e   :  { %13055 = vmatpush3.xpose.msk.msra.mxu0 %vm258_vm3, %v14802_v29  ;;  %v4293_v7 = vpop.permute.xlu0 %4292  ;;  %13056 = vmatprep.mubr.msk.f32.mxu0 %vm14192_vm0, %v14193_v1 }
0x1e8f   :  { %13052 = vmatmul.mubr.msk.f32.vlgmr.msra.gmra.mrb[42].mxu1 %vm258_vm3, %v4293_v7  ;;  %13064 = vmatprep.subr.mxu0 %v14193_v1 }
0x1e90   :  { %13060 = vmatpush3.xpose.msk.msra.mxu1 %vm258_vm3, %v14804_v30  ;;  %v4371_v5 = vpop.permute.xlu1 %4370  ;;  %13061 = vmatprep.mubr.msk.f32.mxu1 %vm14192_vm0, %v14193_v1 }
0x1e91   :  { %13057 = vmatmul.mubr.msk.f32.vlgmr.msra.gmra.mrb[44].mxu0 %vm258_vm3, %v4371_v5  ;;  %13069 = vmatprep.subr.mxu1 %v14193_v1 }
0x1e92   :  { %13065 = vmatpush3.msra.mxu0 %v14790_v24  ;;  %v4449_v9 = vpop.permute.xlu0 %4448  ;;  %13066 = vmatprep.mubr.msk.f32.mxu0 %vm14192_vm0, %v14193_v1 }
0x1e93   :  { %13062 = vmatmul.mubr.msk.f32.vlgmr.msra.gmra.mrb[44].mxu1 %vm258_vm3, %v4449_v9  ;;  %13074 = vmatprep.subr.mxu0 %v14193_v1 }
0x1e94   :  { %13070 = vmatpush3.msra.mxu1 %v14792_v22  ;;  %13071 = vmatprep.mubr.msk.f32.mxu1 %vm14192_vm0, %v14193_v1 }
0x1e95   :  { %13079 = vmatprep.subr.mxu1 %v14193_v1 }
0x1f58   :  { %v3972_v8 = vpop.f32.mrb[38].mxu0 }
0x1f59   :  { %v13028_v13 = vpop.f32.mrb[39].mxu0 }
0x1f5a   :  { %v4050_v10 = vpop.f32.mrb[38].mxu1 }
0x1f5b   :  { %v4530_v19 = vrot.slane %v4050_v10, 7  ;;  %v13033_v20 = vpop.f32.mrb[39].mxu1 }
0x1f5c   :  { %v4128_v21 = vpop.f32.mrb[40].mxu0 }
0x1f5d   :  { %v4531_v23 = vsel %vm2828_vm11, %v4530_v19, %v3972_v8  ;;  %v4532_v31 = vrot.slane %v4128_v21, 6  ;;  %v13038_v32 = vpop.f32.mrb[41].mxu0 }
0x1f5e   :  { %v4206_v18 = vpop.f32.mrb[40].mxu1 }
0x1f5f   :  { %v4533_v33 = vsel %vm2831_vm12, %v4532_v31, %v4531_v23  ;;  %v4534_v34 = vrot.slane %v4206_v18, 5  ;;  %v13043_v35 = vpop.f32.mrb[41].mxu1 }
0x1f60   :  { %v4284_v44 = vpop.f32.mrb[42].mxu0 }
0x1f61   :  { %v4535_v40 = vsel %vm2834_vm13, %v4534_v34, %v4533_v33  ;;  %v4536_v50 = vrot.slane %v4284_v44, 4  ;;  %v13048_v51 = vpop.f32.mrb[43].mxu0 }
0x1f62   :  { %v4362_v15 = vpop.f32.mrb[42].mxu1 }
0x1f63   :  { %v4537_v36 = vsel %vm2837_vm14, %v4536_v50, %v4535_v40  ;;  %v4538_v16 = vrot.slane %v4362_v15, 3  ;;  %v13053_v54 = vpop.f32.mrb[43].mxu1 }
0x1f64   :  { %v4440_v39 = vpop.f32.mrb[44].mxu0 }
0x1f65   :  { %v4539_v14 = vsel %vm2840_vm15, %v4538_v16, %v4537_v36  ;;  %v4540_v26 = vrot.slane %v4440_v39, 2  ;;  %v13058_v43 = vpop.f32.mrb[45].mxu0 }
0x1f66   :  { %v4518_v45 = vpop.f32.mrb[44].mxu1 }
0x1f67   :  { %v4542_v47 = vrot.slane %v4518_v45, 1  ;;  %v13063_v12 = vpop.f32.mrb[45].mxu1  ;;  %v4541_v48 = vsel %vm2843_vm2, %v4540_v26, %v4539_v14 }
0x1f69   :  { %v4543_v28 = vsel %vm2846_vm4, %v4542_v47, %v4541_v48 }
0x1f6a   :  { %v4545_v56 = vsel %vm2818_vm6, %v4543_v28, -1e+09 }
0x1f6b   :  { %v4546_v55 = vsel %vm2850_vm5, %v4545_v56, -inf }
0x1f6c   :  { %4547 = vmax.xlane.f32.xlu1 %v4546_v55 }
0x1ff9   :  { %v4548_v60 = vpop.xlane.xlu1 %4547 }
0x1ffa   :  { %v4549_v58 = vsub.f32 %v4545_v56, %v4548_v60 }
0x1ffc   :  { %v4550_v59 = vmul.f32 1.442695, %v4549_v58 }
0x1ffe   :  { %13923 = vpow2.f32 %v4550_v59 }
0x2008   :  { %v13924_v63 = vpop.eup %13923 }
0x2009   :  { %v4552_v3 = vmul.f32 %v13924_v63, %v14865_v6 }
0x200b   :  { %v4553_v42 = vsel %vm2850_vm5, %v4552_v3, 0.0 }
0x200c   :  { %4554 = vadd.xlane.f32.xlu0 %v4553_v42 }
0x2022   :  { %5279 = vrot.lane.b32.xlu0 %v14976_v17, %s14196_s5 }
0x2099   :  { %v4555_v7 = vpop.xlane.xlu0 %4554 }
0x209a   :  { %v4556_v5 = vadd.f32 1e-09, %v4555_v7 }
0x209c   :  { %13925 = vrcp.f32 %v4556_v5 }
0x209d   :  { %v5280_v40 = vpop.permute.xlu0 %5279 }
0x20a6   :  { %v13926_v9 = vpop.eup %13925 }
0x20a7   :  { %v4558_v8 = vmul.f32 %v13926_v9, %v4552_v3 }
0x20a9   :  { %v4560_v13 = vcombine.high %v4558_v8, %v4558_v8  ;;  %v4567_v10 = vrot.slane %v4558_v8, %v14741_v52 }
0x20ab   :  { %v4583_v19 = vrot.slane %v4567_v10, %v14741_v52  ;;  %v4575_v20 = vcombine.high %v4567_v10, %v4567_v10  ;;  %v4574_v23 = vrot.slane %v4560_v13, %v14741_v52 }
0x20ad   :  { %13067 = vmatmul.mubr.msk.f32.vlgmr.msra.gmra.mrb[46].mxu0 %vm2850_vm5, %v4583_v19  ;;  %v4597_v21 = vrot.slane %v4575_v20, %v14741_v52  ;;  %v4605_v31 = vcombine.high %v4583_v19, %v4583_v19  ;;  %v4576_v18 = vcombine.high %v4574_v23, %v4574_v23  ;;  %v4590_v33 = vrot.slane %v4574_v23, %v14741_v52  ;;  %v5368_v23 = vld [vmem:[#allocation6 + $0x10] sm:$0xff] }
0x20ae   :  { %13075 = vmatpush3.msra.mxu0 %v14794_v11  ;;  %13076 = vmatprep.mubr.msk.f32.mxu0 %vm14192_vm0, %v14193_v1 }
0x20af   :  { %13072 = vmatmul.mubr.msk.f32.vlgmr.msra.gmra.mrb[46].mxu1 %vm2850_vm5, %v4597_v21  ;;  %13084 = vmatprep.subr.mxu0 %v14193_v1  ;;  %v4607_v32 = vcombine.high %v4597_v21, %v4597_v21  ;;  %v4604_v34 = vrot.slane %v4576_v18, %v14741_v52  ;;  %v4606_v35 = vcombine.high %v4590_v33, %v4590_v33 }
0x20b0   :  { %13080 = vmatpush3.msra.mxu1 %v14796_v37  ;;  %13081 = vmatprep.mubr.msk.f32.mxu1 %vm14192_vm0, %v14193_v1 }
0x20b1   :  { %13077 = vmatmul.mubr.msk.f32.vlgmr.msra.gmra.mrb[48].mxu0 %vm2850_vm5, %v4605_v31  ;;  %13089 = vmatprep.subr.mxu1 %v14193_v1  ;;  %v4608_v44 = vcombine.high %v4604_v34, %v4604_v34 }
0x20b2   :  { %13085 = vmatpush3.msra.mxu0 %v14798_v25  ;;  %13086 = vmatprep.mubr.msk.f32.mxu0 %vm14192_vm0, %v14193_v1 }
0x20b3   :  { %13082 = vmatmul.mubr.msk.f32.vlgmr.msra.gmra.mrb[48].mxu1 %vm2850_vm5, %v4607_v32  ;;  %13094 = vmatprep.subr.mxu0 %v14193_v1  ;;  %v15146_v32 = vld [vmem:[%s15916_s10] ss:$0 sm:$0xff] }
0x20b4   :  { %13090 = vmatpush3.msra.mxu1 %v14800_v27  ;;  %13091 = vmatprep.mubr.msk.f32.mxu1 %vm14192_vm0, %v14193_v1 }
0x20b5   :  { %13087 = vmatmul.mubr.msk.f32.vlgmr.msra.gmra.mrb[50].mxu0 %vm2850_vm5, %v4590_v33  ;;  %13099 = vmatprep.subr.mxu1 %v14193_v1 }
0x20b6   :  { %13095 = vmatpush3.msra.mxu0 %v14802_v29  ;;  %13096 = vmatprep.mubr.msk.f32.mxu0 %vm14192_vm0, %v14193_v1 }
0x20b7   :  { %13092 = vmatmul.mubr.msk.f32.vlgmr.msra.gmra.mrb[50].mxu1 %vm2850_vm5, %v4604_v34  ;;  %13730 = vmatprep.subr.bf16.mxu0 %v14191_v0 }
0x20b8   :  { %13100 = vmatpush3.msra.mxu1 %v14804_v30  ;;  %13101 = vmatprep.mubr.msk.f32.mxu1 %vm14192_vm0, %v14193_v1 }
0x20b9   :  { %13097 = vmatmul.mubr.msk.f32.vlgmr.msra.gmra.mrb[52].mxu0 %vm2850_vm5, %v4606_v35  ;;  %13736 = vmatprep.subr.bf16.mxu1 %v14191_v0 }
0x20ba   :  { %13732 = vmatpush3.bf16.msra.mxu0 %v14940_v62  ;;  %13112 = vmatprep.mubr.msk.f32.mxu0 %vm14192_vm0, %v14193_v1 }
0x20bb   :  { %13102 = vmatmul.mubr.msk.f32.vlgmr.msra.gmra.mrb[52].mxu1 %vm2850_vm5, %v4608_v44  ;;  %13733 = vmatprep.subr.bf16.mxu0 %v14191_v0 }
0x20bc   :  { %13738 = vmatpush3.bf16.msra.mxu1 %v14912_v38  ;;  %13123 = vmatprep.mubr.msk.f32.mxu1 %vm14192_vm0, %v14193_v1 }
0x20bd   :  { %13739 = vmatprep.subr.bf16.mxu1 %v14191_v0 }
0x20be   :  { %13735 = vmatpush3.bf16.msra.mxu0 %v14944_v4 }
0x20bf   :  { %13742 = vmatprep.subr.bf16.mxu0 %v14191_v0 }
0x20c0   :  { %13741 = vmatpush3.bf16.msra.mxu1 %v14920_v2 }
0x20c1   :  { %13748 = vmatprep.subr.bf16.mxu1 %v14191_v0 }
0x20c3   :  { %13124 = vmatmul.mubr.msk.f32.vlgmr.msra.gmra.mrb[54].mxu1 %vm258_vm3, %v5280_v40 }
0x20c4   :  { %13750 = vmatpush3.bf16.msra.mxu1 %v14655_v46  ;;  %13145 = vmatprep.mubr.msk.f32.mxu1 %vm14192_vm0, %v14193_v1 }
0x20c5   :  { %13751 = vmatprep.subr.bf16.mxu1 %v14191_v0 }
0x20c8   :  { %13753 = vmatpush3.bf16.msra.mxu1 %v14662_v53 }
0x20c9   :  { %13153 = vmatprep.subr.mxu1 %v14193_v1 }
0x20cb   :  { %13146 = vmatmul.mubr.msk.f32.vlgmr.msra.gmra.mrb[56].mxu1 %vm258_vm3, %v5280_v40 }
0x20cc   :  { %13155 = vmatprep.mubr.msk.f32.mxu1 %vm14192_vm0, %v14193_v1 }
0x20d1   :  { %13154 = vmatpush3.xpose.msk.msra.mxu1 %vm258_vm3, %v14792_v22 }
0x20d2   :  { %13163 = vmatprep.subr.mxu1 %v14193_v1 }
0x2180   :  { %v4677_v50 = vpop.f32.mrb[46].mxu0 }
0x2181   :  { %v13068_v51 = vpop.f32.mrb[47].mxu0 }
0x2182   :  { %v4749_v15 = vpop.f32.mrb[46].mxu1 }
0x2183   :  { %v5193_v36 = vrot.slane %v4749_v15, 7  ;;  %v13073_v16 = vpop.f32.mrb[47].mxu1 }
0x2184   :  { %v4821_v54 = vpop.f32.mrb[48].mxu0 }
0x2185   :  { %v5194_v39 = vsel %vm2828_vm11, %v5193_v36, %v4677_v50  ;;  %v5195_v14 = vrot.slane %v4821_v54, 6  ;;  %v13078_v26 = vpop.f32.mrb[49].mxu0  ;;  %v15158_v50 = vld [vmem:[%s15915_s9] ss:$0 sm:$0xff] }
0x2186   :  { %v4893_v43 = vpop.f32.mrb[48].mxu1 }
0x2187   :  { %v5196_v45 = vsel %vm2831_vm12, %v5195_v14, %v5194_v39  ;;  %v5197_v47 = vrot.slane %v4893_v43, 5  ;;  %v13083_v12 = vpop.f32.mrb[49].mxu1 }
0x2188   :  { %v4965_v48 = vpop.f32.mrb[50].mxu0 }
0x2189   :  { %v5198_v28 = vsel %vm2834_vm13, %v5197_v47, %v5196_v45  ;;  %v5199_v56 = vrot.slane %v4965_v48, 4  ;;  %v13088_v55 = vpop.f32.mrb[51].mxu0 }
0x218a   :  { %v5037_v60 = vpop.f32.mrb[50].mxu1 }
0x218b   :  { %v5200_v58 = vsel %vm2837_vm14, %v5199_v56, %v5198_v28  ;;  %v5201_v59 = vrot.slane %v5037_v60, 3  ;;  %v13093_v63 = vpop.f32.mrb[51].mxu1 }
0x218c   :  { %v5109_v3 = vpop.f32.mrb[52].mxu0 }
0x218d   :  { %v5202_v42 = vsel %vm2840_vm15, %v5201_v59, %v5200_v58  ;;  %v5203_v7 = vrot.slane %v5109_v3, 2  ;;  %v13098_v5 = vpop.f32.mrb[53].mxu0 }
0x218e   :  { %v5181_v9 = vpop.f32.mrb[52].mxu1 }
0x218f   :  { %v5204_v8 = vsel %vm2843_vm2, %v5203_v7, %v5202_v42  ;;  %v5205_v13 = vrot.slane %v5181_v9, 1  ;;  %v13103_v10 = vpop.f32.mrb[53].mxu1 }
0x2191   :  { %v5206_v19 = vsel %vm2846_vm4, %v5205_v13, %v5204_v8 }
0x2192   :  { %13113 = vmatmul.mubr.msk.f32.vlgmr.msra.gmra.mrb[54].mxu0 %vm258_vm3, %v5206_v19 }
0x2193   :  { %13744 = vmatpush3.bf16.msra.mxu0 %v14647_v41  ;;  %13134 = vmatprep.mubr.msk.f32.mxu0 %vm14192_vm0, %v14193_v1 }
0x2194   :  { %13745 = vmatprep.subr.bf16.mxu0 %v14191_v0 }
0x2196   :  { %v5349_v20 = vpop.f32.mrb[54].mxu1 }
0x2197   :  { %v13125_v21 = vpop.f32.mrb[55].mxu1  ;;  %13747 = vmatpush3.bf16.msra.mxu0 %v14658_v49 }
0x2198   :  { %13148 = vmatprep.subr.mxu0 %v14193_v1 }
0x219a   :  { %13135 = vmatmul.mubr.msk.f32.vlgmr.msra.gmra.mrb[56].mxu0 %vm258_vm3, %v5368_v23 }
0x219b   :  { %13150 = vmatprep.mubr.msk.f32.mxu0 %vm14192_vm0, %v14193_v1 }
0x219e   :  { %v5508_v31 = vpop.f32.mrb[56].mxu1 }
0x219f   :  { %v5509_v18 = vadd.f32 %v15146_v32, %v5508_v31  ;;  %v13147_v33 = vpop.f32.mrb[57].mxu1 }
0x21a0   :  { %13149 = vmatpush3.xpose.msk.msra.mxu0 %vm258_vm3, %v14790_v24 }
0x21a1   :  { %5520 = vrot.lane.b32.xlu1 %v5509_v18, %s14195_s21  ;;  %13158 = vmatprep.subr.mxu0 %v14193_v1 }
0x2213   :  { %v5521_v26 = vpop.permute.xlu1 %5520 }
0x2265   :  { %v5275_v34 = vpop.f32.mrb[54].mxu0 }
0x2266   :  { %v15153_v35 = vadd.f32 %v5349_v20, %v5275_v34  ;;  %v13114_v44 = vpop.f32.mrb[55].mxu0 }
0x226d   :  { %v5438_v40 = vpop.f32.mrb[56].mxu0 }
0x226e   :  { %v5439_v51 = vadd.f32 %v15158_v50, %v5438_v40  ;;  %v13136_v15 = vpop.f32.mrb[57].mxu0 }
0x2270   :  { %v5512_v36 = vadd.f32 %v5509_v18, %v5439_v51 }
0x2272   :  { %v12244_v16 = vmul.f32 -1.442695, %v5512_v36 }
0x2274   :  { %13927 = vpow2.f32 %v12244_v16 }
0x227e   :  { %v13928_v54 = vpop.eup %13927 }
0x227f   :  { %v5516_v39 = vadd.f32 1.0, %v13928_v54 }
0x2281   :  { %13929 = vrcp.f32 %v5516_v39 }
0x228b   :  { %v13930_v14 = vpop.eup %13929 }
0x228c   :  { %v5523_v43 = vmul.f32 %v13930_v14, %v5521_v26  ;;  %v5530_v48 = vsub.f32 1.0, %v13930_v14  ;;  %v5536_v56 = vmul.f32 %v13930_v14, %v14976_v17 }
0x228e   :  { %5525 = vrot.lane.b32.xlu1 %v5523_v43, %s14195_s21 }
0x2300   :  { %v5526_v45 = vpop.permute.xlu1 %5525 }
0x2301   :  { %v5528_v47 = vadd.f32 %v5526_v45, %v5439_v51 }
0x2303   :  { %13931 = vtanh.f32 %v5528_v47 }
0x230d   :  { %v13932_v12 = vpop.eup %13931 }
0x230e   :  { %5532 = vrot.lane.b32.xlu0 %v13932_v12, %s14196_s5 }
0x2380   :  { %v5533_v28 = vpop.permute.xlu0 %5532 }
0x2381   :  { %v5535_v55 = vmul.f32 %v5533_v28, %v5530_v48 }
0x2383   :  { %v15164_v60 = vadd.f32 %v5536_v56, %v5535_v55 }
0x2385   :  { %v5546_v58 = vrot.slane %v15164_v60, %v14741_v52  ;;  %v5539_v59 = vcombine.high %v15164_v60, %v15164_v60 }
0x2387   :  { %v5562_v63 = vrot.slane %v5546_v58, %v14741_v52  ;;  %v5554_v3 = vcombine.high %v5546_v58, %v5546_v58  ;;  %v5553_v42 = vrot.slane %v5539_v59, %v14741_v52 }
0x2389   :  { %v5591_v7 = vrot.slane %v5562_v63, %v14746_v57  ;;  %v5576_v5 = vrot.slane %v5554_v3, %v14741_v52  ;;  %v5584_v9 = vcombine.high %v5562_v63, %v5562_v63  ;;  %v5555_v13 = vcombine.high %v5553_v42, %v5553_v42 }
0x238a   :  { %v5569_v19 = vrot.slane %v5553_v42, %v14741_v52 }
0x238b   :  { %5592 = vrot.lane.b32.xlu1 %v5591_v7, %s14196_s5  ;;  %v5669_v17 = vrot.slane %v5576_v5, %v14746_v57  ;;  %v5586_v8 = vcombine.high %v5576_v5, %v5576_v5  ;;  %v5747_v10 = vrot.slane %v5584_v9, %v14746_v57  ;;  %v5583_v21 = vrot.slane %v5555_v13, %v14741_v52 }
0x238c   :  { %v5903_v23 = vrot.slane %v5569_v19, %v14746_v57  ;;  %v5585_v31 = vcombine.high %v5569_v19, %v5569_v19 }
0x238d   :  { %5670 = vrot.lane.b32.xlu0 %v5669_v17, %s14196_s5  ;;  %v5825_v20 = vrot.slane %v5586_v8, %v14746_v57  ;;  %v5981_v18 = vrot.slane %v5583_v21, %v14746_v57  ;;  %v5587_v33 = vcombine.high %v5583_v21, %v5583_v21 }
0x238e   :  { %v6059_v34 = vrot.slane %v5585_v31, %v14746_v57 }
0x238f   :  { %5748 = vrot.lane.b32.xlu1 %v5747_v10, %s14196_s5  ;;  %v6137_v44 = vrot.slane %v5587_v33, %v14746_v57 }
0x2391   :  { %5826 = vrot.lane.b32.xlu0 %v5825_v20, %s14196_s5 }
0x2393   :  { %5904 = vrot.lane.b32.xlu1 %v5903_v23, %s14196_s5 }
0x2395   :  { %5982 = vrot.lane.b32.xlu0 %v5981_v18, %s14196_s5 }
0x2397   :  { %6060 = vrot.lane.b32.xlu1 %v6059_v34, %s14196_s5 }
0x2399   :  { %6138 = vrot.lane.b32.xlu0 %v6137_v44, %s14196_s5 }
0x23fd   :  { %v5593_v40 = vpop.permute.xlu1 %5592 }
0x23fe   :  { %13151 = vmatmul.mubr.msk.f32.vlgmr.msra.gmra.mrb[58].mxu0 %vm258_vm3, %v5593_v40 }
0x23ff   :  { %13159 = vmatpush3.xpose.msk.msra.mxu0 %vm258_vm3, %v14794_v11  ;;  %v5671_v51 = vpop.permute.xlu0 %5670  ;;  %13160 = vmatprep.mubr.msk.f32.mxu0 %vm14192_vm0, %v14193_v1 }
0x2400   :  { %13156 = vmatmul.mubr.msk.f32.vlgmr.msra.gmra.mrb[58].mxu1 %vm258_vm3, %v5671_v51  ;;  %13168 = vmatprep.subr.mxu0 %v14193_v1 }
0x2401   :  { %13164 = vmatpush3.xpose.msk.msra.mxu1 %vm258_vm3, %v14796_v37  ;;  %v5749_v15 = vpop.permute.xlu1 %5748  ;;  %13165 = vmatprep.mubr.msk.f32.mxu1 %vm14192_vm0, %v14193_v1 }
0x2402   :  { %13161 = vmatmul.mubr.msk.f32.vlgmr.msra.gmra.mrb[60].mxu0 %vm258_vm3, %v5749_v15  ;;  %13173 = vmatprep.subr.mxu1 %v14193_v1 }
0x2403   :  { %13169 = vmatpush3.xpose.msk.msra.mxu0 %vm258_vm3, %v14798_v25  ;;  %v5827_v36 = vpop.permute.xlu0 %5826  ;;  %13170 = vmatprep.mubr.msk.f32.mxu0 %vm14192_vm0, %v14193_v1 }
0x2404   :  { %13166 = vmatmul.mubr.msk.f32.vlgmr.msra.gmra.mrb[60].mxu1 %vm258_vm3, %v5827_v36  ;;  %13178 = vmatprep.subr.mxu0 %v14193_v1 }
0x2405   :  { %13174 = vmatpush3.xpose.msk.msra.mxu1 %vm258_vm3, %v14800_v27  ;;  %v5905_v16 = vpop.permute.xlu1 %5904  ;;  %13175 = vmatprep.mubr.msk.f32.mxu1 %vm14192_vm0, %v14193_v1 }
0x2406   :  { %13171 = vmatmul.mubr.msk.f32.vlgmr.msra.gmra.mrb[62].mxu0 %vm258_vm3, %v5905_v16  ;;  %13183 = vmatprep.subr.mxu1 %v14193_v1 }
0x2407   :  { %13179 = vmatpush3.xpose.msk.msra.mxu0 %vm258_vm3, %v14802_v29  ;;  %v5983_v54 = vpop.permute.xlu0 %5982  ;;  %13180 = vmatprep.mubr.msk.f32.mxu0 %vm14192_vm0, %v14193_v1 }
0x2408   :  { %13176 = vmatmul.mubr.msk.f32.vlgmr.msra.gmra.mrb[62].mxu1 %vm258_vm3, %v5983_v54  ;;  %13188 = vmatprep.subr.mxu0 %v14193_v1 }
0x2409   :  { %13184 = vmatpush3.xpose.msk.msra.mxu1 %vm258_vm3, %v14804_v30  ;;  %v6061_v39 = vpop.permute.xlu1 %6060  ;;  %13185 = vmatprep.mubr.msk.f32.mxu1 %vm14192_vm0, %v14193_v1 }
0x240a   :  { %13181 = vmatmul.mubr.msk.f32.vlgmr.msra.gmra.mrb[64].mxu0 %vm258_vm3, %v6061_v39  ;;  %13193 = vmatprep.subr.mxu1 %v14193_v1 }
0x240b   :  { %13189 = vmatpush3.msra.mxu0 %v14790_v24  ;;  %v6139_v14 = vpop.permute.xlu0 %6138  ;;  %13190 = vmatprep.mubr.msk.f32.mxu0 %vm14192_vm0, %v14193_v1 }
0x240c   :  { %13186 = vmatmul.mubr.msk.f32.vlgmr.msra.gmra.mrb[64].mxu1 %vm258_vm3, %v6139_v14  ;;  %13198 = vmatprep.subr.mxu0 %v14193_v1 }
0x240d   :  { %13194 = vmatpush3.msra.mxu1 %v14792_v22  ;;  %13195 = vmatprep.mubr.msk.f32.mxu1 %vm14192_vm0, %v14193_v1 }
0x240e   :  { %13203 = vmatprep.subr.mxu1 %v14193_v1 }
0x24d1   :  { %v5662_v26 = vpop.f32.mrb[58].mxu0 }
0x24d2   :  { %v13152_v43 = vpop.f32.mrb[59].mxu0 }
0x24d3   :  { %v5740_v45 = vpop.f32.mrb[58].mxu1 }
0x24d4   :  { %v6220_v47 = vrot.slane %v5740_v45, 7  ;;  %v13157_v12 = vpop.f32.mrb[59].mxu1 }
0x24d5   :  { %v5818_v48 = vpop.f32.mrb[60].mxu0 }
0x24d6   :  { %v6221_v28 = vsel %vm2828_vm11, %v6220_v47, %v5662_v26  ;;  %v6222_v56 = vrot.slane %v5818_v48, 6  ;;  %v13162_v55 = vpop.f32.mrb[61].mxu0 }
0x24d7   :  { %v5896_v58 = vpop.f32.mrb[60].mxu1 }
0x24d8   :  { %v6223_v59 = vsel %vm2831_vm12, %v6222_v56, %v6221_v28  ;;  %v6224_v63 = vrot.slane %v5896_v58, 5  ;;  %v13167_v3 = vpop.f32.mrb[61].mxu1 }
0x24d9   :  { %v5974_v42 = vpop.f32.mrb[62].mxu0 }
0x24da   :  { %v6225_v7 = vsel %vm2834_vm13, %v6224_v63, %v6223_v59  ;;  %v6226_v5 = vrot.slane %v5974_v42, 4  ;;  %v13172_v9 = vpop.f32.mrb[63].mxu0 }
0x24db   :  { %v6052_v17 = vpop.f32.mrb[62].mxu1 }
0x24dc   :  { %v6227_v8 = vsel %vm2837_vm14, %v6226_v5, %v6225_v7  ;;  %v6228_v13 = vrot.slane %v6052_v17, 3  ;;  %v13177_v10 = vpop.f32.mrb[63].mxu1 }
0x24dd   :  { %v6130_v19 = vpop.f32.mrb[64].mxu0 }
0x24de   :  { %v6229_v20 = vsel %vm2840_vm15, %v6228_v13, %v6227_v8  ;;  %v6230_v21 = vrot.slane %v6130_v19, 2  ;;  %v13182_v23 = vpop.f32.mrb[65].mxu0 }
0x24df   :  { %v6208_v31 = vpop.f32.mrb[64].mxu1 }
0x24e0   :  { %v6232_v18 = vrot.slane %v6208_v31, 1  ;;  %v13187_v33 = vpop.f32.mrb[65].mxu1  ;;  %v6231_v34 = vsel %vm2843_vm2, %v6230_v21, %v6229_v20 }
0x24e2   :  { %v6233_v44 = vsel %vm2846_vm4, %v6232_v18, %v6231_v34 }
0x24e3   :  { %v6235_v40 = vsel %vm2818_vm6, %v6233_v44, -1e+09 }
0x24e4   :  { %v6236_v51 = vsel %vm2850_vm5, %v6235_v40, -inf }
0x24e5   :  { %6237 = vmax.xlane.f32.xlu1 %v6236_v51 }
0x2572   :  { %v6238_v15 = vpop.xlane.xlu1 %6237 }
0x2573   :  { %v6239_v36 = vsub.f32 %v6235_v40, %v6238_v15 }
0x2575   :  { %v6240_v16 = vmul.f32 1.442695, %v6239_v36 }
0x2577   :  { %13933 = vpow2.f32 %v6240_v16 }
0x2581   :  { %v13934_v54 = vpop.eup %13933 }
0x2582   :  { %v6242_v39 = vmul.f32 %v13934_v54, %v14865_v6 }
0x2584   :  { %v6243_v14 = vsel %vm2850_vm5, %v6242_v39, 0.0 }
0x2585   :  { %6244 = vadd.xlane.f32.xlu0 %v6243_v14 }
0x259b   :  { %6969 = vrot.lane.b32.xlu0 %v15164_v60, %s14196_s5 }
0x2612   :  { %v6245_v26 = vpop.xlane.xlu0 %6244 }
0x2613   :  { %v6246_v43 = vadd.f32 1e-09, %v6245_v26 }
0x2615   :  { %13935 = vrcp.f32 %v6246_v43 }
0x2616   :  { %v6970_v17 = vpop.permute.xlu0 %6969 }
0x261f   :  { %v13936_v45 = vpop.eup %13935 }
0x2620   :  { %v6248_v47 = vmul.f32 %v13936_v45, %v6242_v39 }
0x2622   :  { %v6250_v12 = vcombine.high %v6248_v47, %v6248_v47  ;;  %v6257_v48 = vrot.slane %v6248_v47, %v14741_v52 }
0x2624   :  { %v6273_v28 = vrot.slane %v6257_v48, %v14741_v52  ;;  %v6265_v56 = vcombine.high %v6257_v48, %v6257_v48  ;;  %v6264_v58 = vrot.slane %v6250_v12, %v14741_v52 }
0x2626   :  { %13191 = vmatmul.mubr.msk.f32.vlgmr.msra.gmra.mrb[66].mxu0 %vm2850_vm5, %v6273_v28  ;;  %v6287_v55 = vrot.slane %v6265_v56, %v14741_v52  ;;  %v6295_v59 = vcombine.high %v6273_v28, %v6273_v28  ;;  %v6266_v3 = vcombine.high %v6264_v58, %v6264_v58  ;;  %v6280_v42 = vrot.slane %v6264_v58, %v14741_v52 }
0x2627   :  { %13199 = vmatpush3.msra.mxu0 %v14794_v11  ;;  %13200 = vmatprep.mubr.msk.f32.mxu0 %vm14192_vm0, %v14193_v1 }
0x2628   :  { %13196 = vmatmul.mubr.msk.f32.vlgmr.msra.gmra.mrb[66].mxu1 %vm2850_vm5, %v6287_v55  ;;  %13208 = vmatprep.subr.mxu0 %v14193_v1  ;;  %v6297_v63 = vcombine.high %v6287_v55, %v6287_v55  ;;  %v6294_v7 = vrot.slane %v6266_v3, %v14741_v52  ;;  %v6296_v5 = vcombine.high %v6280_v42, %v6280_v42  ;;  %v7058_v3 = vld [vmem:[#allocation6 + $0x18] sm:$0xff] }
0x2629   :  { %13204 = vmatpush3.msra.mxu1 %v14796_v37  ;;  %13205 = vmatprep.mubr.msk.f32.mxu1 %vm14192_vm0, %v14193_v1 }
0x262a   :  { %13201 = vmatmul.mubr.msk.f32.vlgmr.msra.gmra.mrb[68].mxu0 %vm2850_vm5, %v6295_v59  ;;  %13213 = vmatprep.subr.mxu1 %v14193_v1  ;;  %v6298_v9 = vcombine.high %v6294_v7, %v6294_v7 }
0x262b   :  { %13209 = vmatpush3.msra.mxu0 %v14798_v25  ;;  %13210 = vmatprep.mubr.msk.f32.mxu0 %vm14192_vm0, %v14193_v1 }
0x262c   :  { %13206 = vmatmul.mubr.msk.f32.vlgmr.msra.gmra.mrb[68].mxu1 %vm2850_vm5, %v6297_v63  ;;  %13218 = vmatprep.subr.mxu0 %v14193_v1 }
0x262d   :  { %13214 = vmatpush3.msra.mxu1 %v14800_v27  ;;  %13215 = vmatprep.mubr.msk.f32.mxu1 %vm14192_vm0, %v14193_v1 }
0x262e   :  { %13211 = vmatmul.mubr.msk.f32.vlgmr.msra.gmra.mrb[70].mxu0 %vm2850_vm5, %v6280_v42  ;;  %13223 = vmatprep.subr.mxu1 %v14193_v1 }
0x262f   :  { %13219 = vmatpush3.msra.mxu0 %v14802_v29  ;;  %13220 = vmatprep.mubr.msk.f32.mxu0 %vm14192_vm0, %v14193_v1 }
0x2630   :  { %13216 = vmatmul.mubr.msk.f32.vlgmr.msra.gmra.mrb[70].mxu1 %vm2850_vm5, %v6294_v7  ;;  %13754 = vmatprep.subr.bf16.mxu0 %v14191_v0 }
0x2631   :  { %13224 = vmatpush3.msra.mxu1 %v14804_v30  ;;  %13225 = vmatprep.mubr.msk.f32.mxu1 %vm14192_vm0, %v14193_v1 }
0x2632   :  { %13221 = vmatmul.mubr.msk.f32.vlgmr.msra.gmra.mrb[72].mxu0 %vm2850_vm5, %v6296_v5  ;;  %13760 = vmatprep.subr.bf16.mxu1 %v14191_v0 }
0x2633   :  { %13756 = vmatpush3.bf16.msra.mxu0 %v14940_v62  ;;  %13236 = vmatprep.mubr.msk.f32.mxu0 %vm14192_vm0, %v14193_v1 }
0x2634   :  { %13226 = vmatmul.mubr.msk.f32.vlgmr.msra.gmra.mrb[72].mxu1 %vm2850_vm5, %v6298_v9  ;;  %13757 = vmatprep.subr.bf16.mxu0 %v14191_v0 }
0x2635   :  { %13762 = vmatpush3.bf16.msra.mxu1 %v14912_v38  ;;  %13247 = vmatprep.mubr.msk.f32.mxu1 %vm14192_vm0, %v14193_v1 }
0x2636   :  { %13763 = vmatprep.subr.bf16.mxu1 %v14191_v0 }
0x2637   :  { %13759 = vmatpush3.bf16.msra.mxu0 %v14944_v4 }
0x2638   :  { %13766 = vmatprep.subr.bf16.mxu0 %v14191_v0 }
0x2639   :  { %13765 = vmatpush3.bf16.msra.mxu1 %v14920_v2 }
0x263a   :  { %13772 = vmatprep.subr.bf16.mxu1 %v14191_v0 }
0x263c   :  { %13248 = vmatmul.mubr.msk.f32.vlgmr.msra.gmra.mrb[74].mxu1 %vm258_vm3, %v6970_v17 }
0x263d   :  { %13774 = vmatpush3.bf16.msra.mxu1 %v14655_v46  ;;  %13269 = vmatprep.mubr.msk.f32.mxu1 %vm14192_vm0, %v14193_v1 }
0x263e   :  { %13775 = vmatprep.subr.bf16.mxu1 %v14191_v0 }
0x2641   :  { %13777 = vmatpush3.bf16.msra.mxu1 %v14662_v53 }
0x2642   :  { %13277 = vmatprep.subr.mxu1 %v14193_v1 }
0x2644   :  { %13270 = vmatmul.mubr.msk.f32.vlgmr.msra.gmra.mrb[76].mxu1 %vm258_vm3, %v6970_v17 }
0x2645   :  { %13279 = vmatprep.mubr.msk.f32.mxu1 %vm14192_vm0, %v14193_v1 }
0x264a   :  { %13278 = vmatpush3.xpose.msk.msra.mxu1 %vm258_vm3, %v14792_v22 }
0x264b   :  { %13287 = vmatprep.subr.mxu1 %v14193_v1 }
0x26f9   :  { %v6367_v8 = vpop.f32.mrb[66].mxu0 }
0x26fa   :  { %v13192_v13 = vpop.f32.mrb[67].mxu0 }
0x26fb   :  { %v6439_v10 = vpop.f32.mrb[66].mxu1 }
0x26fc   :  { %v6883_v19 = vrot.slane %v6439_v10, 7  ;;  %v13197_v20 = vpop.f32.mrb[67].mxu1 }
0x26fd   :  { %v6511_v21 = vpop.f32.mrb[68].mxu0 }
0x26fe   :  { %v6884_v23 = vsel %vm2828_vm11, %v6883_v19, %v6367_v8  ;;  %v6885_v31 = vrot.slane %v6511_v21, 6  ;;  %v13202_v18 = vpop.f32.mrb[69].mxu0 }
0x26ff   :  { %v6583_v33 = vpop.f32.mrb[68].mxu1 }
0x2700   :  { %v6886_v34 = vsel %vm2831_vm12, %v6885_v31, %v6884_v23  ;;  %v6887_v44 = vrot.slane %v6583_v33, 5  ;;  %v13207_v40 = vpop.f32.mrb[69].mxu1 }
0x2701   :  { %v6655_v51 = vpop.f32.mrb[70].mxu0 }
0x2702   :  { %v6888_v15 = vsel %vm2834_vm13, %v6887_v44, %v6886_v34  ;;  %v6889_v36 = vrot.slane %v6655_v51, 4  ;;  %v13212_v16 = vpop.f32.mrb[71].mxu0 }
0x2703   :  { %v6727_v54 = vpop.f32.mrb[70].mxu1 }
0x2704   :  { %v6890_v39 = vsel %vm2837_vm14, %v6889_v36, %v6888_v15  ;;  %v6891_v14 = vrot.slane %v6727_v54, 3  ;;  %v13217_v26 = vpop.f32.mrb[71].mxu1 }
0x2705   :  { %v6799_v43 = vpop.f32.mrb[72].mxu0 }
0x2706   :  { %v6892_v45 = vsel %vm2840_vm15, %v6891_v14, %v6890_v39  ;;  %v6893_v47 = vrot.slane %v6799_v43, 2  ;;  %v13222_v12 = vpop.f32.mrb[73].mxu0 }
0x2707   :  { %v6871_v48 = vpop.f32.mrb[72].mxu1 }
0x2708   :  { %v6894_v28 = vsel %vm2843_vm2, %v6893_v47, %v6892_v45  ;;  %v6895_v56 = vrot.slane %v6871_v48, 1  ;;  %v13227_v55 = vpop.f32.mrb[73].mxu1 }
0x270a   :  { %v6896_v58 = vsel %vm2846_vm4, %v6895_v56, %v6894_v28 }
0x270b   :  { %13237 = vmatmul.mubr.msk.f32.vlgmr.msra.gmra.mrb[74].mxu0 %vm258_vm3, %v6896_v58 }
0x270c   :  { %13768 = vmatpush3.bf16.msra.mxu0 %v14647_v41  ;;  %13258 = vmatprep.mubr.msk.f32.mxu0 %vm14192_vm0, %v14193_v1 }
0x270d   :  { %13769 = vmatprep.subr.bf16.mxu0 %v14191_v0 }
0x270f   :  { %v7039_v59 = vpop.f32.mrb[74].mxu1 }
0x2710   :  { %v13249_v63 = vpop.f32.mrb[75].mxu1  ;;  %13771 = vmatpush3.bf16.msra.mxu0 %v14658_v49 }
0x2711   :  { %13272 = vmatprep.subr.mxu0 %v14193_v1 }
0x2713   :  { %13259 = vmatmul.mubr.msk.f32.vlgmr.msra.gmra.mrb[76].mxu0 %vm258_vm3, %v7058_v3 }
0x2714   :  { %13274 = vmatprep.mubr.msk.f32.mxu0 %vm14192_vm0, %v14193_v1 }
0x2717   :  { %v7198_v42 = vpop.f32.mrb[76].mxu1 }
0x2718   :  { %v7199_v7 = vadd.f32 %v15146_v32, %v7198_v42  ;;  %v13271_v5 = vpop.f32.mrb[77].mxu1 }
0x2719   :  { %13273 = vmatpush3.xpose.msk.msra.mxu0 %vm258_vm3, %v14790_v24 }
0x271a   :  { %7210 = vrot.lane.b32.xlu1 %v7199_v7, %s14195_s21  ;;  %13282 = vmatprep.subr.mxu0 %v14193_v1 }
0x278c   :  { %v7211_v33 = vpop.permute.xlu1 %7210 }
0x27de   :  { %v6965_v9 = vpop.f32.mrb[74].mxu0 }
0x27df   :  { %v15336_v17 = vadd.f32 %v7039_v59, %v6965_v9  ;;  %v13238_v8 = vpop.f32.mrb[75].mxu0 }
0x27e6   :  { %v7128_v13 = vpop.f32.mrb[76].mxu0 }
0x27e7   :  { %v7129_v10 = vadd.f32 %v15158_v50, %v7128_v13  ;;  %v13260_v19 = vpop.f32.mrb[77].mxu0 }
0x27e9   :  { %v7202_v20 = vadd.f32 %v7199_v7, %v7129_v10 }
0x27eb   :  { %v12273_v21 = vmul.f32 -1.442695, %v7202_v20 }
0x27ed   :  { %13937 = vpow2.f32 %v12273_v21 }
0x27f7   :  { %v13938_v23 = vpop.eup %13937 }
0x27f8   :  { %v7206_v31 = vadd.f32 1.0, %v13938_v23 }
0x27fa   :  { %13939 = vrcp.f32 %v7206_v31 }
0x2804   :  { %v13940_v18 = vpop.eup %13939 }
0x2805   :  { %v7213_v34 = vmul.f32 %v13940_v18, %v7211_v33  ;;  %v7220_v15 = vsub.f32 1.0, %v13940_v18  ;;  %v7226_v16 = vmul.f32 %v13940_v18, %v15164_v60 }
0x2807   :  { %7215 = vrot.lane.b32.xlu1 %v7213_v34, %s14195_s21 }
0x2879   :  { %v7216_v44 = vpop.permute.xlu1 %7215 }
0x287a   :  { %v7218_v40 = vadd.f32 %v7216_v44, %v7129_v10 }
0x287c   :  { %13941 = vtanh.f32 %v7218_v40 }
0x2886   :  { %v13942_v51 = vpop.eup %13941 }
0x2887   :  { %7222 = vrot.lane.b32.xlu0 %v13942_v51, %s14196_s5 }
0x28f9   :  { %v7223_v36 = vpop.permute.xlu0 %7222 }
0x28fa   :  { %v7225_v54 = vmul.f32 %v7223_v36, %v7220_v15 }
0x28fc   :  { %v15342_v39 = vadd.f32 %v7226_v16, %v7225_v54 }
0x28fe   :  { %v7229_v14 = vcombine.high %v15342_v39, %v15342_v39  ;;  %v7236_v26 = vrot.slane %v15342_v39, %v14741_v52 }
0x2900   :  { %v7252_v43 = vrot.slane %v7236_v26, %v14741_v52  ;;  %v7244_v45 = vcombine.high %v7236_v26, %v7236_v26  ;;  %v7243_v47 = vrot.slane %v7229_v14, %v14741_v52 }
0x2902   :  { %v7281_v12 = vrot.slane %v7252_v43, %v14746_v57  ;;  %v7266_v48 = vrot.slane %v7244_v45, %v14741_v52  ;;  %v7274_v28 = vcombine.high %v7252_v43, %v7252_v43  ;;  %v7245_v55 = vcombine.high %v7243_v47, %v7243_v47 }
0x2903   :  { %v7259_v59 = vrot.slane %v7243_v47, %v14741_v52 }
0x2904   :  { %7282 = vrot.lane.b32.xlu1 %v7281_v12, %s14196_s5  ;;  %v7359_v60 = vrot.slane %v7266_v48, %v14746_v57  ;;  %v7276_v56 = vcombine.high %v7266_v48, %v7266_v48  ;;  %v7437_v58 = vrot.slane %v7274_v28, %v14746_v57  ;;  %v7273_v3 = vrot.slane %v7245_v55, %v14741_v52 }
0x2905   :  { %v7593_v42 = vrot.slane %v7259_v59, %v14746_v57  ;;  %v7275_v7 = vcombine.high %v7259_v59, %v7259_v59 }
0x2906   :  { %7360 = vrot.lane.b32.xlu0 %v7359_v60, %s14196_s5  ;;  %v7515_v63 = vrot.slane %v7276_v56, %v14746_v57  ;;  %v7671_v5 = vrot.slane %v7273_v3, %v14746_v57  ;;  %v7277_v9 = vcombine.high %v7273_v3, %v7273_v3 }
0x2907   :  { %v7749_v8 = vrot.slane %v7275_v7, %v14746_v57 }
0x2908   :  { %7438 = vrot.lane.b32.xlu1 %v7437_v58, %s14196_s5  ;;  %v7827_v13 = vrot.slane %v7277_v9, %v14746_v57 }
0x290a   :  { %7516 = vrot.lane.b32.xlu0 %v7515_v63, %s14196_s5 }
0x290c   :  { %7594 = vrot.lane.b32.xlu1 %v7593_v42, %s14196_s5 }
0x290e   :  { %7672 = vrot.lane.b32.xlu0 %v7671_v5, %s14196_s5 }
0x2910   :  { %7750 = vrot.lane.b32.xlu1 %v7749_v8, %s14196_s5 }
0x2912   :  { %7828 = vrot.lane.b32.xlu0 %v7827_v13, %s14196_s5 }
0x2976   :  { %v7283_v10 = vpop.permute.xlu1 %7282 }
0x2977   :  { %13275 = vmatmul.mubr.msk.f32.vlgmr.msra.gmra.mrb[78].mxu0 %vm258_vm3, %v7283_v10 }
0x2978   :  { %13283 = vmatpush3.xpose.msk.msra.mxu0 %vm258_vm3, %v14794_v11  ;;  %v7361_v19 = vpop.permute.xlu0 %7360  ;;  %13284 = vmatprep.mubr.msk.f32.mxu0 %vm14192_vm0, %v14193_v1 }
0x2979   :  { %13280 = vmatmul.mubr.msk.f32.vlgmr.msra.gmra.mrb[78].mxu1 %vm258_vm3, %v7361_v19  ;;  %13292 = vmatprep.subr.mxu0 %v14193_v1 }
0x297a   :  { %13288 = vmatpush3.xpose.msk.msra.mxu1 %vm258_vm3, %v14796_v37  ;;  %v7439_v20 = vpop.permute.xlu1 %7438  ;;  %13289 = vmatprep.mubr.msk.f32.mxu1 %vm14192_vm0, %v14193_v1 }
0x297b   :  { %13285 = vmatmul.mubr.msk.f32.vlgmr.msra.gmra.mrb[80].mxu0 %vm258_vm3, %v7439_v20  ;;  %13297 = vmatprep.subr.mxu1 %v14193_v1 }
0x297c   :  { %13293 = vmatpush3.xpose.msk.msra.mxu0 %vm258_vm3, %v14798_v25  ;;  %v7517_v21 = vpop.permute.xlu0 %7516  ;;  %13294 = vmatprep.mubr.msk.f32.mxu0 %vm14192_vm0, %v14193_v1 }
0x297d   :  { %13290 = vmatmul.mubr.msk.f32.vlgmr.msra.gmra.mrb[80].mxu1 %vm258_vm3, %v7517_v21  ;;  %13302 = vmatprep.subr.mxu0 %v14193_v1 }
0x297e   :  { %13298 = vmatpush3.xpose.msk.msra.mxu1 %vm258_vm3, %v14800_v27  ;;  %v7595_v23 = vpop.permute.xlu1 %7594  ;;  %13299 = vmatprep.mubr.msk.f32.mxu1 %vm14192_vm0, %v14193_v1 }
0x297f   :  { %13295 = vmatmul.mubr.msk.f32.vlgmr.msra.gmra.mrb[82].mxu0 %vm258_vm3, %v7595_v23  ;;  %13307 = vmatprep.subr.mxu1 %v14193_v1 }
0x2980   :  { %13303 = vmatpush3.xpose.msk.msra.mxu0 %vm258_vm3, %v14802_v29  ;;  %v7673_v31 = vpop.permute.xlu0 %7672  ;;  %13304 = vmatprep.mubr.msk.f32.mxu0 %vm14192_vm0, %v14193_v1 }
0x2981   :  { %13300 = vmatmul.mubr.msk.f32.vlgmr.msra.gmra.mrb[82].mxu1 %vm258_vm3, %v7673_v31  ;;  %13312 = vmatprep.subr.mxu0 %v14193_v1 }
0x2982   :  { %13308 = vmatpush3.xpose.msk.msra.mxu1 %vm258_vm3, %v14804_v30  ;;  %v7751_v18 = vpop.permute.xlu1 %7750  ;;  %13309 = vmatprep.mubr.msk.f32.mxu1 %vm14192_vm0, %v14193_v1 }
0x2983   :  { %13305 = vmatmul.mubr.msk.f32.vlgmr.msra.gmra.mrb[84].mxu0 %vm258_vm3, %v7751_v18  ;;  %13317 = vmatprep.subr.mxu1 %v14193_v1 }
0x2984   :  { %13313 = vmatpush3.msra.mxu0 %v14790_v24  ;;  %v7829_v33 = vpop.permute.xlu0 %7828  ;;  %13314 = vmatprep.mubr.msk.f32.mxu0 %vm14192_vm0, %v14193_v1 }
0x2985   :  { %13310 = vmatmul.mubr.msk.f32.vlgmr.msra.gmra.mrb[84].mxu1 %vm258_vm3, %v7829_v33  ;;  %13322 = vmatprep.subr.mxu0 %v14193_v1 }
0x2986   :  { %13318 = vmatpush3.msra.mxu1 %v14792_v22  ;;  %13319 = vmatprep.mubr.msk.f32.mxu1 %vm14192_vm0, %v14193_v1 }
0x2987   :  { %13327 = vmatprep.subr.mxu1 %v14193_v1 }
0x2a4a   :  { %v7352_v34 = vpop.f32.mrb[78].mxu0 }
0x2a4b   :  { %v13276_v44 = vpop.f32.mrb[79].mxu0 }
0x2a4c   :  { %v7430_v40 = vpop.f32.mrb[78].mxu1 }
0x2a4d   :  { %v7910_v51 = vrot.slane %v7430_v40, 7  ;;  %v13281_v15 = vpop.f32.mrb[79].mxu1 }
0x2a4e   :  { %v7508_v36 = vpop.f32.mrb[80].mxu0 }
0x2a4f   :  { %v7911_v16 = vsel %vm2828_vm11, %v7910_v51, %v7352_v34  ;;  %v7912_v54 = vrot.slane %v7508_v36, 6  ;;  %v13286_v14 = vpop.f32.mrb[81].mxu0 }
0x2a50   :  { %v7586_v26 = vpop.f32.mrb[80].mxu1 }
0x2a51   :  { %v7913_v43 = vsel %vm2831_vm12, %v7912_v54, %v7911_v16  ;;  %v7914_v45 = vrot.slane %v7586_v26, 5  ;;  %v13291_v47 = vpop.f32.mrb[81].mxu1 }
0x2a52   :  { %v7664_v12 = vpop.f32.mrb[82].mxu0 }
0x2a53   :  { %v7915_v48 = vsel %vm2834_vm13, %v7914_v45, %v7913_v43  ;;  %v7916_v28 = vrot.slane %v7664_v12, 4  ;;  %v13296_v60 = vpop.f32.mrb[83].mxu0 }
0x2a54   :  { %v7742_v56 = vpop.f32.mrb[82].mxu1 }
0x2a55   :  { %v7917_v55 = vsel %vm2837_vm14, %v7916_v28, %v7915_v48  ;;  %v7918_v58 = vrot.slane %v7742_v56, 3  ;;  %v13301_v59 = vpop.f32.mrb[83].mxu1 }
0x2a56   :  { %v7820_v63 = vpop.f32.mrb[84].mxu0 }
0x2a57   :  { %v7919_v3 = vsel %vm2840_vm15, %v7918_v58, %v7917_v55  ;;  %v7920_v42 = vrot.slane %v7820_v63, 2  ;;  %v13306_v7 = vpop.f32.mrb[85].mxu0 }
0x2a58   :  { %v7898_v5 = vpop.f32.mrb[84].mxu1 }
0x2a59   :  { %v7921_v9 = vsel %vm2843_vm2, %v7920_v42, %v7919_v3  ;;  %v7922_v8 = vrot.slane %v7898_v5, 1  ;;  %v13311_v13 = vpop.f32.mrb[85].mxu1 }
0x2a5b   :  { %v7923_v10 = vsel %vm2846_vm4, %v7922_v8, %v7921_v9 }
0x2a5c   :  { %v7925_v19 = vsel %vm2818_vm6, %v7923_v10, -1e+09 }
0x2a5d   :  { %v7926_v20 = vsel %vm2850_vm5, %v7925_v19, -inf }
0x2a5e   :  { %7927 = vmax.xlane.f32.xlu1 %v7926_v20 }
0x2aeb   :  { %v7928_v21 = vpop.xlane.xlu1 %7927 }
0x2aec   :  { %v7929_v23 = vsub.f32 %v7925_v19, %v7928_v21 }
0x2aee   :  { %v7930_v31 = vmul.f32 1.442695, %v7929_v23 }
0x2af0   :  { %13943 = vpow2.f32 %v7930_v31 }
0x2afa   :  { %v13944_v18 = vpop.eup %13943 }
0x2afb   :  { %v7932_v33 = vmul.f32 %v13944_v18, %v14865_v6 }
0x2afd   :  { %v7933_v34 = vsel %vm2850_vm5, %v7932_v33, 0.0 }
0x2afe   :  { %7934 = vadd.xlane.f32.xlu0 %v7933_v34 }
0x2b14   :  { %8659 = vrot.lane.b32.xlu0 %v15342_v39, %s14196_s5 }
0x2b8b   :  { %v7935_v44 = vpop.xlane.xlu0 %7934 }
0x2b8c   :  { %v7936_v40 = vadd.f32 1e-09, %v7935_v44 }
0x2b8e   :  { %13945 = vrcp.f32 %v7936_v40 }
0x2b8f   :  { %v8660_v55 = vpop.permute.xlu0 %8659 }
0x2b98   :  { %v13946_v51 = vpop.eup %13945 }
0x2b99   :  { %v7938_v15 = vmul.f32 %v13946_v51, %v7932_v33 }
0x2b9b   :  { %v7940_v36 = vcombine.high %v7938_v15, %v7938_v15  ;;  %v7947_v16 = vrot.slane %v7938_v15, %v14741_v52 }
0x2b9d   :  { %v7963_v54 = vrot.slane %v7947_v16, %v14741_v52  ;;  %v7955_v14 = vcombine.high %v7947_v16, %v7947_v16  ;;  %v7954_v43 = vrot.slane %v7940_v36, %v14741_v52 }
0x2b9f   :  { %13315 = vmatmul.mubr.msk.f32.vlgmr.msra.gmra.mrb[86].mxu0 %vm2850_vm5, %v7963_v54  ;;  %v7977_v26 = vrot.slane %v7955_v14, %v14741_v52  ;;  %v7985_v45 = vcombine.high %v7963_v54, %v7963_v54  ;;  %v7956_v12 = vcombine.high %v7954_v43, %v7954_v43  ;;  %v7970_v48 = vrot.slane %v7954_v43, %v14741_v52 }
0x2ba0   :  { %13323 = vmatpush3.msra.mxu0 %v14794_v11  ;;  %13324 = vmatprep.mubr.msk.f32.mxu0 %vm14192_vm0, %v14193_v1 }
0x2ba1   :  { %13320 = vmatmul.mubr.msk.f32.vlgmr.msra.gmra.mrb[86].mxu1 %vm2850_vm5, %v7977_v26  ;;  %13332 = vmatprep.subr.mxu0 %v14193_v1  ;;  %v7987_v47 = vcombine.high %v7977_v26, %v7977_v26  ;;  %v7984_v28 = vrot.slane %v7956_v12, %v14741_v52  ;;  %v7986_v60 = vcombine.high %v7970_v48, %v7970_v48 }
0x2ba2   :  { %13328 = vmatpush3.msra.mxu1 %v14796_v37  ;;  %13329 = vmatprep.mubr.msk.f32.mxu1 %vm14192_vm0, %v14193_v1 }
0x2ba3   :  { %13325 = vmatmul.mubr.msk.f32.vlgmr.msra.gmra.mrb[88].mxu0 %vm2850_vm5, %v7985_v45  ;;  %13337 = vmatprep.subr.mxu1 %v14193_v1  ;;  %v7988_v56 = vcombine.high %v7984_v28, %v7984_v28 }
0x2ba4   :  { %13333 = vmatpush3.msra.mxu0 %v14798_v25  ;;  %13334 = vmatprep.mubr.msk.f32.mxu0 %vm14192_vm0, %v14193_v1 }
0x2ba5   :  { %13330 = vmatmul.mubr.msk.f32.vlgmr.msra.gmra.mrb[88].mxu1 %vm2850_vm5, %v7987_v47  ;;  %13342 = vmatprep.subr.mxu0 %v14193_v1 }
0x2ba6   :  { %13338 = vmatpush3.msra.mxu1 %v14800_v27  ;;  %13339 = vmatprep.mubr.msk.f32.mxu1 %vm14192_vm0, %v14193_v1 }
0x2ba7   :  { %13335 = vmatmul.mubr.msk.f32.vlgmr.msra.gmra.mrb[90].mxu0 %vm2850_vm5, %v7970_v48  ;;  %13347 = vmatprep.subr.mxu1 %v14193_v1  ;;  %v8748_v48 = vld [vmem:[#allocation6 + $0x20] sm:$0xff] }
0x2ba8   :  { %13343 = vmatpush3.msra.mxu0 %v14802_v29  ;;  %13344 = vmatprep.mubr.msk.f32.mxu0 %vm14192_vm0, %v14193_v1 }
0x2ba9   :  { %13340 = vmatmul.mubr.msk.f32.vlgmr.msra.gmra.mrb[90].mxu1 %vm2850_vm5, %v7984_v28  ;;  %13778 = vmatprep.subr.bf16.mxu0 %v14191_v0 }
0x2baa   :  { %13348 = vmatpush3.msra.mxu1 %v14804_v30  ;;  %13349 = vmatprep.mubr.msk.f32.mxu1 %vm14192_vm0, %v14193_v1 }
0x2bab   :  { %13345 = vmatmul.mubr.msk.f32.vlgmr.msra.gmra.mrb[92].mxu0 %vm2850_vm5, %v7986_v60  ;;  %13784 = vmatprep.subr.bf16.mxu1 %v14191_v0 }
0x2bac   :  { %13780 = vmatpush3.bf16.msra.mxu0 %v14940_v62  ;;  %13360 = vmatprep.mubr.msk.f32.mxu0 %vm14192_vm0, %v14193_v1 }
0x2bad   :  { %13350 = vmatmul.mubr.msk.f32.vlgmr.msra.gmra.mrb[92].mxu1 %vm2850_vm5, %v7988_v56  ;;  %13781 = vmatprep.subr.bf16.mxu0 %v14191_v0 }
0x2bae   :  { %13786 = vmatpush3.bf16.msra.mxu1 %v14912_v38  ;;  %13371 = vmatprep.mubr.msk.f32.mxu1 %vm14192_vm0, %v14193_v1 }
0x2baf   :  { %13787 = vmatprep.subr.bf16.mxu1 %v14191_v0 }
0x2bb0   :  { %13783 = vmatpush3.bf16.msra.mxu0 %v14944_v4 }
0x2bb1   :  { %13790 = vmatprep.subr.bf16.mxu0 %v14191_v0 }
0x2bb2   :  { %13789 = vmatpush3.bf16.msra.mxu1 %v14920_v2 }
0x2bb3   :  { %13796 = vmatprep.subr.bf16.mxu1 %v14191_v0 }
0x2bb5   :  { %13372 = vmatmul.mubr.msk.f32.vlgmr.msra.gmra.mrb[94].mxu1 %vm258_vm3, %v8660_v55 }
0x2bb6   :  { %13798 = vmatpush3.bf16.msra.mxu1 %v14655_v46  ;;  %13393 = vmatprep.mubr.msk.f32.mxu1 %vm14192_vm0, %v14193_v1 }
0x2bb7   :  { %13799 = vmatprep.subr.bf16.mxu1 %v14191_v0 }
0x2bba   :  { %13801 = vmatpush3.bf16.msra.mxu1 %v14662_v53 }
0x2bbb   :  { %13401 = vmatprep.subr.mxu1 %v14193_v1 }
0x2bbd   :  { %13394 = vmatmul.mubr.msk.f32.vlgmr.msra.gmra.mrb[96].mxu1 %vm258_vm3, %v8660_v55 }
0x2bbe   :  { %13403 = vmatprep.mubr.msk.f32.mxu1 %vm14192_vm0, %v14193_v1 }
0x2bc3   :  { %13402 = vmatpush3.xpose.msk.msra.mxu1 %vm258_vm3, %v14792_v22 }
0x2bc4   :  { %13411 = vmatprep.subr.mxu1 %v14193_v1 }
0x2c72   :  { %v8057_v58 = vpop.f32.mrb[86].mxu0 }
0x2c73   :  { %v13316_v59 = vpop.f32.mrb[87].mxu0 }
0x2c74   :  { %v8129_v63 = vpop.f32.mrb[86].mxu1 }
0x2c75   :  { %v8573_v3 = vrot.slane %v8129_v63, 7  ;;  %v13321_v42 = vpop.f32.mrb[87].mxu1 }
0x2c76   :  { %v8201_v7 = vpop.f32.mrb[88].mxu0 }
0x2c77   :  { %v8574_v5 = vsel %vm2828_vm11, %v8573_v3, %v8057_v58  ;;  %v8575_v9 = vrot.slane %v8201_v7, 6  ;;  %v13326_v8 = vpop.f32.mrb[89].mxu0 }
0x2c78   :  { %v8273_v13 = vpop.f32.mrb[88].mxu1 }
0x2c79   :  { %v8576_v10 = vsel %vm2831_vm12, %v8575_v9, %v8574_v5  ;;  %v8577_v19 = vrot.slane %v8273_v13, 5  ;;  %v13331_v20 = vpop.f32.mrb[89].mxu1 }
0x2c7a   :  { %v8345_v21 = vpop.f32.mrb[90].mxu0 }
0x2c7b   :  { %v8578_v23 = vsel %vm2834_vm13, %v8577_v19, %v8576_v10  ;;  %v8579_v31 = vrot.slane %v8345_v21, 4  ;;  %v13336_v18 = vpop.f32.mrb[91].mxu0 }
0x2c7c   :  { %v8417_v33 = vpop.f32.mrb[90].mxu1 }
0x2c7d   :  { %v8580_v34 = vsel %vm2837_vm14, %v8579_v31, %v8578_v23  ;;  %v8581_v44 = vrot.slane %v8417_v33, 3  ;;  %v13341_v40 = vpop.f32.mrb[91].mxu1 }
0x2c7e   :  { %v8489_v51 = vpop.f32.mrb[92].mxu0 }
0x2c7f   :  { %v8582_v15 = vsel %vm2840_vm15, %v8581_v44, %v8580_v34  ;;  %v8583_v36 = vrot.slane %v8489_v51, 2  ;;  %v13346_v16 = vpop.f32.mrb[93].mxu0 }
0x2c80   :  { %v8561_v54 = vpop.f32.mrb[92].mxu1 }
0x2c81   :  { %v8584_v14 = vsel %vm2843_vm2, %v8583_v36, %v8582_v15  ;;  %v8585_v26 = vrot.slane %v8561_v54, 1  ;;  %v13351_v43 = vpop.f32.mrb[93].mxu1 }
0x2c83   :  { %v8586_v45 = vsel %vm2846_vm4, %v8585_v26, %v8584_v14 }
0x2c84   :  { %13361 = vmatmul.mubr.msk.f32.vlgmr.msra.gmra.mrb[94].mxu0 %vm258_vm3, %v8586_v45 }
0x2c85   :  { %13792 = vmatpush3.bf16.msra.mxu0 %v14647_v41  ;;  %13382 = vmatprep.mubr.msk.f32.mxu0 %vm14192_vm0, %v14193_v1 }
0x2c86   :  { %13793 = vmatprep.subr.bf16.mxu0 %v14191_v0 }
0x2c88   :  { %v8729_v47 = vpop.f32.mrb[94].mxu1 }
0x2c89   :  { %v13373_v12 = vpop.f32.mrb[95].mxu1  ;;  %13795 = vmatpush3.bf16.msra.mxu0 %v14658_v49 }
0x2c8a   :  { %13396 = vmatprep.subr.mxu0 %v14193_v1 }
0x2c8c   :  { %13383 = vmatmul.mubr.msk.f32.vlgmr.msra.gmra.mrb[96].mxu0 %vm258_vm3, %v8748_v48 }
0x2c8d   :  { %13398 = vmatprep.mubr.msk.f32.mxu0 %vm14192_vm0, %v14193_v1 }
0x2c90   :  { %v8888_v28 = vpop.f32.mrb[96].mxu1 }
0x2c91   :  { %v8889_v60 = vadd.f32 %v15146_v32, %v8888_v28  ;;  %v13395_v56 = vpop.f32.mrb[97].mxu1 }
0x2c92   :  { %13397 = vmatpush3.xpose.msk.msra.mxu0 %vm258_vm3, %v14790_v24 }
0x2c93   :  { %8900 = vrot.lane.b32.xlu1 %v8889_v60, %s14195_s21  ;;  %13406 = vmatprep.subr.mxu0 %v14193_v1 }
0x2d05   :  { %v8901_v13 = vpop.permute.xlu1 %8900 }
0x2d57   :  { %v8655_v55 = vpop.f32.mrb[94].mxu0 }
0x2d58   :  { %v15514_v58 = vadd.f32 %v8729_v47, %v8655_v55  ;;  %v13362_v59 = vpop.f32.mrb[95].mxu0 }
0x2d5f   :  { %v8818_v63 = vpop.f32.mrb[96].mxu0 }
0x2d60   :  { %v8819_v3 = vadd.f32 %v15158_v50, %v8818_v63  ;;  %v13384_v42 = vpop.f32.mrb[97].mxu0 }
0x2d62   :  { %v8892_v7 = vadd.f32 %v8889_v60, %v8819_v3 }
0x2d64   :  { %v12302_v5 = vmul.f32 -1.442695, %v8892_v7 }
0x2d66   :  { %13947 = vpow2.f32 %v12302_v5 }
0x2d70   :  { %v13948_v32 = vpop.eup %13947 }
0x2d71   :  { %v8896_v9 = vadd.f32 1.0, %v13948_v32 }
0x2d73   :  { %13949 = vrcp.f32 %v8896_v9 }
0x2d7d   :  { %v13950_v8 = vpop.eup %13949 }
0x2d7e   :  { %v8903_v10 = vmul.f32 %v13950_v8, %v8901_v13  ;;  %v8910_v23 = vsub.f32 1.0, %v13950_v8  ;;  %v8916_v31 = vmul.f32 %v13950_v8, %v15342_v39 }
0x2d80   :  { %8905 = vrot.lane.b32.xlu1 %v8903_v10, %s14195_s21 }
0x2df2   :  { %v8906_v19 = vpop.permute.xlu1 %8905 }
0x2df3   :  { %v8908_v20 = vadd.f32 %v8906_v19, %v8819_v3 }
0x2df5   :  { %13951 = vtanh.f32 %v8908_v20 }
0x2dff   :  { %v13952_v21 = vpop.eup %13951 }
0x2e00   :  { %8912 = vrot.lane.b32.xlu0 %v13952_v21, %s14196_s5 }
0x2e72   :  { %v8913_v50 = vpop.permute.xlu0 %8912 }
0x2e73   :  { %v8915_v18 = vmul.f32 %v8913_v50, %v8910_v23 }
0x2e75   :  { %v15520_v33 = vadd.f32 %v8916_v31, %v8915_v18 }
0x2e77   :  { %v8919_v34 = vcombine.high %v15520_v33, %v15520_v33  ;;  %v8926_v44 = vrot.slane %v15520_v33, %v14741_v52 }
0x2e79   :  { %v8942_v40 = vrot.slane %v8926_v44, %v14741_v52  ;;  %v8934_v51 = vcombine.high %v8926_v44, %v8926_v44  ;;  %v8933_v15 = vrot.slane %v8919_v34, %v14741_v52 }
0x2e7b   :  { %v8971_v36 = vrot.slane %v8942_v40, %v14746_v57  ;;  %v8956_v16 = vrot.slane %v8934_v51, %v14741_v52  ;;  %v8964_v54 = vcombine.high %v8942_v40, %v8942_v40  ;;  %v8935_v26 = vcombine.high %v8933_v15, %v8933_v15 }
0x2e7c   :  { %v8949_v45 = vrot.slane %v8933_v15, %v14741_v52 }
0x2e7d   :  { %8972 = vrot.lane.b32.xlu1 %v8971_v36, %s14196_s5  ;;  %v9049_v39 = vrot.slane %v8956_v16, %v14746_v57  ;;  %v8966_v14 = vcombine.high %v8956_v16, %v8956_v16  ;;  %v9127_v43 = vrot.slane %v8964_v54, %v14746_v57  ;;  %v8963_v12 = vrot.slane %v8935_v26, %v14741_v52 }
0x2e7e   :  { %v9283_v48 = vrot.slane %v8949_v45, %v14746_v57  ;;  %v8965_v28 = vcombine.high %v8949_v45, %v8949_v45 }
0x2e7f   :  { %9050 = vrot.lane.b32.xlu0 %v9049_v39, %s14196_s5  ;;  %v9205_v47 = vrot.slane %v8966_v14, %v14746_v57  ;;  %v9361_v60 = vrot.slane %v8963_v12, %v14746_v57  ;;  %v8967_v56 = vcombine.high %v8963_v12, %v8963_v12 }
0x2e80   :  { %v9439_v55 = vrot.slane %v8965_v28, %v14746_v57 }
0x2e81   :  { %9128 = vrot.lane.b32.xlu1 %v9127_v43, %s14196_s5  ;;  %v9517_v59 = vrot.slane %v8967_v56, %v14746_v57 }
0x2e83   :  { %9206 = vrot.lane.b32.xlu0 %v9205_v47, %s14196_s5 }
0x2e85   :  { %9284 = vrot.lane.b32.xlu1 %v9283_v48, %s14196_s5 }
0x2e87   :  { %9362 = vrot.lane.b32.xlu0 %v9361_v60, %s14196_s5 }
0x2e89   :  { %9440 = vrot.lane.b32.xlu1 %v9439_v55, %s14196_s5 }
0x2e8b   :  { %9518 = vrot.lane.b32.xlu0 %v9517_v59, %s14196_s5 }
0x2eef   :  { %v8973_v63 = vpop.permute.xlu1 %8972 }
0x2ef0   :  { %13399 = vmatmul.mubr.msk.f32.vlgmr.msra.gmra.mrb[98].mxu0 %vm258_vm3, %v8973_v63 }
0x2ef1   :  { %13407 = vmatpush3.xpose.msk.msra.mxu0 %vm258_vm3, %v14794_v11  ;;  %v9051_v3 = vpop.permute.xlu0 %9050  ;;  %13408 = vmatprep.mubr.msk.f32.mxu0 %vm14192_vm0, %v14193_v1 }
0x2ef2   :  { %13404 = vmatmul.mubr.msk.f32.vlgmr.msra.gmra.mrb[98].mxu1 %vm258_vm3, %v9051_v3  ;;  %13416 = vmatprep.subr.mxu0 %v14193_v1 }
0x2ef3   :  { %13412 = vmatpush3.xpose.msk.msra.mxu1 %vm258_vm3, %v14796_v37  ;;  %v9129_v42 = vpop.permute.xlu1 %9128  ;;  %13413 = vmatprep.mubr.msk.f32.mxu1 %vm14192_vm0, %v14193_v1 }
0x2ef4   :  { %13409 = vmatmul.mubr.msk.f32.vlgmr.msra.gmra.mrb[100].mxu0 %vm258_vm3, %v9129_v42  ;;  %13421 = vmatprep.subr.mxu1 %v14193_v1 }
0x2ef5   :  { %13417 = vmatpush3.xpose.msk.msra.mxu0 %vm258_vm3, %v14798_v25  ;;  %v9207_v7 = vpop.permute.xlu0 %9206  ;;  %13418 = vmatprep.mubr.msk.f32.mxu0 %vm14192_vm0, %v14193_v1 }
0x2ef6   :  { %13414 = vmatmul.mubr.msk.f32.vlgmr.msra.gmra.mrb[100].mxu1 %vm258_vm3, %v9207_v7  ;;  %13426 = vmatprep.subr.mxu0 %v14193_v1 }
0x2ef7   :  { %13422 = vmatpush3.xpose.msk.msra.mxu1 %vm258_vm3, %v14800_v27  ;;  %v9285_v5 = vpop.permute.xlu1 %9284  ;;  %13423 = vmatprep.mubr.msk.f32.mxu1 %vm14192_vm0, %v14193_v1 }
0x2ef8   :  { %13419 = vmatmul.mubr.msk.f32.vlgmr.msra.gmra.mrb[102].mxu0 %vm258_vm3, %v9285_v5  ;;  %13431 = vmatprep.subr.mxu1 %v14193_v1 }
0x2ef9   :  { %13427 = vmatpush3.xpose.msk.msra.mxu0 %vm258_vm3, %v14802_v29  ;;  %v9363_v32 = vpop.permute.xlu0 %9362  ;;  %13428 = vmatprep.mubr.msk.f32.mxu0 %vm14192_vm0, %v14193_v1 }
0x2efa   :  { %13424 = vmatmul.mubr.msk.f32.vlgmr.msra.gmra.mrb[102].mxu1 %vm258_vm3, %v9363_v32  ;;  %13436 = vmatprep.subr.mxu0 %v14193_v1 }
0x2efb   :  { %13432 = vmatpush3.xpose.msk.msra.mxu1 %vm258_vm3, %v14804_v30  ;;  %v9441_v9 = vpop.permute.xlu1 %9440  ;;  %13433 = vmatprep.mubr.msk.f32.mxu1 %vm14192_vm0, %v14193_v1 }
0x2efc   :  { %13429 = vmatmul.mubr.msk.f32.vlgmr.msra.gmra.mrb[104].mxu0 %vm258_vm3, %v9441_v9  ;;  %13441 = vmatprep.subr.mxu1 %v14193_v1 }
0x2efd   :  { %13437 = vmatpush3.msra.mxu0 %v14790_v24  ;;  %v9519_v8 = vpop.permute.xlu0 %9518  ;;  %13438 = vmatprep.mubr.msk.f32.mxu0 %vm14192_vm0, %v14193_v1 }
0x2efe   :  { %13434 = vmatmul.mubr.msk.f32.vlgmr.msra.gmra.mrb[104].mxu1 %vm258_vm3, %v9519_v8  ;;  %13446 = vmatprep.subr.mxu0 %v14193_v1 }
0x2eff   :  { %13442 = vmatpush3.msra.mxu1 %v14792_v22  ;;  %13443 = vmatprep.mubr.msk.f32.mxu1 %vm14192_vm0, %v14193_v1 }
0x2f00   :  { %13451 = vmatprep.subr.mxu1 %v14193_v1 }
0x2fc3   :  { %v9042_v13 = vpop.f32.mrb[98].mxu0 }
0x2fc4   :  { %v13400_v10 = vpop.f32.mrb[99].mxu0 }
0x2fc5   :  { %v9120_v19 = vpop.f32.mrb[98].mxu1 }
0x2fc6   :  { %v9600_v20 = vrot.slane %v9120_v19, 7  ;;  %v13405_v21 = vpop.f32.mrb[99].mxu1 }
0x2fc7   :  { %v9198_v23 = vpop.f32.mrb[100].mxu0 }
0x2fc8   :  { %v9601_v50 = vsel %vm2828_vm11, %v9600_v20, %v9042_v13  ;;  %v9602_v31 = vrot.slane %v9198_v23, 6  ;;  %v13410_v18 = vpop.f32.mrb[101].mxu0 }
0x2fc9   :  { %v9276_v34 = vpop.f32.mrb[100].mxu1 }
0x2fca   :  { %v9603_v44 = vsel %vm2831_vm12, %v9602_v31, %v9601_v50  ;;  %v9604_v40 = vrot.slane %v9276_v34, 5  ;;  %v13415_v51 = vpop.f32.mrb[101].mxu1 }
0x2fcb   :  { %v9354_v15 = vpop.f32.mrb[102].mxu0 }
0x2fcc   :  { %v9605_v36 = vsel %vm2834_vm13, %v9604_v40, %v9603_v44  ;;  %v9606_v16 = vrot.slane %v9354_v15, 4  ;;  %v13420_v54 = vpop.f32.mrb[103].mxu0 }
0x2fcd   :  { %v9432_v39 = vpop.f32.mrb[102].mxu1 }
0x2fce   :  { %v9607_v14 = vsel %vm2837_vm14, %v9606_v16, %v9605_v36  ;;  %v9608_v26 = vrot.slane %v9432_v39, 3  ;;  %v13425_v43 = vpop.f32.mrb[103].mxu1 }
0x2fcf   :  { %v9510_v45 = vpop.f32.mrb[104].mxu0 }
0x2fd0   :  { %v9609_v47 = vsel %vm2840_vm15, %v9608_v26, %v9607_v14  ;;  %v9610_v12 = vrot.slane %v9510_v45, 2  ;;  %v13430_v48 = vpop.f32.mrb[105].mxu0 }
0x2fd1   :  { %v9588_v28 = vpop.f32.mrb[104].mxu1 }
0x2fd2   :  { %v9611_v60 = vsel %vm2843_vm2, %v9610_v12, %v9609_v47  ;;  %v9612_v56 = vrot.slane %v9588_v28, 1  ;;  %v13435_v55 = vpop.f32.mrb[105].mxu1 }
0x2fd4   :  { %v9613_v59 = vsel %vm2846_vm4, %v9612_v56, %v9611_v60 }
0x2fd5   :  { %v9615_v63 = vsel %vm2818_vm6, %v9613_v59, -1e+09 }
0x2fd6   :  { %v9616_v3 = vsel %vm2850_vm5, %v9615_v63, -inf }
0x2fd7   :  { %9617 = vmax.xlane.f32.xlu1 %v9616_v3 }
0x3064   :  { %v9618_v42 = vpop.xlane.xlu1 %9617 }
0x3065   :  { %v9619_v7 = vsub.f32 %v9615_v63, %v9618_v42 }
0x3067   :  { %v9620_v5 = vmul.f32 1.442695, %v9619_v7 }
0x3069   :  { %13953 = vpow2.f32 %v9620_v5 }
0x3073   :  { %v13954_v32 = vpop.eup %13953 }
0x3074   :  { %v9622_v9 = vmul.f32 %v13954_v32, %v14865_v6 }
0x3076   :  { %v9623_v8 = vsel %vm2850_vm5, %v9622_v9, 0.0 }
0x3077   :  { %9624 = vadd.xlane.f32.xlu0 %v9623_v8 }
0x308d   :  { %10349 = vrot.lane.b32.xlu0 %v15520_v33, %s14196_s5 }
0x3104   :  { %v9625_v13 = vpop.xlane.xlu0 %9624 }
0x3105   :  { %v9626_v10 = vadd.f32 1e-09, %v9625_v13 }
0x3107   :  { %13955 = vrcp.f32 %v9626_v10 }
0x3108   :  { %v10350_v39 = vpop.permute.xlu0 %10349 }
0x3111   :  { %v13956_v19 = vpop.eup %13955 }
0x3112   :  { %v9628_v20 = vmul.f32 %v13956_v19, %v9622_v9 }
0x3114   :  { %v9630_v21 = vcombine.high %v9628_v20, %v9628_v20  ;;  %v9637_v23 = vrot.slane %v9628_v20, %v14741_v52 }
0x3116   :  { %v9653_v50 = vrot.slane %v9637_v23, %v14741_v52  ;;  %v9645_v31 = vcombine.high %v9637_v23, %v9637_v23  ;;  %v9644_v34 = vrot.slane %v9630_v21, %v14741_v52 }
0x3118   :  { %13439 = vmatmul.mubr.msk.f32.vlgmr.msra.gmra.mrb[106].mxu0 %vm2850_vm5, %v9653_v50  ;;  %v9667_v18 = vrot.slane %v9645_v31, %v14741_v52  ;;  %v9675_v44 = vcombine.high %v9653_v50, %v9653_v50  ;;  %v9646_v51 = vcombine.high %v9644_v34, %v9644_v34  ;;  %v9660_v15 = vrot.slane %v9644_v34, %v14741_v52 }
0x3119   :  { %13447 = vmatpush3.msra.mxu0 %v14794_v11  ;;  %13448 = vmatprep.mubr.msk.f32.mxu0 %vm14192_vm0, %v14193_v1 }
0x311a   :  { %13444 = vmatmul.mubr.msk.f32.vlgmr.msra.gmra.mrb[106].mxu1 %vm2850_vm5, %v9667_v18  ;;  %13456 = vmatprep.subr.mxu0 %v14193_v1  ;;  %v9677_v40 = vcombine.high %v9667_v18, %v9667_v18  ;;  %v9674_v36 = vrot.slane %v9646_v51, %v14741_v52  ;;  %v9676_v16 = vcombine.high %v9660_v15, %v9660_v15 }
0x311b   :  { %13452 = vmatpush3.msra.mxu1 %v14796_v37  ;;  %13453 = vmatprep.mubr.msk.f32.mxu1 %vm14192_vm0, %v14193_v1 }
0x311c   :  { %13449 = vmatmul.mubr.msk.f32.vlgmr.msra.gmra.mrb[108].mxu0 %vm2850_vm5, %v9675_v44  ;;  %13461 = vmatprep.subr.mxu1 %v14193_v1  ;;  %v9678_v54 = vcombine.high %v9674_v36, %v9674_v36  ;;  %v10438_v44 = vld [vmem:[#allocation6 + $0x28] sm:$0xff] }
0x311d   :  { %13457 = vmatpush3.msra.mxu0 %v14798_v25  ;;  %13458 = vmatprep.mubr.msk.f32.mxu0 %vm14192_vm0, %v14193_v1 }
0x311e   :  { %13454 = vmatmul.mubr.msk.f32.vlgmr.msra.gmra.mrb[108].mxu1 %vm2850_vm5, %v9677_v40  ;;  %13466 = vmatprep.subr.mxu0 %v14193_v1 }
0x311f   :  { %13462 = vmatpush3.msra.mxu1 %v14800_v27  ;;  %13463 = vmatprep.mubr.msk.f32.mxu1 %vm14192_vm0, %v14193_v1 }
0x3120   :  { %13459 = vmatmul.mubr.msk.f32.vlgmr.msra.gmra.mrb[110].mxu0 %vm2850_vm5, %v9660_v15  ;;  %13471 = vmatprep.subr.mxu1 %v14193_v1 }
0x3121   :  { %13467 = vmatpush3.msra.mxu0 %v14802_v29  ;;  %13468 = vmatprep.mubr.msk.f32.mxu0 %vm14192_vm0, %v14193_v1 }
0x3122   :  { %13464 = vmatmul.mubr.msk.f32.vlgmr.msra.gmra.mrb[110].mxu1 %vm2850_vm5, %v9674_v36  ;;  %13802 = vmatprep.subr.bf16.mxu0 %v14191_v0 }
0x3123   :  { %13472 = vmatpush3.msra.mxu1 %v14804_v30  ;;  %13473 = vmatprep.mubr.msk.f32.mxu1 %vm14192_vm0, %v14193_v1 }
0x3124   :  { %13469 = vmatmul.mubr.msk.f32.vlgmr.msra.gmra.mrb[112].mxu0 %vm2850_vm5, %v9676_v16  ;;  %13808 = vmatprep.subr.bf16.mxu1 %v14191_v0 }
0x3125   :  { %13804 = vmatpush3.bf16.msra.mxu0 %v14940_v62  ;;  %13484 = vmatprep.mubr.msk.f32.mxu0 %vm14192_vm0, %v14193_v1 }
0x3126   :  { %13474 = vmatmul.mubr.msk.f32.vlgmr.msra.gmra.mrb[112].mxu1 %vm2850_vm5, %v9678_v54  ;;  %13805 = vmatprep.subr.bf16.mxu0 %v14191_v0 }
0x3127   :  { %13810 = vmatpush3.bf16.msra.mxu1 %v14912_v38  ;;  %13495 = vmatprep.mubr.msk.f32.mxu1 %vm14192_vm0, %v14193_v1 }
0x3128   :  { %13811 = vmatprep.subr.bf16.mxu1 %v14191_v0 }
0x3129   :  { %13807 = vmatpush3.bf16.msra.mxu0 %v14944_v4 }
0x312a   :  { %13814 = vmatprep.subr.bf16.mxu0 %v14191_v0 }
0x312b   :  { %13813 = vmatpush3.bf16.msra.mxu1 %v14920_v2 }
0x312c   :  { %13820 = vmatprep.subr.bf16.mxu1 %v14191_v0 }
0x312e   :  { %13496 = vmatmul.mubr.msk.f32.vlgmr.msra.gmra.mrb[114].mxu1 %vm258_vm3, %v10350_v39 }
0x312f   :  { %13822 = vmatpush3.bf16.msra.mxu1 %v14655_v46  ;;  %13517 = vmatprep.mubr.msk.f32.mxu1 %vm14192_vm0, %v14193_v1 }
0x3130   :  { %13823 = vmatprep.subr.bf16.mxu1 %v14191_v0 }
0x3133   :  { %13825 = vmatpush3.bf16.msra.mxu1 %v14662_v53 }
0x3134   :  { %13525 = vmatprep.subr.mxu1 %v14193_v1 }
0x3136   :  { %13518 = vmatmul.mubr.msk.f32.vlgmr.msra.gmra.mrb[116].mxu1 %vm258_vm3, %v10350_v39  ;;  %v13995_v39 = vld [vmem:[%s15915_s9] ss:$0 sm:$0xff] }
0x3137   :  { %13527 = vmatprep.mubr.msk.f32.mxu1 %vm14192_vm0, %v14193_v1 }
0x313c   :  { %13526 = vmatpush3.xpose.msk.msra.mxu1 %vm258_vm3, %v14792_v22 }
0x313d   :  { %13535 = vmatprep.subr.mxu1 %v14193_v1 }
0x31eb   :  { %v9747_v46 = vpop.f32.mrb[106].mxu0 }
0x31ec   :  { %v13440_v14 = vpop.f32.mrb[107].mxu0 }
0x31ed   :  { %v9819_v26 = vpop.f32.mrb[106].mxu1 }
0x31ee   :  { %v10263_v43 = vrot.slane %v9819_v26, 7  ;;  %v13445_v45 = vpop.f32.mrb[107].mxu1 }
0x31ef   :  { %v9891_v47 = vpop.f32.mrb[108].mxu0 }
0x31f0   :  { %v10264_v53 = vsel %vm2828_vm11, %v10263_v43, %v9747_v46  ;;  %v10265_v12 = vrot.slane %v9891_v47, 6  ;;  %v13450_v48 = vpop.f32.mrb[109].mxu0 }
0x31f1   :  { %v9963_v28 = vpop.f32.mrb[108].mxu1 }
0x31f2   :  { %v10266_v60 = vsel %vm2831_vm12, %v10265_v12, %v10264_v53  ;;  %v10267_v56 = vrot.slane %v9963_v28, 5  ;;  %v13455_v55 = vpop.f32.mrb[109].mxu1 }
0x31f3   :  { %v10035_v59 = vpop.f32.mrb[110].mxu0 }
0x31f4   :  { %v10268_v63 = vsel %vm2834_vm13, %v10267_v56, %v10266_v60  ;;  %v10269_v3 = vrot.slane %v10035_v59, 4  ;;  %v13460_v42 = vpop.f32.mrb[111].mxu0 }
0x31f5   :  { %v10107_v7 = vpop.f32.mrb[110].mxu1 }
0x31f6   :  { %v10270_v5 = vsel %vm2837_vm14, %v10269_v3, %v10268_v63  ;;  %v10271_v32 = vrot.slane %v10107_v7, 3  ;;  %v13465_v9 = vpop.f32.mrb[111].mxu1 }
0x31f7   :  { %v10179_v8 = vpop.f32.mrb[112].mxu0 }
0x31f8   :  { %v10272_v13 = vsel %vm2840_vm15, %v10271_v32, %v10270_v5  ;;  %v10273_v10 = vrot.slane %v10179_v8, 2  ;;  %v13470_v19 = vpop.f32.mrb[113].mxu0 }
0x31f9   :  { %v10251_v20 = vpop.f32.mrb[112].mxu1 }
0x31fa   :  { %v10274_v21 = vsel %vm2843_vm2, %v10273_v10, %v10272_v13  ;;  %v10275_v23 = vrot.slane %v10251_v20, 1  ;;  %v13475_v50 = vpop.f32.mrb[113].mxu1 }
0x31fc   :  { %v10276_v31 = vsel %vm2846_vm4, %v10275_v23, %v10274_v21 }
0x31fd   :  { %13485 = vmatmul.mubr.msk.f32.vlgmr.msra.gmra.mrb[114].mxu0 %vm258_vm3, %v10276_v31 }
0x31fe   :  { %13816 = vmatpush3.bf16.msra.mxu0 %v14647_v41  ;;  %13506 = vmatprep.mubr.msk.f32.mxu0 %vm14192_vm0, %v14193_v1  ;;  %v13994_v41 = vld [vmem:[%s15916_s10] ss:$0 sm:$0xff] }
0x31ff   :  { %13817 = vmatprep.subr.bf16.mxu0 %v14191_v0 }
0x3201   :  { %v10419_v18 = vpop.f32.mrb[114].mxu1 }
0x3202   :  { %v13497_v34 = vpop.f32.mrb[115].mxu1  ;;  %13819 = vmatpush3.bf16.msra.mxu0 %v14658_v49 }
0x3203   :  { %13520 = vmatprep.subr.mxu0 %v14193_v1 }
0x3205   :  { %13507 = vmatmul.mubr.msk.f32.vlgmr.msra.gmra.mrb[116].mxu0 %vm258_vm3, %v10438_v44 }
0x3206   :  { %13522 = vmatprep.mubr.msk.f32.mxu0 %vm14192_vm0, %v14193_v1 }
0x3209   :  { %v10578_v40 = vpop.f32.mrb[116].mxu1 }
0x320a   :  { %v10579_v51 = vadd.f32 %v13994_v41, %v10578_v40  ;;  %v13519_v15 = vpop.f32.mrb[117].mxu1 }
0x320b   :  { %13521 = vmatpush3.xpose.msk.msra.mxu0 %vm258_vm3, %v14790_v24 }
0x320c   :  { %10590 = vrot.lane.b32.xlu1 %v10579_v51, %s14195_s21  ;;  %13530 = vmatprep.subr.mxu0 %v14193_v1 }
0x327e   :  { %v10591_v12 = vpop.permute.xlu1 %10590 }
0x32d0   :  { %v10345_v49 = vpop.f32.mrb[114].mxu0 }
0x32d1   :  { %v15694_v36 = vadd.f32 %v10419_v18, %v10345_v49  ;;  %v13486_v16 = vpop.f32.mrb[115].mxu0 }
0x32d8   :  { %v10508_v54 = vpop.f32.mrb[116].mxu0 }
0x32d9   :  { %v10509_v46 = vadd.f32 %v13995_v39, %v10508_v54  ;;  %v13508_v14 = vpop.f32.mrb[117].mxu0 }
0x32db   :  { %v10582_v26 = vadd.f32 %v10579_v51, %v10509_v46 }
0x32dd   :  { %v12331_v43 = vmul.f32 -1.442695, %v10582_v26 }
0x32df   :  { %13957 = vpow2.f32 %v12331_v43 }
0x32e9   :  { %v13958_v45 = vpop.eup %13957 }
0x32ea   :  { %v10586_v47 = vadd.f32 1.0, %v13958_v45 }
0x32ec   :  { %13959 = vrcp.f32 %v10586_v47 }
0x32f6   :  { %v13960_v53 = vpop.eup %13959 }
0x32f7   :  { %v10593_v48 = vmul.f32 %v13960_v53, %v10591_v12  ;;  %v10600_v55 = vsub.f32 1.0, %v13960_v53  ;;  %v10606_v63 = vmul.f32 %v13960_v53, %v15520_v33 }
0x32f9   :  { %10595 = vrot.lane.b32.xlu1 %v10593_v48, %s14195_s21 }
0x336b   :  { %v10596_v28 = vpop.permute.xlu1 %10595 }
0x336c   :  { %v10598_v60 = vadd.f32 %v10596_v28, %v10509_v46 }
0x336e   :  { %13961 = vtanh.f32 %v10598_v60 }
0x3378   :  { %v13962_v56 = vpop.eup %13961 }
0x3379   :  { %10602 = vrot.lane.b32.xlu0 %v13962_v56, %s14196_s5 }
0x33eb   :  { %v10603_v59 = vpop.permute.xlu0 %10602 }
0x33ec   :  { %v10605_v3 = vmul.f32 %v10603_v59, %v10600_v55 }
0x33ee   :  { %v15702_v42 = vadd.f32 %v10606_v63, %v10605_v3 }
0x33f0   :  { %v10609_v7 = vcombine.high %v15702_v42, %v15702_v42  ;;  %v10616_v5 = vrot.slane %v15702_v42, %v14741_v52 }
0x33f2   :  { %v10623_v32 = vrot.slane %v10609_v7, %v14741_v52  ;;  %v10624_v9 = vcombine.high %v10616_v5, %v10616_v5  ;;  %v10632_v8 = vrot.slane %v10616_v5, %v14741_v52 }
0x33f4   :  { %v10661_v13 = vrot.slane %v10632_v8, %v14746_v57  ;;  %v10646_v10 = vrot.slane %v10624_v9, %v14741_v52  ;;  %v10654_v19 = vcombine.high %v10632_v8, %v10632_v8  ;;  %v10625_v33 = vcombine.high %v10623_v32, %v10623_v32 }
0x33f5   :  { %v10639_v50 = vrot.slane %v10623_v32, %v14741_v52 }
0x33f6   :  { %10662 = vrot.lane.b32.xlu1 %v10661_v13, %s14196_s5  ;;  %v10739_v20 = vrot.slane %v10646_v10, %v14746_v57  ;;  %v10656_v21 = vcombine.high %v10646_v10, %v10646_v10  ;;  %v10817_v23 = vrot.slane %v10654_v19, %v14746_v57  ;;  %v10653_v18 = vrot.slane %v10625_v33, %v14741_v52 }
0x33f7   :  { %v10973_v34 = vrot.slane %v10639_v50, %v14746_v57  ;;  %v10655_v44 = vcombine.high %v10639_v50, %v10639_v50 }
0x33f8   :  { %10740 = vrot.lane.b32.xlu0 %v10739_v20, %s14196_s5  ;;  %v10895_v31 = vrot.slane %v10656_v21, %v14746_v57  ;;  %v11051_v40 = vrot.slane %v10653_v18, %v14746_v57  ;;  %v10657_v41 = vcombine.high %v10653_v18, %v10653_v18 }
0x33f9   :  { %v11129_v51 = vrot.slane %v10655_v44, %v14746_v57  ;;  %v15787_v44 = vld [vmem:[%s15919_s13] ss:$0 sm:$0xff]  ;;  %s14200_s13 = smov [#allocation15]  }
0x33fa   :  { %10818 = vrot.lane.b32.xlu1 %v10817_v23, %s14196_s5  ;;  %v11207_v15 = vrot.slane %v10657_v41, %v14746_v57  ;;  %v15792_v41 = vadd.f32 %v15787_v44, %v14970_v61  ;;  %v15812_v61 = vadd.f32 %v15787_v44, %v15694_v36  ;;  %s12132_s21 = sshll.u32 %s14200_s13, 4  ;;  %s12133_s21 = int_to_ptr.vmem [resolvable:$true] %s12132_s21 }
0x33fb   :  { %s14150_s22 = scalar_lea.vmem %s12133_s21, 768  ;;  %p14155_p1 = scmp.lt.s32.totalorder %s12133_s21, %s12133_s21 }
0x33fc   :  { %10896 = vrot.lane.b32.xlu0 %v10895_v31, %s14196_s5  ;;  %p14151_p0 = scmp.ne.s32.totalorder %s12133_s21, %s14150_s22  ;;  %p14156_p2 = scmp.lt.s32.totalorder %s14150_s22, %s14150_s22 }
0x33fe   :  { %10974 = vrot.lane.b32.xlu1 %v10973_v34, %s14196_s5  ;;  %p14157_p3 = por %p14156_p2, %p14155_p1 }
0x3400   :  { %11052 = vrot.lane.b32.xlu0 %v11051_v40, %s14196_s5  ;;  %p14158_p4 = pnand %p14157_p3, %p14151_p0 }
0x3402   :  { %11130 = vrot.lane.b32.xlu1 %v11129_v51, %s14196_s5  ;;  %v15797_v51 = vadd.f32 %v15787_v44, %v15153_v35 }
0x3404   :  { %11208 = vrot.lane.b32.xlu0 %v11207_v15, %s14196_s5  ;;  %v15802_v15 = vadd.f32 %v15787_v44, %v15336_v17 }
0x3468   :  { %v10663_v49 = vpop.permute.xlu1 %10662 }
0x3469   :  { %13523 = vmatmul.mubr.msk.f32.vlgmr.msra.gmra.mrb[118].mxu0 %vm258_vm3, %v10663_v49  ;;  %v15807_v49 = vadd.f32 %v15787_v44, %v15514_v58 }
0x346a   :  { %13531 = vmatpush3.xpose.msk.msra.mxu0 %vm258_vm3, %v14794_v11  ;;  %v10741_v16 = vpop.permute.xlu0 %10740  ;;  %13532 = vmatprep.mubr.msk.f32.mxu0 %vm14192_vm0, %v14193_v1 }
0x346b   :  { %13528 = vmatmul.mubr.msk.f32.vlgmr.msra.gmra.mrb[118].mxu1 %vm258_vm3, %v10741_v16  ;;  %13540 = vmatprep.subr.mxu0 %v14193_v1 }
0x346c   :  { %13536 = vmatpush3.xpose.msk.msra.mxu1 %vm258_vm3, %v14796_v37  ;;  %v10819_v57 = vpop.permute.xlu1 %10818  ;;  %13537 = vmatprep.mubr.msk.f32.mxu1 %vm14192_vm0, %v14193_v1 }
0x346d   :  { %13533 = vmatmul.mubr.msk.f32.vlgmr.msra.gmra.mrb[120].mxu0 %vm258_vm3, %v10819_v57  ;;  %13545 = vmatprep.subr.mxu1 %v14193_v1 }
0x346e   :  { %13541 = vmatpush3.xpose.msk.msra.mxu0 %vm258_vm3, %v14798_v25  ;;  %v10897_v54 = vpop.permute.xlu0 %10896  ;;  %13542 = vmatprep.mubr.msk.f32.mxu0 %vm14192_vm0, %v14193_v1 }
0x346f   :  { %13538 = vmatmul.mubr.msk.f32.vlgmr.msra.gmra.mrb[120].mxu1 %vm258_vm3, %v10897_v54  ;;  %13550 = vmatprep.subr.mxu0 %v14193_v1 }
0x3470   :  { %13546 = vmatpush3.xpose.msk.msra.mxu1 %vm258_vm3, %v14800_v27  ;;  %v10975_v39 = vpop.permute.xlu1 %10974  ;;  %13547 = vmatprep.mubr.msk.f32.mxu1 %vm14192_vm0, %v14193_v1 }
0x3471   :  { %13543 = vmatmul.mubr.msk.f32.vlgmr.msra.gmra.mrb[122].mxu0 %vm258_vm3, %v10975_v39  ;;  %13555 = vmatprep.subr.mxu1 %v14193_v1 }
0x3472   :  { %13551 = vmatpush3.xpose.msk.msra.mxu0 %vm258_vm3, %v14802_v29  ;;  %v11053_v46 = vpop.permute.xlu0 %11052  ;;  %13552 = vmatprep.mubr.msk.f32.mxu0 %vm14192_vm0, %v14193_v1 }
0x3473   :  { %13548 = vmatmul.mubr.msk.f32.vlgmr.msra.gmra.mrb[122].mxu1 %vm258_vm3, %v11053_v46  ;;  %13560 = vmatprep.subr.mxu0 %v14193_v1 }
0x3474   :  { %13556 = vmatpush3.xpose.msk.msra.mxu1 %vm258_vm3, %v14804_v30  ;;  %v11131_v14 = vpop.permute.xlu1 %11130  ;;  %13557 = vmatprep.mubr.msk.f32.mxu1 %vm14192_vm0, %v14193_v1 }
0x3475   :  { %13553 = vmatmul.mubr.msk.f32.vlgmr.msra.gmra.mrb[124].mxu0 %vm258_vm3, %v11131_v14  ;;  %13565 = vmatprep.subr.mxu1 %v14193_v1 }
0x3476   :  { %13561 = vmatpush3.msra.mxu0 %v14790_v24  ;;  %v11209_v26 = vpop.permute.xlu0 %11208  ;;  %13562 = vmatprep.mubr.msk.f32.mxu0 %vm14192_vm0, %v14193_v1 }
0x3477   :  { %13558 = vmatmul.mubr.msk.f32.vlgmr.msra.gmra.mrb[124].mxu1 %vm258_vm3, %v11209_v26  ;;  %13570 = vmatprep.subr.mxu0 %v14193_v1 }
0x3478   :  { %13566 = vmatpush3.msra.mxu1 %v14792_v22  ;;  %13567 = vmatprep.mubr.msk.f32.mxu1 %vm14192_vm0, %v14193_v1 }
0x3479   :  { %13575 = vmatprep.subr.mxu1 %v14193_v1 }
0x353c   :  { %v10732_v43 = vpop.f32.mrb[118].mxu0 }
0x353d   :  { %v13524_v45 = vpop.f32.mrb[119].mxu0 }
0x353e   :  { %v10810_v47 = vpop.f32.mrb[118].mxu1 }
0x353f   :  { %v11290_v53 = vrot.slane %v10810_v47, 7  ;;  %v13529_v24 = vpop.f32.mrb[119].mxu1 }
0x3540   :  { %v10888_v12 = vpop.f32.mrb[120].mxu0 }
0x3541   :  { %v11291_v48 = vsel %vm2828_vm11, %v11290_v53, %v10732_v43  ;;  %v11292_v28 = vrot.slane %v10888_v12, 6  ;;  %v13534_v60 = vpop.f32.mrb[121].mxu0 }
0x3542   :  { %v10966_v56 = vpop.f32.mrb[120].mxu1 }
0x3543   :  { %v11293_v55 = vsel %vm2831_vm12, %v11292_v28, %v11291_v48  ;;  %v11294_v59 = vrot.slane %v10966_v56, 5  ;;  %v13539_v22 = vpop.f32.mrb[121].mxu1 }
0x3544   :  { %v11044_v63 = vpop.f32.mrb[122].mxu0 }
0x3545   :  { %v11295_v3 = vsel %vm2834_vm13, %v11294_v59, %v11293_v55  ;;  %v11296_v7 = vrot.slane %v11044_v63, 4  ;;  %v13544_v5 = vpop.f32.mrb[123].mxu0 }
0x3546   :  { %v11122_v32 = vpop.f32.mrb[122].mxu1 }
0x3547   :  { %v11297_v9 = vsel %vm2837_vm14, %v11296_v7, %v11295_v3  ;;  %v11298_v8 = vrot.slane %v11122_v32, 3  ;;  %v13549_v13 = vpop.f32.mrb[123].mxu1 }
0x3548   :  { %v11200_v10 = vpop.f32.mrb[124].mxu0 }
0x3549   :  { %v11299_v19 = vsel %vm2840_vm15, %v11298_v8, %v11297_v9  ;;  %v11300_v33 = vrot.slane %v11200_v10, 2  ;;  %v13554_v20 = vpop.f32.mrb[125].mxu0 }
0x354a   :  { %v11278_v21 = vpop.f32.mrb[124].mxu1 }
0x354b   :  { %v11301_v23 = vsel %vm2843_vm2, %v11300_v33, %v11299_v19  ;;  %v11302_v50 = vrot.slane %v11278_v21, 1  ;;  %v13559_v31 = vpop.f32.mrb[125].mxu1 }
0x354d   :  { %v11303_v18 = vsel %vm2846_vm4, %v11302_v50, %v11301_v23 }
0x354e   :  { %v11305_v34 = vsel %vm2818_vm6, %v11303_v18, -1e+09 }
0x354f   :  { %v11306_v40 = vsel %vm2850_vm5, %v11305_v34, -inf }
0x3550   :  { %11307 = vmax.xlane.f32.xlu1 %v11306_v40 }
0x3554   :  { %3665 = vmax.xlane.f32.xlu1 %v15792_v41 }
0x3558   :  { %5354 = vmax.xlane.f32.xlu1 %v15797_v51 }
0x355c   :  { %7044 = vmax.xlane.f32.xlu1 %v15802_v15 }
0x3560   :  { %8734 = vmax.xlane.f32.xlu1 %v15807_v49 }
0x3564   :  { %10424 = vmax.xlane.f32.xlu1 %v15812_v61 }
0x35dd   :  { %v11308_v35 = vpop.xlane.xlu1 %11307 }
0x35de   :  { %v11309_v16 = vsub.f32 %v11305_v34, %v11308_v35 }
0x35e0   :  { %v11310_v57 = vmul.f32 1.442695, %v11309_v16 }
0x35e1   :  { %v15819_v58 = vpop.xlane.xlu1 %3665 }
0x35e2   :  { %13963 = vpow2.f32 %v11310_v57  ;;  %v3667_v36 = vsub.f32 %v15792_v41, %v15819_v58 }
0x35e4   :  { %v3668_v46 = vmul.f32 1.442695, %v3667_v36 }
0x35e6   :  { %13965 = vpow2.f32 %v3668_v46 }
0x35ec   :  { %v13964_v17 = vpop.eup %13963 }
0x35ed   :  { %v11312_v54 = vmul.f32 %v13964_v17, %v14865_v6 }
0x35ef   :  { %v11313_v39 = vsel %vm2850_vm5, %v11312_v54, 0.0 }
0x35f0   :  { %11314 = vadd.xlane.f32.xlu0 %v11313_v39  ;;  %v13966_v14 = vpop.eup %13965 }
0x3606   :  { %12039 = vrot.lane.b32.xlu0 %v15702_v42, %s14196_s5 }
0x3625   :  { %3670 = vadd.xlane.f32.xlu0 %v13966_v14 }
0x367d   :  { %v11315_v26 = vpop.xlane.xlu0 %11314 }
0x367e   :  { %v11316_v43 = vadd.f32 1e-09, %v11315_v26 }
0x3680   :  { %13967 = vrcp.f32 %v11316_v43 }
0x368a   :  { %v13968_v45 = vpop.eup %13967 }
0x368b   :  { %v11318_v6 = vmul.f32 %v13968_v45, %v11312_v54 }
0x368d   :  { %v11320_v47 = vcombine.high %v11318_v6, %v11318_v6  ;;  %v11327_v53 = vrot.slane %v11318_v6, %v14741_v52 }
0x368f   :  { %v11343_v24 = vrot.slane %v11327_v53, %v14741_v52  ;;  %v11335_v42 = vcombine.high %v11327_v53, %v11327_v53  ;;  %v11334_v48 = vrot.slane %v11320_v47, %v14741_v52 }
0x3691   :  { %13563 = vmatmul.mubr.msk.f32.vlgmr.msra.gmra.mrb[126].mxu0 %vm2850_vm5, %v11343_v24  ;;  %v11357_v12 = vrot.slane %v11335_v42, %v14741_v52  ;;  %v11365_v28 = vcombine.high %v11343_v24, %v11343_v24  ;;  %v11336_v56 = vcombine.high %v11334_v48, %v11334_v48 }
0x3692   :  { %13571 = vmatpush3.msra.mxu0 %v14794_v11  ;;  %13572 = vmatprep.mubr.msk.f32.mxu0 %vm14192_vm0, %v14193_v1  ;;  %v11350_v11 = vrot.slane %v11334_v48, %v14741_v52 }
0x3693   :  { %13568 = vmatmul.mubr.msk.f32.vlgmr.msra.gmra.mrb[126].mxu1 %vm2850_vm5, %v11357_v12  ;;  %13580 = vmatprep.subr.mxu0 %v14193_v1  ;;  %v11367_v60 = vcombine.high %v11357_v12, %v11357_v12 }
0x3694   :  { %13576 = vmatpush3.msra.mxu1 %v14796_v37  ;;  %13577 = vmatprep.mubr.msk.f32.mxu1 %vm14192_vm0, %v14193_v1  ;;  %v11364_v37 = vrot.slane %v11336_v56, %v14741_v52 }
0x3695   :  { %13573 = vmatmul.mubr.msk.f32.vlgmr.msra.gmra.mrb[128].mxu0 %vm2850_vm5, %v11365_v28  ;;  %13585 = vmatprep.subr.mxu1 %v14193_v1 }
0x3696   :  { %13581 = vmatpush3.msra.mxu0 %v14798_v25  ;;  %13582 = vmatprep.mubr.msk.f32.mxu0 %vm14192_vm0, %v14193_v1  ;;  %v11366_v25 = vcombine.high %v11350_v11, %v11350_v11  ;;  %v11368_v52 = vcombine.high %v11364_v37, %v11364_v37 }
0x3697   :  { %13578 = vmatmul.mubr.msk.f32.vlgmr.msra.gmra.mrb[128].mxu1 %vm2850_vm5, %v11367_v60  ;;  %13590 = vmatprep.subr.mxu0 %v14193_v1 }
0x3698   :  { %13586 = vmatpush3.msra.mxu1 %v14800_v27  ;;  %13587 = vmatprep.mubr.msk.f32.mxu1 %vm14192_vm0, %v14193_v1  ;;  %v12040_v27 = vpop.permute.xlu0 %12039 }
0x3699   :  { %13583 = vmatmul.mubr.msk.f32.vlgmr.msra.gmra.mrb[130].mxu0 %vm2850_vm5, %v11350_v11  ;;  %13595 = vmatprep.subr.mxu1 %v14193_v1 }
0x369a   :  { %13591 = vmatpush3.msra.mxu0 %v14802_v29  ;;  %13592 = vmatprep.mubr.msk.f32.mxu0 %vm14192_vm0, %v14193_v1 }
0x369b   :  { %13588 = vmatmul.mubr.msk.f32.vlgmr.msra.gmra.mrb[130].mxu1 %vm2850_vm5, %v11364_v37  ;;  %13826 = vmatprep.subr.bf16.mxu0 %v14191_v0 }
0x369c   :  { %13596 = vmatpush3.msra.mxu1 %v14804_v30  ;;  %13597 = vmatprep.mubr.msk.f32.mxu1 %vm14192_vm0, %v14193_v1 }
0x369d   :  { %13593 = vmatmul.mubr.msk.f32.vlgmr.msra.gmra.mrb[132].mxu0 %vm2850_vm5, %v11366_v25  ;;  %13832 = vmatprep.subr.bf16.mxu1 %v14191_v0 }
0x369e   :  { %13828 = vmatpush3.bf16.msra.mxu0 %v14940_v62  ;;  %13608 = vmatprep.mubr.msk.f32.mxu0 %vm14192_vm0, %v14193_v1 }
0x369f   :  { %13598 = vmatmul.mubr.msk.f32.vlgmr.msra.gmra.mrb[132].mxu1 %vm2850_vm5, %v11368_v52  ;;  %13829 = vmatprep.subr.bf16.mxu0 %v14191_v0 }
0x36a0   :  { %13834 = vmatpush3.bf16.msra.mxu1 %v14912_v38  ;;  %13619 = vmatprep.mubr.msk.f32.mxu1 %vm14192_vm0, %v14193_v1 }
0x36a1   :  { %13835 = vmatprep.subr.bf16.mxu1 %v14191_v0 }
0x36a2   :  { %13831 = vmatpush3.bf16.msra.mxu0 %v14944_v4 }
0x36a4   :  { %13837 = vmatpush3.bf16.msra.mxu1 %v14920_v2 }
0x36a7   :  { %13620 = vmatmul.mubr.msk.f32.vlgmr.msra.gmra.mrb[134].mxu1 %vm258_vm3, %v12040_v27 }
0x36b2   :  { %v3671_v29 = vpop.xlane.xlu0 %3670 }
0x36b3   :  { %13969 = vlog2.f32 %v3671_v29 }
0x36bd   :  { %v13970_v30 = vpop.eup %13969 }
0x36be   :  { %v3673_v62 = vmul.f32 0.6931472, %v13970_v30 }
0x36c0   :  { %v3674_v55 = vadd.f32 %v3673_v62, %v15819_v58  ;;  %v5355_v58 = vpop.xlane.xlu1 %5354 }
0x36c1   :  { %v5356_v46 = vsub.f32 %v15797_v51, %v5355_v58 }
0x36c2   :  { %v3675_v38 = vsub.f32 %v15792_v41, %v3674_v55 }
0x36c3   :  { %v5357_v26 = vmul.f32 1.442695, %v5356_v46 }
0x36c4   :  { %3676 = vst [vmem:[#allocation15] sm:$0xff] %v3675_v38  ;;  %v7045_v36 = vpop.xlane.xlu1 %7044 }
0x36c5   :  { %v7046_v43 = vsub.f32 %v15802_v15, %v7045_v36  ;;  %13971 = vpow2.f32 %v5357_v26 }
0x36c7   :  { %v7047_v45 = vmul.f32 1.442695, %v7046_v43 }
0x36c8   :  { %v8735_v14 = vpop.xlane.xlu1 %8734 }
0x36c9   :  { %v8736_v6 = vsub.f32 %v15807_v49, %v8735_v14  ;;  %13973 = vpow2.f32 %v7047_v45 }
0x36cb   :  { %v8737_v12 = vmul.f32 1.442695, %v8736_v6 }
0x36cc   :  { %v10425_v47 = vpop.xlane.xlu1 %10424 }
0x36cd   :  { %v10426_v48 = vsub.f32 %v15812_v61, %v10425_v47  ;;  %13975 = vpow2.f32 %v8737_v12 }
0x36cf   :  { %v10427_v60 = vmul.f32 1.442695, %v10426_v48  ;;  %v13972_v56 = vpop.eup %13971 }
0x36d1   :  { %13977 = vpow2.f32 %v10427_v60 }
0x36d3   :  { %v13974_v11 = vpop.eup %13973 }
0x36d7   :  { %v13976_v37 = vpop.eup %13975 }
0x36db   :  { %v13978_v25 = vpop.eup %13977 }
0x3764   :  { %v11437_v59 = vpop.f32.mrb[126].mxu0 }
0x3765   :  { %v13564_v1 = vpop.f32.mrb[127].mxu0 }
0x3766   :  { %v11509_v22 = vpop.f32.mrb[126].mxu1 }
0x3767   :  { %v11953_v0 = vrot.slane %v11509_v22, 7  ;;  %v13569_v63 = vpop.f32.mrb[127].mxu1 }
0x3768   :  { %v11581_v4 = vpop.f32.mrb[128].mxu0 }
0x3769   :  { %v11954_v2 = vsel %vm2828_vm11, %v11953_v0, %v11437_v59  ;;  %v11955_v3 = vrot.slane %v11581_v4, 6  ;;  %v13574_v7 = vpop.f32.mrb[129].mxu0 }
0x376a   :  { %v11653_v5 = vpop.f32.mrb[128].mxu1 }
0x376b   :  { %v11956_v32 = vsel %vm2831_vm12, %v11955_v3, %v11954_v2  ;;  %v11957_v9 = vrot.slane %v11653_v5, 5  ;;  %v13579_v8 = vpop.f32.mrb[129].mxu1 }
0x376c   :  { %v11725_v13 = vpop.f32.mrb[130].mxu0 }
0x376d   :  { %v11958_v10 = vsel %vm2834_vm13, %v11957_v9, %v11956_v32  ;;  %v11959_v19 = vrot.slane %v11725_v13, 4  ;;  %v13584_v33 = vpop.f32.mrb[131].mxu0 }
0x376e   :  { %v11797_v20 = vpop.f32.mrb[130].mxu1 }
0x376f   :  { %v11960_v21 = vsel %vm2837_vm14, %v11959_v19, %v11958_v10  ;;  %v11961_v23 = vrot.slane %v11797_v20, 3  ;;  %v13589_v50 = vpop.f32.mrb[131].mxu1 }
0x3770   :  { %v11869_v31 = vpop.f32.mrb[132].mxu0 }
0x3771   :  { %v11962_v18 = vsel %vm2840_vm15, %v11961_v23, %v11960_v21  ;;  %v11963_v34 = vrot.slane %v11869_v31, 2  ;;  %v13594_v40 = vpop.f32.mrb[133].mxu0 }
0x3772   :  { %v11941_v41 = vpop.f32.mrb[132].mxu1 }
0x3773   :  { %v11964_v35 = vsel %vm2843_vm2, %v11963_v34, %v11962_v18  ;;  %v11965_v16 = vrot.slane %v11941_v41, 1  ;;  %v13599_v57 = vpop.f32.mrb[133].mxu1 }
0x3775   :  { %v11966_v17 = vsel %vm2846_vm4, %v11965_v16, %v11964_v35 }
0x3776   :  { %13609 = vmatmul.mubr.msk.f32.vlgmr.msra.gmra.mrb[134].mxu0 %vm258_vm3, %v11966_v17 }
0x377a   :  { %v12109_v54 = vpop.f32.mrb[134].mxu1 }
0x377b   :  { %v13621_v39 = vpop.f32.mrb[135].mxu1 }
0x3849   :  { %v12035_v53 = vpop.f32.mrb[134].mxu0 }
0x384a   :  { %v12110_v24 = vadd.f32 %v12109_v54, %v12035_v53  ;;  %v13610_v42 = vpop.f32.mrb[135].mxu0 }
0x384c   :  { %v12113_v28 = vadd.f32 %v15787_v44, %v12110_v24 }
0x384e   :  { %12114 = vmax.xlane.f32.xlu1 %v12113_v28 }
0x3852   :  { %5359 = vadd.xlane.f32.xlu1 %v13972_v56 }
0x3856   :  { %7049 = vadd.xlane.f32.xlu1 %v13974_v11 }
0x385a   :  { %8739 = vadd.xlane.f32.xlu1 %v13976_v37 }
0x385e   :  { %10429 = vadd.xlane.f32.xlu1 %v13978_v25 }
0x38db   :  { %v12115_v52 = vpop.xlane.xlu1 %12114 }
0x38dc   :  { %v12116_v27 = vsub.f32 %v12113_v28, %v12115_v52 }
0x38de   :  { %v12117_v29 = vmul.f32 1.442695, %v12116_v27 }
0x38df   :  { %v5360_v30 = vpop.xlane.xlu1 %5359 }
0x38e0   :  { %13979 = vpow2.f32 %v12117_v29 }
0x38e1   :  { %13981 = vlog2.f32 %v5360_v30 }
0x38e3   :  { %v7050_v62 = vpop.xlane.xlu1 %7049 }
0x38e4   :  { %13983 = vlog2.f32 %v7050_v62 }
0x38e7   :  { %v8740_v44 = vpop.xlane.xlu1 %8739 }
0x38e8   :  { %13985 = vlog2.f32 %v8740_v44 }
0x38ea   :  { %v13980_v55 = vpop.eup %13979 }
0x38eb   :  { %v13982_v38 = vpop.eup %13981  ;;  %12119 = vadd.xlane.f32.xlu1 %v13980_v55  ;;  %v10430_v59 = vpop.xlane.xlu1 %10429 }
0x38ec   :  { %v5362_v1 = vmul.f32 0.6931472, %v13982_v38  ;;  %13987 = vlog2.f32 %v10430_v59 }
0x38ee   :  { %v13984_v22 = vpop.eup %13983  ;;  %v5363_v0 = vadd.f32 %v5362_v1, %v5355_v58 }
0x38ef   :  { %v7052_v63 = vmul.f32 0.6931472, %v13984_v22 }
0x38f0   :  { %v5364_v4 = vsub.f32 %v15797_v51, %v5363_v0 }
0x38f1   :  { %v7053_v2 = vadd.f32 %v7052_v63, %v7045_v36 }
0x38f2   :  { %v13986_v3 = vpop.eup %13985  ;;  %5366 = vst [vmem:[#allocation15 + $0x8] sm:$0xff] %v5364_v4 }
0x38f3   :  { %v7054_v7 = vsub.f32 %v15802_v15, %v7053_v2  ;;  %v8742_v5 = vmul.f32 0.6931472, %v13986_v3 }
0x38f5   :  { %7056 = vst [vmem:[#allocation15 + $0x10] sm:$0xff] %v7054_v7  ;;  %v8743_v32 = vadd.f32 %v8742_v5, %v8735_v14 }
0x38f6   :  { %v13988_v9 = vpop.eup %13987 }
0x38f7   :  { %v8744_v8 = vsub.f32 %v15807_v49, %v8743_v32  ;;  %v10432_v13 = vmul.f32 0.6931472, %v13988_v9 }
0x38f9   :  { %8746 = vst [vmem:[#allocation15 + $0x18] sm:$0xff] %v8744_v8  ;;  %v10433_v10 = vadd.f32 %v10432_v13, %v10425_v47 }
0x38fb   :  { %v10434_v19 = vsub.f32 %v15812_v61, %v10433_v10 }
0x38fd   :  { %10436 = vst [vmem:[#allocation15 + $0x20] sm:$0xff] %v10434_v19 }
0x3978   :  { %v12120_v33 = vpop.xlane.xlu1 %12119 }
0x3979   :  { %13989 = vlog2.f32 %v12120_v33 }
0x3983   :  { %v13990_v51 = vpop.eup %13989 }
0x3984   :  { %v12122_v20 = vmul.f32 0.6931472, %v13990_v51 }
0x3986   :  { %v12123_v21 = vadd.f32 %v12122_v20, %v12115_v52 }
0x3988   :  { %v12124_v15 = vsub.f32 %v12113_v28, %v12123_v21 }
0x398a   :  { %12126 = vst [vmem:[#allocation15 + $0x28] sm:$0xff] %v12124_v15 }
0x398b   :  { %14161 = shalt.err (!%p14158_p4)
}
0x398c   :  { %s14162_s3 = scalar_lea.hbm %s15920_s14, 768 }
0x398d   :  { %p14163_p5 = scmp.ne.s32.totalorder %s15920_s14, %s14162_s3  ;;  %p14166_p6 = scmp.lt.u32.totalorder %s14162_s3, %s15920_s14 }
0x398f   :  { %p14168_p7 = pnand %p14166_p6, %p14163_p5 }
0x3991   :  { %14171 = shalt.err (!%p14168_p7)
}
0x3992   :  { %12138 = dma.vmem_to_hbm [thread:$0]  %s12133_s21, 768, %s15920_s14, [#allocation5], %s14184_s25, %s14184_s25, %s14185_s26  }
0x3993   :  { %14180 = dma.done.wait [#allocation5], 768  }
0x3994   :  { %14181 = vsyncadd [#allocation5], 4294966528 }
0x3995   :  { %12142 = vsyncpa [#allocation4], 1 }
0x3996   :  { %12143 = vsyncpa [#allocation7], 1 }
0x3997   :  { %12144 = vsyncpa [#allocation10], 1 }
0x3998   :  { %12145 = vsyncpa [#allocation13], 1 }
0x3999   :  { %12146 = vsyncpa [#allocation5], 1 }

</bundles_post_ra>
